<compile_context>
chip_gen: v7x
topology: tpu7x:2x2x1
jax: 0.10.0
libtpu: 0.0.40
codegen_flags: <defaults>
</compile_context>

<pallas_src>
import jax
import jax.numpy as jnp
import numpy as np
from jax.experimental import pallas as pl
from jax.experimental.pallas import tpu as pltpu

LANE = 128
N_LAYERS = 4


def _round_up(x, m):
    return ((x + m - 1) // m) * m


def hgnnpv2_kernel(x_ref, g1_ref, g2_ref,
                   w0_ref, b0_ref, w1_ref, b1_ref,
                   w2_ref, b2_ref, w3_ref, b3_ref,
                   out_ref, z0_ref, z1_ref):
    """Fused 4-layer HGNN+ forward over a (N_LAYERS + 1, N // tm) grid.

    phase 0          : Z_0  = sum_t G1[:, t] @ (X_t @ W_0 + b_0)
    phase l (1..L-1) : X_t  = act_l(G2[t] @ Z_{l-1});  Z_l += G1[:, t] @ (X_t @ W_l + b_l)
    phase L          : out_t = G2[t] @ Z_{L-1}
    """
    p = pl.program_id(0)                       # phase
    t = pl.program_id(1)                       # vertex row-tile index
    zbufs = [z0_ref, z1_ref]
    w_refs = [w0_ref, w1_ref, w2_ref, w3_ref]
    b_refs = [b0_ref, b1_ref, b2_ref, b3_ref]

    def mxu(a, b):
        # bf16 MXU operands, f32 accumulation.
        return jnp.dot(a, b, preferred_element_type=jnp.float32)

    def theta_and_aggregate(x_bf16, l):
        """Z_l += G1[:, tile] @ (x @ W_l + b_l); Z_l zeroed at tile 0 of the phase."""
        zw = zbufs[l % 2]

        @pl.when(t == 0)
        def _zero():
            zw[...] = jnp.zeros_like(zw)

        y = mxu(x_bf16, w_refs[l][...]) + b_refs[l][...]        # (tm, C) f32
        zw[...] += mxu(g1_ref[...], y.astype(jnp.bfloat16))     # (M, C)  f32 accumulate

    # ---- phase 0: theta(layer 0) on the streamed X tile, start Z_0 ----
    @pl.when(p == 0)
    def _phase0():
        theta_and_aggregate(x_ref[...], 0)

    # ---- phases 1..L-1: scatter layer l-1, then theta(layer l) + aggregate Z_l ----
    for l in range(1, N_LAYERS):
        @pl.when(p == l)
        def _phase(l=l):
            zr = zbufs[(l - 1) % 2]
            xnew = mxu(g2_ref[...], zr[...].astype(jnp.bfloat16))   # (tm, C) f32
            if l == 1:                      # only layer 0 has is_last=False
                xnew = jnp.maximum(xnew, 0.0)   # ReLU; eval-mode Dropout = identity
            theta_and_aggregate(xnew.astype(jnp.bfloat16), l)

    # ---- phase L: final scatter writes the lane-dense output tile ----
    @pl.when(p == N_LAYERS)
    def _final():
        zr = zbufs[(N_LAYERS - 1) % 2]
        out_ref[...] = mxu(g2_ref[...], zr[...].astype(jnp.bfloat16))


def hgnnpv2_forward(X, G1, G2, weights, biases, num_classes, *, tm=512):
    """Fused HGNN+ forward.  weights[l]: (c_in_l, c_out_l) f32, biases[l]: (1, c_out_l) f32."""
    N, c_in = X.shape
    M = G1.shape[0]
    assert G1.shape == (M, N) and G2.shape == (N, M)
    assert len(weights) == N_LAYERS and len(biases) == N_LAYERS

    tm = min(tm, N)
    assert tm % 8 == 0 and (tm == N or (tm % LANE == 0 and N % tm == 0)), \
        "row tile must be a 128-multiple dividing N (or N itself)"
    n_tiles = N // tm
    n_phases = N_LAYERS + 1

    # ---- uniform lane-padded channel width; pad M to a sublane multiple ----
    c_u = max(_round_up(int(w.shape[1]), LANE) for w in weights)
    c_in_pad = _round_up(c_in, LANE)
    m_pad = _round_up(M, 8)

    def pad2(a, rows, cols, dtype):
        out = jnp.zeros((rows, cols), dtype)
        return out.at[:a.shape[0], :a.shape[1]].set(a.astype(dtype))

    x_p = pad2(X, N, c_in_pad, jnp.bfloat16)
    g1_p = pad2(G1, m_pad, N, jnp.bfloat16)        # padded edge rows are zero
    g2_p = pad2(G2, N, m_pad, jnp.bfloat16)        # padded edge cols are zero
    w_p, b_p = [], []
    for l, (w, b) in enumerate(zip(weights, biases)):
        rows = c_in_pad if l == 0 else c_u
        w_p.append(pad2(w, rows, c_u, jnp.bfloat16))
        b_p.append(pad2(jnp.asarray(b).reshape(1, -1), 1, c_u, jnp.float32))

    # ---- phase-gated block specs: unused phases repeat the block index -> DMA skipped ----
    x_spec = pl.BlockSpec((tm, c_in_pad), lambda p, t: (jnp.where(p == 0, t, 0), 0))
    g1_spec = pl.BlockSpec((m_pad, tm), lambda p, t: (0, jnp.where(p < N_LAYERS, t, 0)))
    g2_spec = pl.BlockSpec((tm, m_pad), lambda p, t: (jnp.where(p > 0, t, 0), 0))
    # Output block index is frozen outside the final phase so the pipeliner never
    # writes back a tile before the final-phase kernel body has filled it.
    out_spec = pl.BlockSpec((tm, c_u), lambda p, t: (jnp.where(p == N_LAYERS, t, 0), 0))

    def const_spec(shape):
        return pl.BlockSpec(shape, lambda p, t: (0, 0))    # VMEM-resident across the grid

    in_specs = [x_spec, g1_spec, g2_spec]
    for w, b in zip(w_p, b_p):
        in_specs += [const_spec(w.shape), const_spec(b.shape)]

    # ---- VMEM budget from actual buffer sizes (+headroom); capped for v7x's 64 MiB ----
    def nbytes(shape, dt):
        return int(np.prod(shape)) * jnp.dtype(dt).itemsize

    streamed = 2 * (nbytes((tm, c_in_pad), jnp.bfloat16)     # double-buffered tiles
                    + nbytes((m_pad, tm), jnp.bfloat16)
                    + nbytes((tm, m_pad), jnp.bfloat16)
                    + nbytes((tm, c_u), jnp.float32))
    resident = (sum(nbytes(w.shape, jnp.bfloat16) for w in w_p)
                + sum(nbytes(b.shape, jnp.float32) for b in b_p)
                + 2 * nbytes((m_pad, c_u), jnp.float32))     # two Z ping-pong buffers
    vmem_limit = int(min(max(2 * (streamed + resident) + (2 << 20), 8 << 20), 64 << 20))

    grid_spec = pltpu.PrefetchScalarGridSpec(
        num_scalar_prefetch=0,
        grid=(n_phases, n_tiles),
        in_specs=in_specs,
        out_specs=out_spec,
        scratch_shapes=[pltpu.VMEM((m_pad, c_u), jnp.float32),
                        pltpu.VMEM((m_pad, c_u), jnp.float32)],
    )

    out_padded = pl.pallas_call(
        hgnnpv2_kernel,
        out_shape=jax.ShapeDtypeStruct((N, c_u), jnp.float32),
        grid_spec=grid_spec,
        compiler_params=pltpu.CompilerParams(
            # Both axes carry sequential dependencies (phase order; cross-tile Z reduce).
            dimension_semantics=("arbitrary", "arbitrary"),
            vmem_limit_bytes=vmem_limit,
        ),
    )(x_p, g1_p, g2_p,
      w_p[0], b_p[0], w_p[1], b_p[1], w_p[2], b_p[2], w_p[3], b_p[3])

    return out_padded[:, :num_classes]


def build_propagation_factors(H):
    """G1 = D_e^{-1} H^T (M,N), G2 = D_v^{-1} H (N,M): hg.v2v(X,'mean') == G2 @ (G1 @ X)."""
    H = H.astype(jnp.float32)
    d_v = jnp.maximum(H.sum(axis=1), 1.0)     # (N,) vertex degrees
    d_e = jnp.maximum(H.sum(axis=0), 1.0)     # (M,) hyperedge degrees
    G1 = H.T / d_e[:, None]
    G2 = H / d_v[:, None]
    return G1, G2


def linear_init(key, fan_in, fan_out):
    """PyTorch nn.Linear default init: U(-1/sqrt(fan_in), 1/sqrt(fan_in)); W stored (in, out)."""
    kw, kb = jax.random.split(key)
    bound = 1.0 / (fan_in ** 0.5)
    W = jax.random.uniform(kw, (fan_in, fan_out), jnp.float32, -bound, bound)
    b = jax.random.uniform(kb, (1, fan_out), jnp.float32, -bound, bound)
    return W, b


if __name__ == "__main__":
    # Small shapes consistent with HGNNPv2: N vertices, M hyperedges,
    # channels Cin -> Chid -> Chid/2 -> Chid/4 -> num_classes.
    N, M = 512, 128
    Cin, Chid, num_classes = 64, 32, 8

    key = jax.random.PRNGKey(0)
    kx, k1, k2, k3, k4 = jax.random.split(key, 5)

    X = jax.random.normal(kx, (N, Cin), jnp.float32)

    # Deterministic hypergraph incidence: every vertex joins 1-3 edges, every
    # edge has nonzero degree.
    rows = jnp.arange(N)
    H = jnp.zeros((N, M), jnp.float32)
    H = H.at[rows, rows % M].set(1.0)
    H = H.at[rows, (rows // 2) % M].set(1.0)
    H = H.at[rows, (rows // 4) % M].set(1.0)
    G1, G2 = build_propagation_factors(H)

    dims = [Cin, Chid, Chid // 2, Chid // 4, num_classes]
    weights, biases = [], []
    for i, k in enumerate([k1, k2, k3, k4]):
        W, b = linear_init(k, dims[i], dims[i + 1])
        weights.append(W)
        biases.append(b)

    # tm=256 here to exercise the multi-tile accumulation / phase-gated DMA path.
    out = hgnnpv2_forward(X, G1, G2, weights, biases, num_classes, tm=256)
    out = jax.block_until_ready(out)
    assert out.shape == (N, num_classes)

    # Pure-JAX f32 reference (kernel uses bf16 MXU operands -> loose tolerance).
    def prop(Y):
        return G2 @ (G1 @ Y)
    ref = jnp.maximum(prop(X @ weights[0] + biases[0]), 0.0)   # layer 0: ReLU (+ eval dropout)
    ref = prop(ref @ weights[1] + biases[1])                   # layers 1..3: is_last=True
    ref = prop(ref @ weights[2] + biases[2])
    ref = prop(ref @ weights[3] + biases[3])
    np.testing.assert_allclose(np.asarray(out), np.asarray(ref), rtol=5e-2, atol=5e-2)

    # TODO(synk): training-mode Dropout (pltpu.prng_*) and use_bn=True BatchNorm are not
    # implemented; the module defaults (eval mode, use_bn=False) are.
    print("KERNEL_OK")
</pallas_src>

<mosaic_0001>
module attributes {stable_mosaic.version = 11 : i64} {
  func.func @hgnnpv2_kernel(%arg0: i32, %arg1: i32, %arg2: memref<256x128xbf16, #tpu.memory_space<vmem>>, %arg3: memref<128x256xbf16, #tpu.memory_space<vmem>>, %arg4: memref<256x128xbf16, #tpu.memory_space<vmem>>, %arg5: memref<128x128xbf16, #tpu.memory_space<vmem>>, %arg6: memref<1x128xf32, #tpu.memory_space<vmem>>, %arg7: memref<128x128xbf16, #tpu.memory_space<vmem>>, %arg8: memref<1x128xf32, #tpu.memory_space<vmem>>, %arg9: memref<128x128xbf16, #tpu.memory_space<vmem>>, %arg10: memref<1x128xf32, #tpu.memory_space<vmem>>, %arg11: memref<128x128xbf16, #tpu.memory_space<vmem>>, %arg12: memref<1x128xf32, #tpu.memory_space<vmem>>, %arg13: memref<256x128xf32, #tpu.memory_space<vmem>>, %arg14: memref<128x128xf32, #tpu.memory_space<vmem>>, %arg15: memref<128x128xf32, #tpu.memory_space<vmem>>) attributes {dimension_semantics = [#tpu.dimension_semantics<arbitrary>, #tpu.dimension_semantics<arbitrary>], iteration_bounds = array<i64: 5, 2>, scalar_prefetch = 0 : i64, scratch_operands = 2 : i64, tpu.core_type = #tpu.core_type<tc>, window_params = [{transform_indices = @transform_0, window_bounds = array<i64: 256, 128>}, {transform_indices = @transform_1, window_bounds = array<i64: 128, 256>}, {transform_indices = @transform_2, window_bounds = array<i64: 256, 128>}, {pipeline_mode = #tpu.pipeline_mode<synchronous>, transform_indices = @transform_3, window_bounds = array<i64: 128, 128>}, {pipeline_mode = #tpu.pipeline_mode<synchronous>, transform_indices = @transform_4, window_bounds = array<i64: 1, 128>}, {pipeline_mode = #tpu.pipeline_mode<synchronous>, transform_indices = @transform_5, window_bounds = array<i64: 128, 128>}, {pipeline_mode = #tpu.pipeline_mode<synchronous>, transform_indices = @transform_6, window_bounds = array<i64: 1, 128>}, {pipeline_mode = #tpu.pipeline_mode<synchronous>, transform_indices = @transform_7, window_bounds = array<i64: 128, 128>}, {pipeline_mode = #tpu.pipeline_mode<synchronous>, transform_indices = @transform_8, window_bounds = array<i64: 1, 128>}, {pipeline_mode = #tpu.pipeline_mode<synchronous>, transform_indices = @transform_9, window_bounds = array<i64: 128, 128>}, {pipeline_mode = #tpu.pipeline_mode<synchronous>, transform_indices = @transform_10, window_bounds = array<i64: 1, 128>}, {transform_indices = @transform_11, window_bounds = array<i64: 256, 128>}]} {
    %c0_i32 = arith.constant 0 : i32
    %0 = arith.cmpi eq, %arg0, %c0_i32 : i32
    %1 = arith.extui %0 : i1 to i32
    %c0_i32_0 = arith.constant 0 : i32
    %2 = arith.cmpi ne, %1, %c0_i32_0 : i32
    scf.if %2 {
      %c0 = arith.constant 0 : index
      %c0_5 = arith.constant 0 : index
      %15 = vector.load %arg2[%c0, %c0_5] : memref<256x128xbf16, #tpu.memory_space<vmem>>, vector<256x128xbf16>
      %c0_i32_6 = arith.constant 0 : i32
      %16 = arith.cmpi eq, %arg1, %c0_i32_6 : i32
      %17 = arith.extui %16 : i1 to i32
      %c0_i32_7 = arith.constant 0 : i32
      %18 = arith.cmpi ne, %17, %c0_i32_7 : i32
      scf.if %18 {
        %cst_19 = arith.constant 0.000000e+00 : f32
        %30 = vector.broadcast %cst_19 : f32 to vector<128x128xf32>
        %c0_20 = arith.constant 0 : index
        %c0_21 = arith.constant 0 : index
        %31 = vector.load %arg14[%c0_20, %c0_21] : memref<128x128xf32, #tpu.memory_space<vmem>>, vector<128x128xf32>
        tpu.vector_store %arg14[%c0_20, %c0_21], %30 {strides = array<i32>} : memref<128x128xf32, #tpu.memory_space<vmem>>, vector<128x128xf32>,
      } else {
      }
      %c0_8 = arith.constant 0 : index
      %c0_9 = arith.constant 0 : index
      %19 = vector.load %arg5[%c0_8, %c0_9] : memref<128x128xbf16, #tpu.memory_space<vmem>>, vector<128x128xbf16>
      %cst = arith.constant dense<0.000000e+00> : vector<256x128xf32>
      %20 = tpu.matmul %15, %19, %cst {dimension_numbers = #tpu.dot_dimension_numbers<[1], [0], [0], [1], [0, 0, 1, 1], [], []>} : vector<256x128xbf16>, vector<128x128xbf16>, vector<256x128xf32> -> vector<256x128xf32>
      %c0_10 = arith.constant 0 : index
      %c0_11 = arith.constant 0 : index
      %21 = vector.load %arg6[%c0_10, %c0_11] : memref<1x128xf32, #tpu.memory_space<vmem>>, vector<1x128xf32>
      %22 = vector.broadcast %21 : vector<1x128xf32> to vector<256x128xf32>
      %23 = arith.addf %20, %22 : vector<256x128xf32>
      %c0_12 = arith.constant 0 : index
      %c0_13 = arith.constant 0 : index
      %24 = vector.load %arg14[%c0_12, %c0_13] : memref<128x128xf32, #tpu.memory_space<vmem>>, vector<128x128xf32>
      %c0_14 = arith.constant 0 : index
      %c0_15 = arith.constant 0 : index
      %25 = vector.load %arg3[%c0_14, %c0_15] : memref<128x256xbf16, #tpu.memory_space<vmem>>, vector<128x256xbf16>
      %26 = arith.truncf %23 : vector<256x128xf32> to vector<256x128xbf16>
      %cst_16 = arith.constant dense<0.000000e+00> : vector<128x128xf32>
      %27 = tpu.matmul %25, %26, %cst_16 {dimension_numbers = #tpu.dot_dimension_numbers<[1], [0], [0], [1], [0, 0, 1, 1], [], []>} : vector<128x256xbf16>, vector<256x128xbf16>, vector<128x128xf32> -> vector<128x128xf32>
      %28 = arith.addf %24, %27 : vector<128x128xf32>
      %c0_17 = arith.constant 0 : index
      %c0_18 = arith.constant 0 : index
      %29 = vector.load %arg14[%c0_17, %c0_18] : memref<128x128xf32, #tpu.memory_space<vmem>>, vector<128x128xf32>
      tpu.vector_store %arg14[%c0_17, %c0_18], %28 {strides = array<i32>} : memref<128x128xf32, #tpu.memory_space<vmem>>, vector<128x128xf32>,
    } else {
    }
    %c1_i32 = arith.constant 1 : i32
    %3 = arith.cmpi eq, %arg0, %c1_i32 : i32
    %4 = arith.extui %3 : i1 to i32
    %c0_i32_1 = arith.constant 0 : i32
    %5 = arith.cmpi ne, %4, %c0_i32_1 : i32
    scf.if %5 {
      %c0 = arith.constant 0 : index
      %c0_5 = arith.constant 0 : index
      %15 = vector.load %arg4[%c0, %c0_5] : memref<256x128xbf16, #tpu.memory_space<vmem>>, vector<256x128xbf16>
      %c0_6 = arith.constant 0 : index
      %c0_7 = arith.constant 0 : index
      %16 = vector.load %arg14[%c0_6, %c0_7] : memref<128x128xf32, #tpu.memory_space<vmem>>, vector<128x128xf32>
      %17 = arith.truncf %16 : vector<128x128xf32> to vector<128x128xbf16>
      %cst = arith.constant dense<0.000000e+00> : vector<256x128xf32>
      %18 = tpu.matmul %15, %17, %cst {dimension_numbers = #tpu.dot_dimension_numbers<[1], [0], [0], [1], [0, 0, 1, 1], [], []>} : vector<256x128xbf16>, vector<128x128xbf16>, vector<256x128xf32> -> vector<256x128xf32>
      %cst_8 = arith.constant 0.000000e+00 : f32
      %19 = vector.broadcast %cst_8 : f32 to vector<256x128xf32>
      %20 = arith.maximumf %18, %19 : vector<256x128xf32>
      %21 = arith.truncf %20 : vector<256x128xf32> to vector<256x128xbf16>
      %c0_i32_9 = arith.constant 0 : i32
      %22 = arith.cmpi eq, %arg1, %c0_i32_9 : i32
      %23 = arith.extui %22 : i1 to i32
      %c0_i32_10 = arith.constant 0 : i32
      %24 = arith.cmpi ne, %23, %c0_i32_10 : i32
      scf.if %24 {
        %cst_23 = arith.constant 0.000000e+00 : f32
        %36 = vector.broadcast %cst_23 : f32 to vector<128x128xf32>
        %c0_24 = arith.constant 0 : index
        %c0_25 = arith.constant 0 : index
        %37 = vector.load %arg15[%c0_24, %c0_25] : memref<128x128xf32, #tpu.memory_space<vmem>>, vector<128x128xf32>
        tpu.vector_store %arg15[%c0_24, %c0_25], %36 {strides = array<i32>} : memref<128x128xf32, #tpu.memory_space<vmem>>, vector<128x128xf32>,
      } else {
      }
      %c0_11 = arith.constant 0 : index
      %c0_12 = arith.constant 0 : index
      %25 = vector.load %arg7[%c0_11, %c0_12] : memref<128x128xbf16, #tpu.memory_space<vmem>>, vector<128x128xbf16>
      %cst_13 = arith.constant dense<0.000000e+00> : vector<256x128xf32>
      %26 = tpu.matmul %21, %25, %cst_13 {dimension_numbers = #tpu.dot_dimension_numbers<[1], [0], [0], [1], [0, 0, 1, 1], [], []>} : vector<256x128xbf16>, vector<128x128xbf16>, vector<256x128xf32> -> vector<256x128xf32>
      %c0_14 = arith.constant 0 : index
      %c0_15 = arith.constant 0 : index
      %27 = vector.load %arg8[%c0_14, %c0_15] : memref<1x128xf32, #tpu.memory_space<vmem>>, vector<1x128xf32>
      %28 = vector.broadcast %27 : vector<1x128xf32> to vector<256x128xf32>
      %29 = arith.addf %26, %28 : vector<256x128xf32>
      %c0_16 = arith.constant 0 : index
      %c0_17 = arith.constant 0 : index
      %30 = vector.load %arg15[%c0_16, %c0_17] : memref<128x128xf32, #tpu.memory_space<vmem>>, vector<128x128xf32>
      %c0_18 = arith.constant 0 : index
      %c0_19 = arith.constant 0 : index
      %31 = vector.load %arg3[%c0_18, %c0_19] : memref<128x256xbf16, #tpu.memory_space<vmem>>, vector<128x256xbf16>
      %32 = arith.truncf %29 : vector<256x128xf32> to vector<256x128xbf16>
      %cst_20 = arith.constant dense<0.000000e+00> : vector<128x128xf32>
      %33 = tpu.matmul %31, %32, %cst_20 {dimension_numbers = #tpu.dot_dimension_numbers<[1], [0], [0], [1], [0, 0, 1, 1], [], []>} : vector<128x256xbf16>, vector<256x128xbf16>, vector<128x128xf32> -> vector<128x128xf32>
      %34 = arith.addf %30, %33 : vector<128x128xf32>
      %c0_21 = arith.constant 0 : index
      %c0_22 = arith.constant 0 : index
      %35 = vector.load %arg15[%c0_21, %c0_22] : memref<128x128xf32, #tpu.memory_space<vmem>>, vector<128x128xf32>
      tpu.vector_store %arg15[%c0_21, %c0_22], %34 {strides = array<i32>} : memref<128x128xf32, #tpu.memory_space<vmem>>, vector<128x128xf32>,
    } else {
    }
    %c2_i32 = arith.constant 2 : i32
    %6 = arith.cmpi eq, %arg0, %c2_i32 : i32
    %7 = arith.extui %6 : i1 to i32
    %c0_i32_2 = arith.constant 0 : i32
    %8 = arith.cmpi ne, %7, %c0_i32_2 : i32
    scf.if %8 {
      %c0 = arith.constant 0 : index
      %c0_5 = arith.constant 0 : index
      %15 = vector.load %arg4[%c0, %c0_5] : memref<256x128xbf16, #tpu.memory_space<vmem>>, vector<256x128xbf16>
      %c0_6 = arith.constant 0 : index
      %c0_7 = arith.constant 0 : index
      %16 = vector.load %arg15[%c0_6, %c0_7] : memref<128x128xf32, #tpu.memory_space<vmem>>, vector<128x128xf32>
      %17 = arith.truncf %16 : vector<128x128xf32> to vector<128x128xbf16>
      %cst = arith.constant dense<0.000000e+00> : vector<256x128xf32>
      %18 = tpu.matmul %15, %17, %cst {dimension_numbers = #tpu.dot_dimension_numbers<[1], [0], [0], [1], [0, 0, 1, 1], [], []>} : vector<256x128xbf16>, vector<128x128xbf16>, vector<256x128xf32> -> vector<256x128xf32>
      %19 = arith.truncf %18 : vector<256x128xf32> to vector<256x128xbf16>
      %c0_i32_8 = arith.constant 0 : i32
      %20 = arith.cmpi eq, %arg1, %c0_i32_8 : i32
      %21 = arith.extui %20 : i1 to i32
      %c0_i32_9 = arith.constant 0 : i32
      %22 = arith.cmpi ne, %21, %c0_i32_9 : i32
      scf.if %22 {
        %cst_22 = arith.constant 0.000000e+00 : f32
        %34 = vector.broadcast %cst_22 : f32 to vector<128x128xf32>
        %c0_23 = arith.constant 0 : index
        %c0_24 = arith.constant 0 : index
        %35 = vector.load %arg14[%c0_23, %c0_24] : memref<128x128xf32, #tpu.memory_space<vmem>>, vector<128x128xf32>
        tpu.vector_store %arg14[%c0_23, %c0_24], %34 {strides = array<i32>} : memref<128x128xf32, #tpu.memory_space<vmem>>, vector<128x128xf32>,
      } else {
      }
      %c0_10 = arith.constant 0 : index
      %c0_11 = arith.constant 0 : index
      %23 = vector.load %arg9[%c0_10, %c0_11] : memref<128x128xbf16, #tpu.memory_space<vmem>>, vector<128x128xbf16>
      %cst_12 = arith.constant dense<0.000000e+00> : vector<256x128xf32>
      %24 = tpu.matmul %19, %23, %cst_12 {dimension_numbers = #tpu.dot_dimension_numbers<[1], [0], [0], [1], [0, 0, 1, 1], [], []>} : vector<256x128xbf16>, vector<128x128xbf16>, vector<256x128xf32> -> vector<256x128xf32>
      %c0_13 = arith.constant 0 : index
      %c0_14 = arith.constant 0 : index
      %25 = vector.load %arg10[%c0_13, %c0_14] : memref<1x128xf32, #tpu.memory_space<vmem>>, vector<1x128xf32>
      %26 = vector.broadcast %25 : vector<1x128xf32> to vector<256x128xf32>
      %27 = arith.addf %24, %26 : vector<256x128xf32>
      %c0_15 = arith.constant 0 : index
      %c0_16 = arith.constant 0 : index
      %28 = vector.load %arg14[%c0_15, %c0_16] : memref<128x128xf32, #tpu.memory_space<vmem>>, vector<128x128xf32>
      %c0_17 = arith.constant 0 : index
      %c0_18 = arith.constant 0 : index
      %29 = vector.load %arg3[%c0_17, %c0_18] : memref<128x256xbf16, #tpu.memory_space<vmem>>, vector<128x256xbf16>
      %30 = arith.truncf %27 : vector<256x128xf32> to vector<256x128xbf16>
      %cst_19 = arith.constant dense<0.000000e+00> : vector<128x128xf32>
      %31 = tpu.matmul %29, %30, %cst_19 {dimension_numbers = #tpu.dot_dimension_numbers<[1], [0], [0], [1], [0, 0, 1, 1], [], []>} : vector<128x256xbf16>, vector<256x128xbf16>, vector<128x128xf32> -> vector<128x128xf32>
      %32 = arith.addf %28, %31 : vector<128x128xf32>
      %c0_20 = arith.constant 0 : index
      %c0_21 = arith.constant 0 : index
      %33 = vector.load %arg14[%c0_20, %c0_21] : memref<128x128xf32, #tpu.memory_space<vmem>>, vector<128x128xf32>
      tpu.vector_store %arg14[%c0_20, %c0_21], %32 {strides = array<i32>} : memref<128x128xf32, #tpu.memory_space<vmem>>, vector<128x128xf32>,
    } else {
    }
    %c3_i32 = arith.constant 3 : i32
    %9 = arith.cmpi eq, %arg0, %c3_i32 : i32
    %10 = arith.extui %9 : i1 to i32
    %c0_i32_3 = arith.constant 0 : i32
    %11 = arith.cmpi ne, %10, %c0_i32_3 : i32
    scf.if %11 {
      %c0 = arith.constant 0 : index
      %c0_5 = arith.constant 0 : index
      %15 = vector.load %arg4[%c0, %c0_5] : memref<256x128xbf16, #tpu.memory_space<vmem>>, vector<256x128xbf16>
      %c0_6 = arith.constant 0 : index
      %c0_7 = arith.constant 0 : index
      %16 = vector.load %arg14[%c0_6, %c0_7] : memref<128x128xf32, #tpu.memory_space<vmem>>, vector<128x128xf32>
      %17 = arith.truncf %16 : vector<128x128xf32> to vector<128x128xbf16>
      %cst = arith.constant dense<0.000000e+00> : vector<256x128xf32>
      %18 = tpu.matmul %15, %17, %cst {dimension_numbers = #tpu.dot_dimension_numbers<[1], [0], [0], [1], [0, 0, 1, 1], [], []>} : vector<256x128xbf16>, vector<128x128xbf16>, vector<256x128xf32> -> vector<256x128xf32>
      %19 = arith.truncf %18 : vector<256x128xf32> to vector<256x128xbf16>
      %c0_i32_8 = arith.constant 0 : i32
      %20 = arith.cmpi eq, %arg1, %c0_i32_8 : i32
      %21 = arith.extui %20 : i1 to i32
      %c0_i32_9 = arith.constant 0 : i32
      %22 = arith.cmpi ne, %21, %c0_i32_9 : i32
      scf.if %22 {
        %cst_22 = arith.constant 0.000000e+00 : f32
        %34 = vector.broadcast %cst_22 : f32 to vector<128x128xf32>
        %c0_23 = arith.constant 0 : index
        %c0_24 = arith.constant 0 : index
        %35 = vector.load %arg15[%c0_23, %c0_24] : memref<128x128xf32, #tpu.memory_space<vmem>>, vector<128x128xf32>
        tpu.vector_store %arg15[%c0_23, %c0_24], %34 {strides = array<i32>} : memref<128x128xf32, #tpu.memory_space<vmem>>, vector<128x128xf32>,
      } else {
      }
      %c0_10 = arith.constant 0 : index
      %c0_11 = arith.constant 0 : index
      %23 = vector.load %arg11[%c0_10, %c0_11] : memref<128x128xbf16, #tpu.memory_space<vmem>>, vector<128x128xbf16>
      %cst_12 = arith.constant dense<0.000000e+00> : vector<256x128xf32>
      %24 = tpu.matmul %19, %23, %cst_12 {dimension_numbers = #tpu.dot_dimension_numbers<[1], [0], [0], [1], [0, 0, 1, 1], [], []>} : vector<256x128xbf16>, vector<128x128xbf16>, vector<256x128xf32> -> vector<256x128xf32>
      %c0_13 = arith.constant 0 : index
      %c0_14 = arith.constant 0 : index
      %25 = vector.load %arg12[%c0_13, %c0_14] : memref<1x128xf32, #tpu.memory_space<vmem>>, vector<1x128xf32>
      %26 = vector.broadcast %25 : vector<1x128xf32> to vector<256x128xf32>
      %27 = arith.addf %24, %26 : vector<256x128xf32>
      %c0_15 = arith.constant 0 : index
      %c0_16 = arith.constant 0 : index
      %28 = vector.load %arg15[%c0_15, %c0_16] : memref<128x128xf32, #tpu.memory_space<vmem>>, vector<128x128xf32>
      %c0_17 = arith.constant 0 : index
      %c0_18 = arith.constant 0 : index
      %29 = vector.load %arg3[%c0_17, %c0_18] : memref<128x256xbf16, #tpu.memory_space<vmem>>, vector<128x256xbf16>
      %30 = arith.truncf %27 : vector<256x128xf32> to vector<256x128xbf16>
      %cst_19 = arith.constant dense<0.000000e+00> : vector<128x128xf32>
      %31 = tpu.matmul %29, %30, %cst_19 {dimension_numbers = #tpu.dot_dimension_numbers<[1], [0], [0], [1], [0, 0, 1, 1], [], []>} : vector<128x256xbf16>, vector<256x128xbf16>, vector<128x128xf32> -> vector<128x128xf32>
      %32 = arith.addf %28, %31 : vector<128x128xf32>
      %c0_20 = arith.constant 0 : index
      %c0_21 = arith.constant 0 : index
      %33 = vector.load %arg15[%c0_20, %c0_21] : memref<128x128xf32, #tpu.memory_space<vmem>>, vector<128x128xf32>
      tpu.vector_store %arg15[%c0_20, %c0_21], %32 {strides = array<i32>} : memref<128x128xf32, #tpu.memory_space<vmem>>, vector<128x128xf32>,
    } else {
    }
    %c4_i32 = arith.constant 4 : i32
    %12 = arith.cmpi eq, %arg0, %c4_i32 : i32
    %13 = arith.extui %12 : i1 to i32
    %c0_i32_4 = arith.constant 0 : i32
    %14 = arith.cmpi ne, %13, %c0_i32_4 : i32
    scf.if %14 {
      %c0 = arith.constant 0 : index
      %c0_5 = arith.constant 0 : index
      %15 = vector.load %arg4[%c0, %c0_5] : memref<256x128xbf16, #tpu.memory_space<vmem>>, vector<256x128xbf16>
      %c0_6 = arith.constant 0 : index
      %c0_7 = arith.constant 0 : index
      %16 = vector.load %arg15[%c0_6, %c0_7] : memref<128x128xf32, #tpu.memory_space<vmem>>, vector<128x128xf32>
      %17 = arith.truncf %16 : vector<128x128xf32> to vector<128x128xbf16>
      %cst = arith.constant dense<0.000000e+00> : vector<256x128xf32>
      %18 = tpu.matmul %15, %17, %cst {dimension_numbers = #tpu.dot_dimension_numbers<[1], [0], [0], [1], [0, 0, 1, 1], [], []>} : vector<256x128xbf16>, vector<128x128xbf16>, vector<256x128xf32> -> vector<256x128xf32>
      %c0_8 = arith.constant 0 : index
      %c0_9 = arith.constant 0 : index
      %19 = vector.load %arg13[%c0_8, %c0_9] : memref<256x128xf32, #tpu.memory_space<vmem>>, vector<256x128xf32>
      tpu.vector_store %arg13[%c0_8, %c0_9], %18 {strides = array<i32>} : memref<256x128xf32, #tpu.memory_space<vmem>>, vector<256x128xf32>,
    } else {
    }
    return
  }
  func.func @transform_0(%arg0: i32, %arg1: i32) -> (i32, i32) {
    %c0_i32 = arith.constant 0 : i32
    %0 = arith.cmpi eq, %arg0, %c0_i32 : i32
    %c0_i32_0 = arith.constant 0 : i32
    %1 = arith.select %0, %arg1, %c0_i32_0 : i32
    %c0_i32_1 = arith.constant 0 : i32
    %c0_i32_2 = arith.constant 0 : i32
    return %1, %c0_i32_1 : i32, i32
  }
  func.func @transform_1(%arg0: i32, %arg1: i32) -> (i32, i32) {
    %c4_i32 = arith.constant 4 : i32
    %0 = arith.cmpi slt, %arg0, %c4_i32 : i32
    %c0_i32 = arith.constant 0 : i32
    %1 = arith.select %0, %arg1, %c0_i32 : i32
    %c0_i32_0 = arith.constant 0 : i32
    %c0_i32_1 = arith.constant 0 : i32
    return %c0_i32_0, %1 : i32, i32
  }
  func.func @transform_2(%arg0: i32, %arg1: i32) -> (i32, i32) {
    %c0_i32 = arith.constant 0 : i32
    %0 = arith.cmpi sgt, %arg0, %c0_i32 : i32
    %c0_i32_0 = arith.constant 0 : i32
    %1 = arith.select %0, %arg1, %c0_i32_0 : i32
    %c0_i32_1 = arith.constant 0 : i32
    %c0_i32_2 = arith.constant 0 : i32
    return %1, %c0_i32_1 : i32, i32
  }
  func.func @transform_3(%arg0: i32, %arg1: i32) -> (i32, i32) {
    %c0_i32 = arith.constant 0 : i32
    %c0_i32_0 = arith.constant 0 : i32
    %c0_i32_1 = arith.constant 0 : i32
    return %c0_i32, %c0_i32_0 : i32, i32
  }
  func.func @transform_4(%arg0: i32, %arg1: i32) -> (i32, i32) {
    %c0_i32 = arith.constant 0 : i32
    %c0_i32_0 = arith.constant 0 : i32
    %c0_i32_1 = arith.constant 0 : i32
    return %c0_i32, %c0_i32_0 : i32, i32
  }
  func.func @transform_5(%arg0: i32, %arg1: i32) -> (i32, i32) {
    %c0_i32 = arith.constant 0 : i32
    %c0_i32_0 = arith.constant 0 : i32
    %c0_i32_1 = arith.constant 0 : i32
    return %c0_i32, %c0_i32_0 : i32, i32
  }
  func.func @transform_6(%arg0: i32, %arg1: i32) -> (i32, i32) {
    %c0_i32 = arith.constant 0 : i32
    %c0_i32_0 = arith.constant 0 : i32
    %c0_i32_1 = arith.constant 0 : i32
    return %c0_i32, %c0_i32_0 : i32, i32
  }
  func.func @transform_7(%arg0: i32, %arg1: i32) -> (i32, i32) {
    %c0_i32 = arith.constant 0 : i32
    %c0_i32_0 = arith.constant 0 : i32
    %c0_i32_1 = arith.constant 0 : i32
    return %c0_i32, %c0_i32_0 : i32, i32
  }
  func.func @transform_8(%arg0: i32, %arg1: i32) -> (i32, i32) {
    %c0_i32 = arith.constant 0 : i32
    %c0_i32_0 = arith.constant 0 : i32
    %c0_i32_1 = arith.constant 0 : i32
    return %c0_i32, %c0_i32_0 : i32, i32
  }
  func.func @transform_9(%arg0: i32, %arg1: i32) -> (i32, i32) {
    %c0_i32 = arith.constant 0 : i32
    %c0_i32_0 = arith.constant 0 : i32
    %c0_i32_1 = arith.constant 0 : i32
    return %c0_i32, %c0_i32_0 : i32, i32
  }
  func.func @transform_10(%arg0: i32, %arg1: i32) -> (i32, i32) {
    %c0_i32 = arith.constant 0 : i32
    %c0_i32_0 = arith.constant 0 : i32
    %c0_i32_1 = arith.constant 0 : i32
    return %c0_i32, %c0_i32_0 : i32, i32
  }
  func.func @transform_11(%arg0: i32, %arg1: i32) -> (i32, i32) {
    %c4_i32 = arith.constant 4 : i32
    %0 = arith.cmpi eq, %arg0, %c4_i32 : i32
    %c0_i32 = arith.constant 0 : i32
    %1 = arith.select %0, %arg1, %c0_i32 : i32
    %c0_i32_0 = arith.constant 0 : i32
    %c0_i32_1 = arith.constant 0 : i32
    return %1, %c0_i32_0 : i32, i32
  }
}

</mosaic_0001>

<bundles_post_ra>
// kernel: tpu_custom_call.1
= control target key start
LH: loop header
LB: loop body
LE: loop exit
PB: predicated region body
PF: predicated region fallthrough
CT: control target
= control target key end

     0   :  { %s7624_s0 = inlined_call_operand.hbm [shape: bf16[512,128], index: 0, kind: input, shape index: {}]   ;;  %s7625_s1 = inlined_call_operand.hbm [shape: bf16[128,512], index: 1, kind: input, shape index: {}]   ;;  %s7626_s2 = inlined_call_operand.hbm [shape: bf16[512,128], index: 2, kind: input, shape index: {}]   ;;  %s7627_s3 = inlined_call_operand.hbm [shape: bf16[128,128], index: 3, kind: input, shape index: {}]   ;;  %s7628_s4 = inlined_call_operand.vmem [shape: f32[1,128], index: 4, kind: input, shape index: {}]   ;;  %s7629_s5 = inlined_call_operand.hbm [shape: bf16[128,128], index: 5, kind: input, shape index: {}]   ;;  %s7630_s6 = inlined_call_operand.vmem [shape: f32[1,128], index: 6, kind: input, shape index: {}]   ;;  %s7631_s7 = inlined_call_operand.hbm [shape: bf16[128,128], index: 7, kind: input, shape index: {}]   ;;  %s7632_s8 = inlined_call_operand.vmem [shape: f32[1,128], index: 8, kind: input, shape index: {}]   ;;  %s7633_s9 = inlined_call_operand.hbm [shape: bf16[128,128], index: 9, kind: input, shape index: {}]   ;;  %s7634_s10 = inlined_call_operand.vmem [shape: f32[1,128], index: 10, kind: input, shape index: {}]   ;;  %s7635_s11 = inlined_call_operand.hbm [shape: f32[512,128], index: 11, kind: output, shape index: {}]  }
   0x1   :  { %7669 = sst [smem:[#allocation39_spill]] %s7624_s0 }
   0x2   :  { %7670 = sst [smem:[#allocation40_spill]] %s7625_s1 }
   0x3   :  { %7671 = sst [smem:[#allocation41_spill]] %s7626_s2 }
   0x4   :  { %7672 = sst [smem:[#allocation42_spill]] %s7627_s3 }
   0x5   :  { %7673 = sst [smem:[#allocation43_spill]] %s7628_s4 }
   0x6   :  { %7674 = sst [smem:[#allocation44_spill]] %s7629_s5 }
   0x7   :  { %7675 = sst [smem:[#allocation45_spill]] %s7630_s6 }
   0x8   :  { %7676 = sst [smem:[#allocation46_spill]] %s7631_s7 }
   0x9   :  { %7677 = sst [smem:[#allocation47_spill]] %s7632_s8 }
   0xa   :  { %7678 = sst [smem:[#allocation48_spill]] %s7634_s10 }
   0xb   :  { %7679 = sst [smem:[#allocation49_spill]] %s7635_s11 }
   0xc   :  { %16 = vsyncpa [#allocation5], 0 }
   0xd   :  { %18 = vsyncpa [#allocation5 + $0x1], 0 }
   0xe   :  { %19 = vsyncpa [#allocation8], 0 }
   0xf   :  { %21 = vsyncpa [#allocation8 + $0x1], 0 }
  0x10   :  { %22 = vsyncpa [#allocation11], 0 }
  0x11   :  { %23 = vsyncpa [#allocation14], 0 }
  0x12   :  { %24 = vsyncpa [#allocation6], 0 }
  0x13   :  { %26 = vsyncpa [#allocation6 + $0x1], 0  ;;  %s6309_s17 = smov 0   ;;  %s6311_s18 = smov 0  }
  0x14   :  { %s6313_s19 = smov 0   ;;  %s6315_s20 = smov 0  }
  0x15   :  { %s6317_s21 = smov 0   ;;  %s6319_s22 = smov 0  }
  0x16   :  { %s6321_s23 = smov 0   ;;  %s6323_s24 = smov 0  }
  0x17   :  { %s6325_s25 = smov 0   ;;  %s6327_s26 = smov 0  }
  0x18   :  { %s6329_s27 = smov 0   ;;  %s6331_s28 = smov 0  }
  0x19   :  { %s6333_s29 = smov 0   ;;  %s6335_s30 = smov 0  }
  0x1a   :  { %s6337_s12 = smov 0   ;;  %s6339_s13 = smov 0  }
  0x1b   :  { %s6341_s14 = smov 0  }
  0x1c LB: > { %7680 = sst [smem:[#allocation23_spill]] %s6164_s17  ;;  %s6395_s15 = sadd.s32 4294967295, %s6228_s14   ;;  %s6228_s14 = sphi %s6341_s14, %s32_s14   ;;  %s6224_s13 = sphi %s6339_s13, %s7790_s13   ;;  %s6220_s12 = sphi %s6337_s12, %s7789_s12   ;;  %s6216_s30 = sphi %s6335_s30, %s7788_s30   ;;  %s6212_s29 = sphi %s6333_s29, %s7787_s29   ;;  %s6208_s28 = sphi %s6331_s28, %s7786_s28   ;;  %s6204_s27 = sphi %s6329_s27, %s7785_s27   ;;  %s6200_s26 = sphi %s6327_s26, %s7784_s26   ;;  %s6196_s25 = sphi %s6325_s25, %s7783_s25   ;;  %s6192_s24 = sphi %s6323_s24, %s7782_s24   ;;  %s6188_s23 = sphi %s6321_s23, %s7772_s23   ;;  %s6184_s22 = sphi %s6319_s22, %s7781_s22   ;;  %s6180_s21 = sphi %s6317_s21, %s7780_s21   ;;  %s6176_s20 = sphi %s6315_s20, %s7770_s20   ;;  %s6172_s19 = sphi %s6313_s19, %s7779_s19   ;;  %s6168_s18 = sphi %s6311_s18, %s7778_s18   ;;  %s6164_s17 = sphi %s6309_s17, %s7769_s17  }
  0x1d   : > { %7681 = sst [smem:[#allocation24_spill]] %s6168_s18  ;;  %s4317_s16 = sadd.s32 4294967294, %s6228_s14  }
  0x1e   : > { %7682 = sst [smem:[#allocation25_spill]] %s6176_s20  ;;  %p7645_p0 = scmp.eq.s32.totalorder %s6395_s15, 0 }
  0x1f   : > { %7683 = sst [smem:[#allocation26_spill]] %s6180_s21  ;;  %p323_p1 = scmp.ne.s32.totalorder %s6172_s19, %s6168_s18 }
  0x20   : > { %7684 = sst [smem:[#allocation27_spill]] %s6184_s22  ;;  %p324_p2 = scmp.eq.s32.totalorder %s6395_s15, 9 }
  0x21   : > { %7685 = sst [smem:[#allocation28_spill]] %s6192_s24  ;;  %p329_p3 = scmp.ne.s32.totalorder %s6168_s18, %s6164_s17 }
  0x22   : > { %7686 = sst [smem:[#allocation29_spill]] %s6200_s26  ;;  %p330_p4 = scmp.eq.s32.totalorder %s4317_s16, 9 }
  0x23   : > { %7687 = sst [smem:[#allocation30_spill]] %s6204_s27  ;;  %p6405_p5 = por %p324_p2, %p323_p1 }
  0x24   : > { %7688 = sst [smem:[#allocation31_spill]] %s6212_s29  ;;  %p4318_p6 = scmp.ge.s32.totalorder %s6228_s14, 1 }
  0x25   : > { %7689 = sst [smem:[#allocation32_spill]] %s6216_s30  ;;  %p6410_p7 = por %p330_p4, %p329_p3 }
  0x26   : > { %7690 = sst [smem:[#allocation33_spill]] %s6395_s15  ;;  %p337_p8 = scmp.lt.s32.totalorder %s6228_s14, 11 }
  0x27   : > { %s7691_s10 = scalar_select %p6405_p5, 1, 0 }
  0x28   : > { %s7693_s8 = scalar_select %p6410_p7, 1, 0 }
  0x29   : > { %7692 = sst [smem:[#allocation34_spill]] %s7691_s10  ;;  %p6415_p9 = pnand %p4318_p6, %p337_p8 }
  0x2a   : > { %7694 = sst [smem:[#allocation35_spill]] %s7693_s8  ;;  %s6230_s11 = smov [#allocation10]  }
  0x2b   : > { %s7695_s6 = scalar_select %p6415_p9, 1, 0 }
  0x2c   : > { %s349_s4 = sshll.u32 %s6230_s11, 4  ;;  %p5460_p10 = pneg %p6415_p9  ;;  %s350_s4 = int_to_ptr.vmem [resolvable:$true] %s349_s4 }
  0x2d   : > { %7696 = sst [smem:[#allocation36_spill]] %s7695_s6  ;;  %s6231_s17 = smov [#allocation13]  }
  0x2e   : > { %p6423_p11 = pnand %p5460_p10, %p7645_p0  ;;  %s381_s10 = sshll.u32 %s6231_s17, 4  ;;  %s6427_s10 = int_to_ptr.vmem [resolvable:$true] %s381_s10 }
  0x2f   : > { %s7698_s3 = sld [smem:[#allocation42_spill]] }
  0x30   : > { %s7697_s16 = scalar_select %p6423_p11, 1, 0 }
  0x31   : > { %p6437_p13 = pneg %p6423_p11 }
  0x35   : > { %s5840_s30 = scalar_lea.hbm %s7698_s3, 1024 }
  0x36   : > { %p5841_p12 = scmp.ne.s32.totalorder %s7698_s3, %s5840_s30  ;;  %p5847_p3 = scmp.lt.u32.totalorder %s5840_s30, %s7698_s3 }
  0x38   : > { %p5843_p1 = pnand %p6437_p13, %p5841_p12 }
  0x3a   : > { %p5844_p2 = pneg %p5843_p1 }
  0x3c   : > { %p5849_p4 = pnand %p5847_p3, %p5844_p2 }
  0x3e   : > { %5852 = shalt.err (!%p5849_p4)
}
  0x3f   : > { %s5853_s8 = scalar_lea.vmem %s350_s4, 1024  ;;  %p5861_p0 = scmp.lt.s32.totalorder %s350_s4, %s350_s4 }
  0x40   : > { %p5854_p6 = scmp.ne.s32.totalorder %s350_s4, %s5853_s8  ;;  %p5862_p7 = scmp.lt.s32.totalorder %s5853_s8, %s5853_s8 }
  0x42   : > { %p5856_p8 = pnand %p5854_p6, %p6437_p13  ;;  %p5863_p5 = por %p5862_p7, %p5861_p0 }
  0x44   : > { %p5857_p10 = pneg %p5856_p8 }
  0x46   : > { %p5864_p9 = pnand %p5863_p5, %p5857_p10 }
  0x48   : > { %5867 = shalt.err (!%p5864_p9)
}
  0x49   : > { %s7651_s2 = smov 64   ;;  %s7653_s18 = smov 4  }
  0x4a   : > { %5463 = dma.hbm_to_vmem [thread:$0]  (!%p6423_p11), %s7698_s3, 1024, %s350_s4, [#allocation11], %s7651_s2, %s7651_s2, %s7653_s18  }
  0x4b   : > { %s7700_s7 = sld [smem:[#allocation46_spill]] }
  0x51   : > { %s5868_s20 = scalar_lea.hbm %s7700_s7, 1024 }
  0x52   : > { %p5869_p0 = scmp.ne.s32.totalorder %s7700_s7, %s5868_s20  ;;  %p5875_p9 = scmp.lt.u32.totalorder %s5868_s20, %s7700_s7 }
  0x54   : > { %p5871_p5 = pnand %p5869_p0, %p6437_p13 }
  0x56   : > { %p5872_p7 = pneg %p5871_p5 }
  0x58   : > { %p5877_p12 = pnand %p5875_p9, %p5872_p7 }
  0x5a   : > { %5880 = shalt.err (!%p5877_p12)
}
  0x5b   : > { %s5881_s4 = scalar_lea.vmem %s6427_s10, 1024  ;;  %p5889_p4 = scmp.lt.s32.totalorder %s6427_s10, %s6427_s10 }
  0x5c   : > { %p5882_p1 = scmp.ne.s32.totalorder %s6427_s10, %s5881_s4  ;;  %p5890_p6 = scmp.lt.s32.totalorder %s5881_s4, %s5881_s4 }
  0x5e   : > { %p5884_p2 = pnand %p5882_p1, %p6437_p13  ;;  %p5891_p8 = por %p5890_p6, %p5889_p4 }
  0x60   : > { %p5885_p3 = pneg %p5884_p2 }
  0x62   : > { %p5892_p10 = pnand %p5891_p8, %p5885_p3 }
  0x64   : > { %5895 = shalt.err (!%p5892_p10)
}
  0x65   : > { %5469 = dma.hbm_to_vmem [thread:$0]  (!%p6423_p11), %s7700_s7, 1024, %s6427_s10, [#allocation14], %s7651_s2, %s7651_s2, %s7653_s18  }
  0x66   : > { %s41_s21 = sadd.s32 1, %s6220_s12  ;;  %s44_s22 = sadd.s32 1, %s6224_s13 }
  0x67   : > { %p42_p0 = scmp.ge.s32.totalorder %s41_s21, 2  ;;  %p7663_p5 = scmp.eq.s32.totalorder %s6228_s14, 0 }
  0x68   : > { %p78_p7 = scmp.lt.s32.totalorder %s6224_s13, 4  ;;  %s85_s6 = sadd.s32 1, %s6196_s25 }
  0x69   : > { %s7792_s21 = smov (%p42_p0, %s41_s21), 0  ;;  %s7794_s22 = smov (!%p42_p0, %s44_s22), %s6224_s13 }
  0x6a   : > { %s79_s29 = scalar_select %p78_p7, %s6220_s12, 0 }
  0x6b   : > { %p46_p9 = scmp.ge.s32.totalorder %s7794_s22, 5  ;;  %p92_p12 = scmp.ne.s32.totalorder %s6196_s25, %s6192_s24 }
  0x6c   : > { %p98_p1 = scmp.ne.s32.totalorder %s6192_s24, %s6188_s23  ;;  %p306_p2 = scmp.eq.s32.totalorder %s6224_s13, 4 }
  0x6d   : > { %s7796_s22 = smov (%p46_p9, %s7794_s22), 0  ;;  %p6500_p3 = por %p92_p12, %p7663_p5 }
  0x6e   : > { %p7702_p4 = scmp.eq.s32.totalorder %s6395_s15, 0  ;;  %p80_p8 = scmp.lt.s32.totalorder %s7796_s22, 4 }
  0x6f   : > { %p308_p10 = scmp.eq.s32.totalorder %s7796_s22, 4  ;;  %p7662_p0 = scmp.lt.s32.totalorder %s6228_s14, 10 }
  0x70   : > { %p6506_p6 = por %p98_p1, %p7702_p4  ;;  %s437_s20 = sand.u32 1, %s6228_s14  }
  0x71   : > { %s307_s23 = scalar_select %p306_p2, %s6220_s12, 0 }
  0x72   : > { %s7703_s30 = scalar_select %p6506_p6, 1, 0 }
  0x73   : > { %s81_s17 = scalar_select %p80_p8, %s7792_s21, 0 }
  0x74   : > { %7704 = sst [smem:[#allocation37_spill]] %s7703_s30  ;;  %s7706_s18 = sadd.s32 1, %s6172_s19 }
  0x75   : > { %s309_s8 = scalar_select %p308_p10, %s7792_s21, 0 }
  0x76   : > { %s82_s4 = ssub.s32 %s79_s29, %s81_s17  ;;  %s439_s7 = sand.u32 1, %s6196_s25  }
  0x77   : > { %p83_p7 = scmp.eq.s32.totalorder %s82_s4, 0  ;;  %s310_s0 = ssub.s32 %s307_s23, %s309_s8 }
  0x78   : > { %p311_p9 = scmp.eq.s32.totalorder %s310_s0, 0  ;;  %s4327_s30 = sshll.u32 %s439_s7, 7 }
  0x79   : > { %s6518_s2 = scalar_select %p83_p7, %s6196_s25, %s85_s6  }
  0x7a   : > { %s6523_s3 = scalar_select %p311_p9, %s6172_s19, %s7706_s18  }
  0x7b   : > { %7705 = sst [smem:[#allocation38_spill]] %s6518_s2  ;;  %s4537_s24 = sshll.u32 %s79_s29, 7 }
  0x7c   : > { %s7707_s1 = sld [smem:[#allocation40_spill]]  ;;  %s441_s23 = scalar_lea.vmem [#allocation7], %s4327_s30 }
  0x7d   : > { %s450_s17 = sshll.u32 %s441_s23, 4  ;;  %p6535_p12 = pnand %p7662_p0, %p6500_p3  ;;  %s6539_s17 = int_to_ptr.vmem [resolvable:$true] %s450_s17 }
  0x7e   : > { %s6541_s7 = scalar_lea.sflag [#allocation8], %s437_s20 }
  0x7f   : > { %p5898_p2 = pneg %p6535_p12 }
  0x82   : > { %s6529_s27 = scalar_lea.hbm %s7707_s1, %s4537_s24  ;;  %s5901_s18 = scalar_lea.hbm %s7707_s1, 4096 }
  0x83   : > { %s5896_s24 = scalar_lea.hbm %s6529_s27, 2048  ;;  %p5902_p3 = scmp.lt.u32.totalorder %s6529_s27, %s7707_s1 }
  0x84   : > { %p5897_p1 = scmp.ne.s32.totalorder %s6529_s27, %s5896_s24  ;;  %p5903_p10 = scmp.lt.u32.totalorder %s5901_s18, %s5896_s24 }
  0x85   : > { %p5905_p9 = scmp.lt.u32.totalorder %s5896_s24, %s6529_s27 }
  0x86   : > { %p5899_p4 = pnand %p5898_p2, %p5897_p1  ;;  %p5904_p7 = por %p5903_p10, %p5902_p3 }
  0x88   : > { %p5900_p8 = pneg %p5899_p4  ;;  %p5906_p0 = por %p5905_p9, %p5904_p7 }
  0x8a   : > { %p5907_p5 = pnand %p5906_p0, %p5900_p8 }
  0x8c   : > { %5910 = shalt.err (!%p5907_p5)
}
  0x8d   : > { %s5911_s30 = scalar_lea.vmem %s6539_s17, 2048  ;;  %s6234_s8 = smov [#allocation7]  }
  0x8e   : > { %p5912_p1 = scmp.ne.s32.totalorder %s6539_s17, %s5911_s30  ;;  %s5916_s4 = sshll.u32 %s6234_s8, 4  ;;  %s5917_s4 = int_to_ptr.vmem [resolvable:$false] %s5916_s4 }
  0x8f   : > { %s5918_s0 = scalar_lea.vmem %s5917_s4, 4096  ;;  %p5919_p11 = scmp.lt.s32.totalorder %s6539_s17, %s5917_s4 }
  0x90   : > { %p5914_p4 = pnand %p5912_p1, %p5898_p2  ;;  %p5920_p3 = scmp.lt.s32.totalorder %s5918_s0, %s5911_s30 }
  0x92   : > { %p5915_p6 = pneg %p5914_p4  ;;  %p5921_p10 = por %p5920_p3, %p5919_p11 }
  0x94   : > { %p5922_p7 = pnand %p5921_p10, %p5915_p6 }
  0x96   : > { %5925 = shalt.err (!%p5922_p7)
}
  0x97   : > { %s6235_s20 = smov 256   ;;  %s6236_s23 = smov 128  }
  0x98   : > { %s6237_s24 = smov 8   ;;  %s6238_s26 = smov [#allocation12]  }
  0x99   : > { %5479 = dma.hbm_to_vmem [thread:$0]  (!%p6535_p12), %s6529_s27, 2048, %s6539_s17, %s6541_s7, %s6235_s20, %s6236_s23, %s6237_s24  }
  0x9a   : > { %s365_s15 = sshll.u32 %s6238_s26, 4  ;;  %s6239_s18 = smov [#allocation15]   ;;  %s366_s15 = int_to_ptr.vmem [resolvable:$true] %s365_s15 }
  0x9b   : > { %s397_s29 = sshll.u32 %s6239_s18, 4  ;;  %s7709_s5 = sld [smem:[#allocation44_spill]]  ;;  %s398_s29 = int_to_ptr.vmem [resolvable:$true] %s397_s29 }
  0xa1   : > { %s5926_s8 = scalar_lea.hbm %s7709_s5, 1024 }
  0xa2   : > { %p5927_p11 = scmp.ne.s32.totalorder %s7709_s5, %s5926_s8  ;;  %p5933_p0 = scmp.lt.u32.totalorder %s5926_s8, %s7709_s5 }
  0xa4   : > { %p5929_p5 = pnand %p5927_p11, %p6437_p13 }
  0xa6   : > { %p5930_p6 = pneg %p5929_p5 }
  0xa8   : > { %p5935_p12 = pnand %p5933_p0, %p5930_p6 }
  0xaa   : > { %5938 = shalt.err (!%p5935_p12)
}
  0xab   : > { %s5939_s27 = scalar_lea.vmem %s366_s15, 1024  ;;  %p5947_p1 = scmp.lt.s32.totalorder %s366_s15, %s366_s15 }
  0xac   : > { %p5940_p2 = scmp.ne.s32.totalorder %s366_s15, %s5939_s27  ;;  %p5948_p4 = scmp.lt.s32.totalorder %s5939_s27, %s5939_s27 }
  0xae   : > { %p5942_p8 = pnand %p5940_p2, %p6437_p13  ;;  %p5949_p3 = por %p5948_p4, %p5947_p1 }
  0xb0   : > { %p5943_p9 = pneg %p5942_p8 }
  0xb2   : > { %p5950_p10 = pnand %p5949_p3, %p5943_p9 }
  0xb4   : > { %5953 = shalt.err (!%p5950_p10)
}
  0xb5   : > { %p7710_p7 = scmp.ne.s32.totalorder %s7697_s16, 0  ;;  %s7711_s17 = smov 4  }
  0xb6   : > { %s7712_s6 = smov 64   ;;  %s5954_s24 = scalar_lea.hbm %s7633_s9, 1024 }
  0xb7   : > { %5466 = dma.hbm_to_vmem [thread:$0]  (!%p7710_p7), %s7709_s5, 1024, %s366_s15, [#allocation11], %s7712_s6, %s7712_s6, %s7711_s17  }
  0xb8   : > { %p5955_p11 = scmp.ne.s32.totalorder %s7633_s9, %s5954_s24  ;;  %p5961_p0 = scmp.lt.u32.totalorder %s5954_s24, %s7633_s9 }
  0xba   : > { %p5957_p5 = pnand %p5955_p11, %p6437_p13 }
  0xbc   : > { %p5958_p6 = pneg %p5957_p5 }
  0xbe   : > { %p5963_p12 = pnand %p5961_p0, %p5958_p6 }
  0xc0   : > { %5966 = shalt.err (!%p5963_p12)
}
  0xc1   : > { %s5967_s8 = scalar_lea.vmem %s398_s29, 1024  ;;  %p5975_p1 = scmp.lt.s32.totalorder %s398_s29, %s398_s29 }
  0xc2   : > { %p5968_p2 = scmp.ne.s32.totalorder %s398_s29, %s5967_s8  ;;  %p5976_p4 = scmp.lt.s32.totalorder %s5967_s8, %s5967_s8 }
  0xc4   : > { %p5970_p8 = pnand %p5968_p2, %p6437_p13  ;;  %p5977_p3 = por %p5976_p4, %p5975_p1 }
  0xc6   : > { %p5971_p9 = pneg %p5970_p8 }
  0xc8   : > { %p5978_p10 = pnand %p5977_p3, %p5971_p9 }
  0xca   : > { %5981 = shalt.err (!%p5978_p10)
}
  0xcb   : > { %s7713_s11 = sld [smem:[#allocation30_spill]]  ;;  %s7714_s0 = sld [smem:[#allocation29_spill]] }
  0xcc   : > { %s7715_s27 = sld [smem:[#allocation33_spill]]  ;;  %p48_p13 = scmp.eq.s32.totalorder %s6224_s13, 0 }
  0xcd   : > { %5472 = dma.hbm_to_vmem [thread:$0]  (!%p7710_p7), %s7633_s9, 1024, %s398_s29, [#allocation14], %s7712_s6, %s7712_s6, %s7711_s17  }
  0xce   : > { %p50_p11 = scmp.eq.s32.totalorder %s7796_s22, 0  ;;  %s55_s16 = sadd.s32 1, %s6208_s28 }
  0xcf   : > { %s49_s1 = scalar_select %p48_p13, %s6220_s12, 0 }
  0xd0   : > { %s51_s2 = scalar_select %p50_p11, %s7792_s21, 0 }
  0xd1   : > { %p62_p5 = scmp.ne.s32.totalorder %s6208_s28, %s7713_s11  ;;  %p68_p6 = scmp.ne.s32.totalorder %s7713_s11, %s7714_s0 }
  0xd2   : > { %s52_s20 = ssub.s32 %s49_s1, %s51_s2  ;;  %s414_s23 = sand.u32 1, %s6208_s28  }
  0xd3   : > { %p53_p0 = scmp.eq.s32.totalorder %s52_s20, 0  ;;  %p7716_p12 = scmp.eq.s32.totalorder %s6228_s14, 0 }
  0xd4   : > { %p7717_p8 = scmp.eq.s32.totalorder %s7715_s27, 0  ;;  %s4324_s29 = sshll.u32 %s414_s23, 7 }
  0xd5   : > { %p64_p2 = por %p7716_p12, %p62_p5  ;;  %s4536_s18 = sshll.u32 %s49_s1, 11 }
  0xd6   : > { %p6625_p9 = por %p7717_p8, %p68_p6  ;;  %s7719_s8 = sld [smem:[#allocation39_spill]] }
  0xd7   : > { %s6630_s26 = scalar_select %p53_p0, %s6208_s28, %s55_s16  }
  0xd8   : > { %s418_s4 = scalar_lea.vmem [#allocation4], %s4324_s29  ;;  %p7720_p7 = scmp.lt.s32.totalorder %s6228_s14, 10 }
  0xd9   : > { %s427_s11 = sshll.u32 %s418_s4, 4  ;;  %s6645_s16 = scalar_lea.sflag [#allocation5], %s414_s23  ;;  %s6643_s11 = int_to_ptr.vmem [resolvable:$true] %s427_s11 }
  0xda   : > { %p6639_p1 = pnand %p7720_p7, %p64_p2 }
  0xdc   : > { %s6635_s15 = scalar_lea.hbm %s7719_s8, %s4536_s18  ;;  %p5984_p3 = pneg %p6639_p1 }
  0xdd   : > { %s5982_s1 = scalar_lea.hbm %s6635_s15, 2048  ;;  %s5987_s29 = scalar_lea.hbm %s7719_s8, 4096 }
  0xde   : > { %p5983_p4 = scmp.ne.s32.totalorder %s6635_s15, %s5982_s1  ;;  %p5988_p11 = scmp.lt.u32.totalorder %s6635_s15, %s7719_s8 }
  0xdf   : > { %p5989_p5 = scmp.lt.u32.totalorder %s5987_s29, %s5982_s1  ;;  %p5991_p0 = scmp.lt.u32.totalorder %s5982_s1, %s6635_s15 }
  0xe0   : > { %p5985_p10 = pnand %p5984_p3, %p5983_p4 }
  0xe1   : > { %p5990_p6 = por %p5989_p5, %p5988_p11 }
  0xe2   : > { %p5986_p13 = pneg %p5985_p10 }
  0xe3   : > { %p5992_p12 = por %p5991_p0, %p5990_p6 }
  0xe5   : > { %p5993_p2 = pnand %p5992_p12, %p5986_p13 }
  0xe7   : > { %5996 = shalt.err (!%p5993_p2)
}
  0xe8   : > { %s5997_s23 = scalar_lea.vmem %s6643_s11, 2048  ;;  %s6240_s30 = smov [#allocation4]  }
  0xe9   : > { %p5998_p8 = scmp.ne.s32.totalorder %s6643_s11, %s5997_s23  ;;  %s6002_s4 = sshll.u32 %s6240_s30, 4  ;;  %s6003_s4 = int_to_ptr.vmem [resolvable:$false] %s6002_s4 }
  0xea   : > { %s6004_s2 = scalar_lea.vmem %s6003_s4, 4096  ;;  %p6005_p10 = scmp.lt.s32.totalorder %s6643_s11, %s6003_s4 }
  0xeb   : > { %p6000_p7 = pnand %p5998_p8, %p5984_p3  ;;  %p6006_p11 = scmp.lt.s32.totalorder %s6004_s2, %s5997_s23 }
  0xed   : > { %p6001_p4 = pneg %p6000_p7  ;;  %p6007_p5 = por %p6006_p11, %p6005_p10 }
  0xef   : > { %p6008_p6 = pnand %p6007_p5, %p6001_p4 }
  0xf1   : > { %6011 = shalt.err (!%p6008_p6)
}
  0xf2   : > { %s7722_s1 = sld [smem:[#allocation27_spill]]  ;;  %s7723_s20 = sld [smem:[#allocation26_spill]] }
  0xf3   : > { %s7724_s29 = sld [smem:[#allocation25_spill]]  ;;  %p108_p3 = scmp.gt.s32.totalorder %s6224_s13, 0 }
  0xf4   : > { %5476 = dma.hbm_to_vmem [thread:$0]  (!%p6639_p1), %s6635_s15, 2048, %s6643_s11, %s6645_s16, %s7712_s6, %s7712_s6, %s7711_s17  }
  0xf5   : > { %p110_p13 = scmp.gt.s32.totalorder %s7796_s22, 0  ;;  %p7725_p12 = scmp.eq.s32.totalorder %s6228_s14, 0 }
  0xf6   : > { %s109_s18 = scalar_select %p108_p3, %s6220_s12, 0 }
  0xf7   : > { %s111_s10 = scalar_select %p110_p13, %s7792_s21, 0 }
  0xf8   : > { %s115_s0 = sadd.s32 1, %s7722_s1  ;;  %p122_p0 = scmp.ne.s32.totalorder %s7722_s1, %s7723_s20 }
  0xf9   : > { %p128_p8 = scmp.ne.s32.totalorder %s7723_s20, %s7724_s29  ;;  %s112_s23 = ssub.s32 %s109_s18, %s111_s10 }
  0xfa   : > { %p124_p2 = por %p122_p0, %p7725_p12  ;;  %s462_s30 = sand.u32 1, %s7722_s1  }
  0xfb   : > { %p113_p7 = scmp.eq.s32.totalorder %s112_s23, 0  ;;  %p7726_p4 = scmp.eq.s32.totalorder %s7715_s27, 0 }
  0xfc   : > { %s4330_s2 = sshll.u32 %s462_s30, 7  ;;  %s4538_s15 = sshll.u32 %s109_s18, 11 }
  0xfd   : > { %p6690_p10 = por %p128_p8, %p7726_p4  ;;  %s7798_s1 = smov (!%p113_p7, %s7722_s1), %s115_s0 }
  0xfe   : > { %s7728_s5 = sld [smem:[#allocation41_spill]]  ;;  %s464_s20 = scalar_lea.vmem [#allocation9], %s4330_s2 }
  0xff   : > { %s7727_s4 = scalar_select %p6690_p10, 1, 0 }
 0x100   : > { %s473_s29 = sshll.u32 %s464_s20, 4  ;;  %p7729_p1 = scmp.lt.s32.totalorder %s6228_s14, 10  ;;  %s6708_s29 = int_to_ptr.vmem [resolvable:$true] %s473_s29 }
 0x102   : > { %p6704_p11 = pnand %p7729_p1, %p124_p2 }
 0x104   : > { %s6700_s8 = scalar_lea.hbm %s7728_s5, %s4538_s15  ;;  %p6014_p6 = pneg %p6704_p11 }
 0x105   : > { %s6012_s0 = scalar_lea.hbm %s6700_s8, 2048  ;;  %s6017_s23 = scalar_lea.hbm %s7728_s5, 4096 }
 0x106   : > { %p6013_p5 = scmp.ne.s32.totalorder %s6700_s8, %s6012_s0  ;;  %p6018_p0 = scmp.lt.u32.totalorder %s6700_s8, %s7728_s5 }
 0x107   : > { %p6019_p12 = scmp.lt.u32.totalorder %s6017_s23, %s6012_s0  ;;  %p6021_p8 = scmp.lt.u32.totalorder %s6012_s0, %s6700_s8 }
 0x108   : > { %p6015_p3 = pnand %p6014_p6, %p6013_p5 }
 0x109   : > { %p6020_p2 = por %p6019_p12, %p6018_p0 }
 0x10a   : > { %p6016_p13 = pneg %p6015_p3 }
 0x10b   : > { %p6022_p7 = por %p6021_p8, %p6020_p2 }
 0x10d   : > { %p6023_p4 = pnand %p6022_p7, %p6016_p13 }
 0x10f   : > { %6026 = shalt.err (!%p6023_p4)
}
 0x110   : > { %s6027_s15 = scalar_lea.vmem %s6708_s29, 2048  ;;  %s6241_s11 = smov [#allocation9]  }
 0x111   : > { %p6028_p1 = scmp.ne.s32.totalorder %s6708_s29, %s6027_s15  ;;  %s6032_s16 = sshll.u32 %s6241_s11, 4  ;;  %s6033_s16 = int_to_ptr.vmem [resolvable:$false] %s6032_s16 }
 0x112   : > { %s6034_s20 = scalar_lea.vmem %s6033_s16, 4096  ;;  %p6035_p10 = scmp.lt.s32.totalorder %s6708_s29, %s6033_s16 }
 0x113   : > { %p6030_p5 = pnand %p6028_p1, %p6014_p6  ;;  %p6036_p0 = scmp.lt.s32.totalorder %s6034_s20, %s6027_s15 }
 0x115   : > { %p6031_p3 = pneg %p6030_p5  ;;  %p6037_p12 = por %p6036_p0, %p6035_p10 }
 0x117   : > { %p6038_p2 = pnand %p6037_p12, %p6031_p3 }
 0x119   : > { %6041 = shalt.err (!%p6038_p2)
}
 0x11a   : > { %5482 = dma.hbm_to_vmem [thread:$0]  (!%p6704_p11), %s6700_s8, 2048, %s6708_s29, %s6541_s7, %s7712_s6, %s7712_s6, %s7711_s17  }
 0x11b   : > { %s7731_s0 = sld [smem:[#allocation36_spill]] }
 0x121   : > { %p7732_p6 = scmp.ne.s32.totalorder %s7731_s0, 0 }
 0x122   : > { %s7733_s18 = sld [smem:[#allocation30_spill]] (!%p7732_p6) }
 0x123   : > { %485 = sbr.rel (%p7732_p6) target bundleno = 3882 (0xf2a), region = 64 }
 0x128   : > { %s487_s10 = sand.u32 (!%p7732_p6), 1, %s7733_s18  }
 0x129   : > { %s4334_s23 = sshll.u32 (!%p7732_p6), %s487_s10, 7  ;;  %s488_s30 = scalar_lea.sflag (!%p7732_p6), [#allocation5], %s487_s10 }
 0x12a   : > { %s6742_s2 = scalar_lea.vmem [#allocation4], %s4334_s23 }
 0x12b   : > { %6139 = dma.done.wait (%p6625_p9), %s488_s30, 2048  }
 0x12c   : > { %6141 = vsyncadd (%p6625_p9), %s488_s30, 4294965248  ;;  %s7734_s27 = sld [smem:[#allocation33_spill]]  ;;  %s7736_s11 = sld [smem:[#allocation37_spill]] }
 0x12d   : > { %s7735_s15 = sld [smem:[#allocation28_spill]] }
 0x132   : > { %s496_s16 = sand.u32 1, %s7734_s27   ;;  %p7737_p10 = scmp.ne.s32.totalorder %s7736_s11, 0 }
 0x133   : > { %s498_s7 = sand.u32 1, %s7735_s15   ;;  %s497_s6 = scalar_lea.sflag [#allocation8], %s496_s16 }
 0x134   : > { %s4335_s17 = sshll.u32 %s498_s7, 7 }
 0x135   : > { %s6750_s8 = scalar_lea.vmem [#allocation7], %s4335_s17 }
 0x136   : > { %6143 = dma.done.wait (%p7737_p10), %s497_s6, 2048  }
 0x137   : > { %6145 = vsyncadd (%p7737_p10), %s497_s6, 4294965248  ;;  %s7738_s29 = sld [smem:[#allocation26_spill]]  ;;  %p7739_p9 = scmp.ne.s32.totalorder %s7727_s4, 0 }
 0x13d   : > { %s507_s20 = sand.u32 1, %s7738_s29  }
 0x13e   : > { %s4336_s0 = sshll.u32 %s507_s20, 7 }
 0x13f   : > { %s6757_s24 = scalar_lea.vmem [#allocation9], %s4336_s0 }
 0x140   : > { %6147 = dma.done.wait (%p7739_p9), %s497_s6, 2048  }
 0x141   : > { %6149 = vsyncadd (%p7739_p9), %s497_s6, 4294965248  ;;  %p7740_p11 = scmp.eq.s32.totalorder %s7734_s27, 0 }
 0x143   : > { %6151 = dma.done.wait (%p7740_p11), [#allocation11], 2048   ;;  %p7741_p13 = pmov %p7740_p11 }
 0x144   : > { %p7742_p8 = pmov %p7740_p11 }
 0x145   : > { %6153 = vsyncadd (%p7741_p13), [#allocation11], 4294965248 }
 0x146   : > { %6155 = dma.done.wait (%p7742_p8), [#allocation14], 2048   ;;  %p7743_p7 = pmov %p7742_p8 }
 0x147   : > { %s7744_s18 = sld [smem:[#allocation24_spill]]  ;;  %s7745_s4 = sld [smem:[#allocation32_spill]] }
 0x148   : > { %6157 = vsyncadd (%p7743_p7), [#allocation14], 4294965248 }
 0x14d   : > { %s571_s10 = sand.u32 1, %s7744_s18   ;;  %p4342_p4 = scmp.ne.s32.totalorder %s7745_s4, 0 }
 0x14e   : > { %s4341_s23 = sshll.u32 %s571_s10, 8  ;;  %v591_v0 = vld [vmem:[%s6742_s2] sm:$0xf] (!%p4342_p4)  ;;  %v592_v1 = vld [vmem:[%s6742_s2 + $0x4] sm:$0xf] (!%p4342_p4)  ;;  %s7746_s27 = sld [smem:[#allocation31_spill]] (!%p4342_p4) }
 0x14f   : > { %s6774_s30 = scalar_lea.vmem [#allocation16], %s4341_s23  ;;  %590 = sbr.rel (%p4342_p4) target bundleno = 947 (0x3b3), region = 96  ;;  %v6780_v2 = vld [vmem:[%s6742_s2 + $0x8] sm:$0xf] (!%p4342_p4)  ;;  %v6783_v3 = vld [vmem:[%s6742_s2 + $0xc] sm:$0xf] (!%p4342_p4) }
 0x150   : > { %v6786_v4 = vld [vmem:[%s6742_s2 + $0x10] sm:$0xf] (!%p4342_p4)  ;;  %v6789_v5 = vld [vmem:[%s6742_s2 + $0x14] sm:$0xf] (!%p4342_p4)  ;;  %v6792_v6 = vld [vmem:[%s6742_s2 + $0x18] sm:$0xf] (!%p4342_p4) }
 0x151   : > { %v6795_v7 = vld [vmem:[%s6742_s2 + $0x1c] sm:$0xf] (!%p4342_p4)  ;;  %v6798_v8 = vld [vmem:[%s6742_s2 + $0x20] sm:$0xf] (!%p4342_p4)  ;;  %v6801_v9 = vld [vmem:[%s6742_s2 + $0x24] sm:$0xf] (!%p4342_p4) }
 0x152   : > { %v6804_v10 = vld [vmem:[%s6742_s2 + $0x28] sm:$0xf] (!%p4342_p4)  ;;  %v6807_v11 = vld [vmem:[%s6742_s2 + $0x2c] sm:$0xf] (!%p4342_p4)  ;;  %v6810_v12 = vld [vmem:[%s6742_s2 + $0x30] sm:$0xf] (!%p4342_p4) }
 0x153   : > { %v6813_v13 = vld [vmem:[%s6742_s2 + $0x34] sm:$0xf] (!%p4342_p4)  ;;  %v6816_v14 = vld [vmem:[%s6742_s2 + $0x38] sm:$0xf] (!%p4342_p4)  ;;  %v6819_v15 = vld [vmem:[%s6742_s2 + $0x3c] sm:$0xf] (!%p4342_p4) }
 0x154   : > { %v6822_v16 = vld [vmem:[%s6742_s2 + $0x40] sm:$0xf] (!%p4342_p4)  ;;  %v6825_v17 = vld [vmem:[%s6742_s2 + $0x44] sm:$0xf] (!%p4342_p4)  ;;  %v6828_v18 = vld [vmem:[%s6742_s2 + $0x48] sm:$0xf] (!%p4342_p4) }
 0x155   : > { %v6831_v19 = vld [vmem:[%s6742_s2 + $0x4c] sm:$0xf] (!%p4342_p4)  ;;  %v6834_v20 = vld [vmem:[%s6742_s2 + $0x50] sm:$0xf] (!%p4342_p4)  ;;  %v6837_v21 = vld [vmem:[%s6742_s2 + $0x54] sm:$0xf] (!%p4342_p4) }
 0x156   : > { %v6840_v22 = vld [vmem:[%s6742_s2 + $0x58] sm:$0xf]  ;;  %v6843_v23 = vld [vmem:[%s6742_s2 + $0x5c] sm:$0xf]  ;;  %v6846_v24 = vld [vmem:[%s6742_s2 + $0x60] sm:$0xf] }
 0x157   : > { %v6849_v25 = vld [vmem:[%s6742_s2 + $0x64] sm:$0xf]  ;;  %v6852_v26 = vld [vmem:[%s6742_s2 + $0x68] sm:$0xf]  ;;  %v6855_v27 = vld [vmem:[%s6742_s2 + $0x6c] sm:$0xf] }
 0x158   : > { %v6858_v28 = vld [vmem:[%s6742_s2 + $0x70] sm:$0xf]  ;;  %v6861_v29 = vld [vmem:[%s6742_s2 + $0x74] sm:$0xf]  ;;  %v6864_v30 = vld [vmem:[%s6742_s2 + $0x78] sm:$0xf] }
 0x159   : > { %v6867_v31 = vld [vmem:[%s6742_s2 + $0x7c] sm:$0xf]  ;;  %p4343_p1 = scmp.ne.s32.totalorder %s7746_s27, 0 }
 0x15a   : > { %v6242_v32 = vmov (!%p4343_p1), 0.0  }
 0x15b   : > { %626 = sbr.rel (%p4343_p1) target bundleno = 355 (0x163), region = 100  ;;  %627 = vst [vmem:[#allocation2] sm:$0xff] (!%p4343_p1), %v6242_v32  ;;  %628 = vst [vmem:[#allocation2 + $0x8] sm:$0xff] (!%p4343_p1), %v6242_v32 }
 0x15c   : > { %629 = vst [vmem:[#allocation2 + $0x10] sm:$0xff] (!%p4343_p1), %v6242_v32  ;;  %630 = vst [vmem:[#allocation2 + $0x18] sm:$0xff] (!%p4343_p1), %v6242_v32 }
 0x15d   : > { %631 = vst [vmem:[#allocation2 + $0x20] sm:$0xff] (!%p4343_p1), %v6242_v32  ;;  %632 = vst [vmem:[#allocation2 + $0x28] sm:$0xff] (!%p4343_p1), %v6242_v32 }
 0x15e   : > { %633 = vst [vmem:[#allocation2 + $0x30] sm:$0xff] (!%p4343_p1), %v6242_v32  ;;  %634 = vst [vmem:[#allocation2 + $0x38] sm:$0xff] (!%p4343_p1), %v6242_v32 }
 0x15f   : > { %635 = vst [vmem:[#allocation2 + $0x40] sm:$0xff] (!%p4343_p1), %v6242_v32  ;;  %636 = vst [vmem:[#allocation2 + $0x48] sm:$0xff] (!%p4343_p1), %v6242_v32 }
 0x160   : > { %637 = vst [vmem:[#allocation2 + $0x50] sm:$0xff] (!%p4343_p1), %v6242_v32  ;;  %638 = vst [vmem:[#allocation2 + $0x58] sm:$0xff] (!%p4343_p1), %v6242_v32 }
 0x161   : > { %639 = vst [vmem:[#allocation2 + $0x60] sm:$0xff] (!%p4343_p1), %v6242_v32  ;;  %640 = vst [vmem:[#allocation2 + $0x68] sm:$0xff] (!%p4343_p1), %v6242_v32 }
 0x162   : > { %641 = vst [vmem:[#allocation2 + $0x70] sm:$0xff] %v6242_v32  ;;  %642 = vst [vmem:[#allocation2 + $0x78] sm:$0xff] %v6242_v32 }
 0x163 PF: > { %v5648_v33 = vld [vmem:[#allocation10] sm:$0xff]   ;;  %v4345_v34 = vcombine.low %v591_v0, %v592_v1  ;;  %v5649_v35 = vld [vmem:[#allocation10 + $0x8] sm:$0xff]   ;;  %v5650_v36 = vld [vmem:[#allocation10 + $0x10] sm:$0xff]   ;;  %v4346_v42 = vcombine.low %v6780_v2, %v6783_v3  ;;  %v4347_v43 = vcombine.low %v6786_v4, %v6789_v5  ;;  %v4348_v44 = vcombine.low %v6792_v6, %v6795_v7  ;;  %s7747_s11 = sld [smem:[#allocation43_spill]] }
 0x164   : > { %4988 = vmatprep.subr.bf16.mxu0 %v5648_v33  ;;  %v5651_v37 = vld [vmem:[#allocation10 + $0x18] sm:$0xff]   ;;  %v5652_v38 = vld [vmem:[#allocation10 + $0x20] sm:$0xff]   ;;  %v5653_v39 = vld [vmem:[#allocation10 + $0x28] sm:$0xff]   ;;  %v4349_v45 = vcombine.low %v6798_v8, %v6801_v9  ;;  %v4350_v46 = vcombine.low %v6804_v10, %v6807_v11  ;;  %v4351_v47 = vcombine.low %v6810_v12, %v6813_v13  ;;  %v4352_v48 = vcombine.low %v6816_v14, %v6819_v15 }
 0x165   : > { %5004 = vmatprep.mubr.bf16.mxu0 %v4345_v34  ;;  %4989 = vmatpush3.bf16.msra.mxu0 %v5648_v33  ;;  %v5654_v40 = vld [vmem:[#allocation10 + $0x30] sm:$0xff]   ;;  %v5655_v41 = vld [vmem:[#allocation10 + $0x38] sm:$0xff]   ;;  %v4353_v49 = vcombine.low %v6822_v16, %v6825_v17  ;;  %v4354_v50 = vcombine.low %v6828_v18, %v6831_v19  ;;  %v4355_v51 = vcombine.low %v6834_v20, %v6837_v21  ;;  %v5658_v57 = vld [vmem:[%s6750_s8 + $0x4] ss:$8 sps:$4 sm:$0xff]  }
 0x166   : > { %4990 = vmatprep.subr.bf16.mxu0 %v5649_v35  ;;  %v4356_v52 = vcombine.low %v6840_v22, %v6843_v23  ;;  %v4357_v53 = vcombine.low %v6846_v24, %v6849_v25  ;;  %v4358_v54 = vcombine.low %v6852_v26, %v6855_v27  ;;  %v4359_v55 = vcombine.low %v6858_v28, %v6861_v29 }
 0x167   : > { %v4360_v56 = vcombine.low %v6864_v30, %v6867_v31  ;;  %1131 = vmatprep.mubr.bf16.mxu1 %v5658_v57 }
 0x169   : > { %4991 = vmatpush3.bf16.msra.mxu0 %v5649_v35  ;;  %v6904_v59 = vld [vmem:[%s7747_s11] ss:$0 sm:$0xff] }
 0x16a   : > { %4992 = vmatprep.subr.bf16.mxu0 %v5650_v36 }
 0x16d   : > { %4993 = vmatpush3.bf16.msra.mxu0 %v5650_v36 }
 0x16e   : > { %4994 = vmatprep.subr.bf16.mxu0 %v5651_v37 }
 0x171   : > { %4995 = vmatpush3.bf16.msra.mxu0 %v5651_v37 }
 0x172   : > { %4996 = vmatprep.subr.bf16.mxu0 %v5652_v38 }
 0x175   : > { %4997 = vmatpush3.bf16.msra.mxu0 %v5652_v38 }
 0x176   : > { %4998 = vmatprep.subr.bf16.mxu0 %v5653_v39 }
 0x179   : > { %4999 = vmatpush3.bf16.msra.mxu0 %v5653_v39 }
 0x17a   : > { %5000 = vmatprep.subr.bf16.mxu0 %v5654_v40 }
 0x17d   : > { %5001 = vmatpush3.bf16.msra.mxu0 %v5654_v40 }
 0x17e   : > { %5002 = vmatprep.subr.bf16.mxu0 %v5655_v41 }
 0x181   : > { %5003 = vmatpush3.bf16.msra.mxu0 %v5655_v41 }
 0x184   : > { %5005 = vmatmul.mubr.bf16.vlgmr.msra.gmra.mrb[0].mxu0 %v4346_v42 }
 0x185   : > { %5008 = vmatprep.mubr.bf16.mxu0 %v4347_v43 }
 0x18c   : > { %5009 = vmatmul.mubr.bf16.gmra.mrb[4].mxu0 %v4348_v44 }
 0x18d   : > { %5012 = vmatprep.mubr.bf16.mxu0 %v4349_v45 }
 0x194   : > { %5013 = vmatmul.mubr.bf16.gmra.mrb[8].mxu0 %v4350_v46 }
 0x195   : > { %5016 = vmatprep.mubr.bf16.mxu0 %v4351_v47 }
 0x19c   : > { %5017 = vmatmul.mubr.bf16.gmra.mrb[12].mxu0 %v4352_v48 }
 0x19d   : > { %5020 = vmatprep.mubr.bf16.mxu0 %v4353_v49 }
 0x1a4   : > { %5021 = vmatmul.mubr.bf16.gmra.mrb[16].mxu0 %v4354_v50 }
 0x1a5   : > { %5024 = vmatprep.mubr.bf16.mxu0 %v4355_v51 }
 0x1ac   : > { %5025 = vmatmul.mubr.bf16.gmra.mrb[20].mxu0 %v4356_v52 }
 0x1ad   : > { %5028 = vmatprep.mubr.bf16.mxu0 %v4357_v53 }
 0x1b4   : > { %5029 = vmatmul.mubr.bf16.gmra.mrb[24].mxu0 %v4358_v54 }
 0x1b5   : > { %5032 = vmatprep.mubr.bf16.mxu0 %v4359_v55 }
 0x1bc   : > { %5033 = vmatmul.mubr.bf16.gmra.mrb[28].mxu0 %v4360_v56 }
 0x257   : > { %v5006_v58 = vpop.f32.mrb[0].mxu0 }
 0x258   : > { %v844_v60 = vpop.f32.mrb[1].mxu0  ;;  %v853_v62 = vadd.f32 %v5006_v58, %v6904_v59 }
 0x259   : > { %v5007_v61 = vpop.f32.mrb[2].mxu0  ;;  %v845_v1 = vadd.f32 %v6904_v59, %v844_v60 }
 0x25a   : > { %v856_v63 = vadd.f32 %v5007_v61, %v6904_v59  ;;  %v847_v0 = vpop.f32.mrb[3].mxu0 }
 0x25b   : > { %v848_v2 = vadd.f32 %v6904_v59, %v847_v0 }
 0x25c   : > { %v1004_v3 = vpack.c.bf16 %v856_v63, %v853_v62 }
 0x25d   : > { %v1003_v4 = vpack.c.bf16 %v848_v2, %v845_v1 }
 0x25f   : > { %v5010_v5 = vpop.f32.mrb[4].mxu0 }
 0x260   : > { %v860_v6 = vpop.f32.mrb[5].mxu0  ;;  %v6911_v8 = vadd.f32 %v5010_v5, %v6904_v59 }
 0x261   : > { %v5011_v7 = vpop.f32.mrb[6].mxu0  ;;  %v861_v11 = vadd.f32 %v6904_v59, %v860_v6 }
 0x262   : > { %v872_v9 = vadd.f32 %v5011_v7, %v6904_v59  ;;  %v863_v10 = vpop.f32.mrb[7].mxu0 }
 0x263   : > { %v864_v12 = vadd.f32 %v6904_v59, %v863_v10 }
 0x264   : > { %v1006_v13 = vpack.c.bf16 %v872_v9, %v6911_v8 }
 0x265   : > { %v1005_v14 = vpack.c.bf16 %v864_v12, %v861_v11  ;;  %v5656_v12 = vld [vmem:[%s6750_s8] ss:$8 sps:$4 sm:$0xff]  }
 0x267   : > { %v5014_v15 = vpop.f32.mrb[8].mxu0 }
 0x268   : > { %v876_v16 = vpop.f32.mrb[9].mxu0  ;;  %v6918_v18 = vadd.f32 %v5014_v15, %v6904_v59  ;;  %v5664_v15 = vld [vmem:[%s6750_s8 + $0x20] ss:$8 sps:$4 sm:$0xff]  }
 0x269   : > { %v5015_v17 = vpop.f32.mrb[10].mxu0  ;;  %v877_v21 = vadd.f32 %v6904_v59, %v876_v16  ;;  %v5665_v16 = vld [vmem:[%s6750_s8 + $0x34] ss:$8 sps:$4 sm:$0xff]  }
 0x26a   : > { %v6921_v19 = vadd.f32 %v5015_v17, %v6904_v59  ;;  %v879_v20 = vpop.f32.mrb[11].mxu0  ;;  %v5667_v17 = vld [vmem:[%s6750_s8 + $0x30] ss:$8 sps:$4 sm:$0xff]  }
 0x26b   : > { %v880_v22 = vadd.f32 %v6904_v59, %v879_v20  ;;  %v5671_v20 = vld [vmem:[%s6750_s8 + $0x54] ss:$8 sps:$4 sm:$0xff]  }
 0x26c   : > { %v1008_v23 = vpack.c.bf16 %v6921_v19, %v6918_v18  ;;  %v5668_v18 = vld [vmem:[%s6750_s8 + $0x44] ss:$8 sps:$4 sm:$0xff]   ;;  %v5670_v19 = vld [vmem:[%s6750_s8 + $0x40] ss:$8 sps:$4 sm:$0xff]  }
 0x26d   : > { %v1007_v24 = vpack.c.bf16 %v880_v22, %v877_v21  ;;  %v5673_v21 = vld [vmem:[%s6750_s8 + $0x50] ss:$8 sps:$4 sm:$0xff]   ;;  %v5674_v22 = vld [vmem:[%s6750_s8 + $0x64] ss:$8 sps:$4 sm:$0xff]  }
 0x26f   : > { %v5018_v25 = vpop.f32.mrb[12].mxu0 }
 0x270   : > { %v892_v26 = vpop.f32.mrb[13].mxu0  ;;  %v6928_v28 = vadd.f32 %v5018_v25, %v6904_v59  ;;  %v5679_v25 = vld [vmem:[%s6750_s8 + $0x70] ss:$8 sps:$4 sm:$0xff]  }
 0x271   : > { %v5019_v27 = vpop.f32.mrb[14].mxu0  ;;  %v893_v31 = vadd.f32 %v6904_v59, %v892_v26 }
 0x272   : > { %v904_v29 = vadd.f32 %v5019_v27, %v6904_v59  ;;  %v895_v30 = vpop.f32.mrb[15].mxu0  ;;  %v971_v27 = vld [vmem:[#allocation2] sm:$0xff] }
 0x273   : > { %v896_v32 = vadd.f32 %v6904_v59, %v895_v30 }
 0x274   : > { %v1010_v33 = vpack.c.bf16 %v904_v29, %v6928_v28 }
 0x275   : > { %v1009_v34 = vpack.c.bf16 %v896_v32, %v893_v31  ;;  %v972_v31 = vld [vmem:[#allocation2 + $0x8] sm:$0xff] }
 0x277   : > { %v5022_v35 = vpop.f32.mrb[16].mxu0 }
 0x278   : > { %v908_v36 = vpop.f32.mrb[17].mxu0  ;;  %v917_v38 = vadd.f32 %v5022_v35, %v6904_v59 }
 0x279   : > { %v5023_v37 = vpop.f32.mrb[18].mxu0  ;;  %v909_v41 = vadd.f32 %v6904_v59, %v908_v36 }
 0x27a   : > { %v920_v39 = vadd.f32 %v5023_v37, %v6904_v59  ;;  %v911_v40 = vpop.f32.mrb[19].mxu0  ;;  %v973_v37 = vld [vmem:[#allocation2 + $0x10] sm:$0xff] }
 0x27b   : > { %v912_v42 = vadd.f32 %v6904_v59, %v911_v40 }
 0x27c   : > { %v1012_v43 = vpack.c.bf16 %v920_v39, %v917_v38 }
 0x27d   : > { %v1011_v44 = vpack.c.bf16 %v912_v42, %v909_v41  ;;  %v974_v41 = vld [vmem:[#allocation2 + $0x18] sm:$0xff] }
 0x27f   : > { %v5026_v45 = vpop.f32.mrb[20].mxu0  ;;  %4564 = vmatprep.subr.bf16.mxu1 %v1011_v44 }
 0x280   : > { %v924_v46 = vpop.f32.mrb[21].mxu0  ;;  %4565 = vmatpush3.bf16.msra.mxu1 %v1003_v4  ;;  %v933_v48 = vadd.f32 %v5026_v45, %v6904_v59 }
 0x281   : > { %v5027_v47 = vpop.f32.mrb[22].mxu0  ;;  %4566 = vmatprep.subr.bf16.mxu1 %v1012_v43  ;;  %v925_v51 = vadd.f32 %v6904_v59, %v924_v46 }
 0x282   : > { %v936_v49 = vadd.f32 %v5027_v47, %v6904_v59  ;;  %v927_v50 = vpop.f32.mrb[23].mxu0  ;;  %v975_v47 = vld [vmem:[#allocation2 + $0x20] sm:$0xff] }
 0x283   : > { %v928_v52 = vadd.f32 %v6904_v59, %v927_v50 }
 0x284   : > { %v1014_v53 = vpack.c.bf16 %v936_v49, %v933_v48  ;;  %4567 = vmatpush3.bf16.msra.mxu1 %v1004_v3 }
 0x285   : > { %v1013_v54 = vpack.c.bf16 %v928_v52, %v925_v51  ;;  %v976_v51 = vld [vmem:[#allocation2 + $0x28] sm:$0xff] }
 0x287   : > { %v5030_v55 = vpop.f32.mrb[24].mxu0  ;;  %4568 = vmatprep.subr.bf16.mxu1 %v1013_v54 }
 0x288   : > { %v940_v56 = vpop.f32.mrb[25].mxu0  ;;  %4569 = vmatpush3.bf16.msra.mxu1 %v1005_v14  ;;  %v949_v58 = vadd.f32 %v5030_v55, %v6904_v59  ;;  %v5661_v14 = vld [vmem:[%s6750_s8 + $0x10] ss:$8 sps:$4 sm:$0xff]  }
 0x289   : > { %v5031_v57 = vpop.f32.mrb[26].mxu0  ;;  %4570 = vmatprep.subr.bf16.mxu1 %v1014_v53  ;;  %v941_v62 = vadd.f32 %v6904_v59, %v940_v56 }
 0x28a   : > { %v952_v60 = vadd.f32 %v5031_v57, %v6904_v59  ;;  %v943_v61 = vpop.f32.mrb[27].mxu0  ;;  %v977_v57 = vld [vmem:[#allocation2 + $0x30] sm:$0xff] }
 0x28b   : > { %v944_v63 = vadd.f32 %v6904_v59, %v943_v61 }
 0x28c   : > { %v1016_v0 = vpack.c.bf16 %v952_v60, %v949_v58  ;;  %4571 = vmatpush3.bf16.msra.mxu1 %v1006_v13  ;;  %v5659_v13 = vld [vmem:[%s6750_s8 + $0x14] ss:$8 sps:$4 sm:$0xff]  }
 0x28d   : > { %v1015_v1 = vpack.c.bf16 %v944_v63, %v941_v62  ;;  %v978_v62 = vld [vmem:[#allocation2 + $0x38] sm:$0xff] }
 0x28f   : > { %v5034_v2 = vpop.f32.mrb[28].mxu0  ;;  %4572 = vmatprep.subr.bf16.mxu1 %v1015_v1 }
 0x290   : > { %v956_v3 = vpop.f32.mrb[29].mxu0  ;;  %4573 = vmatpush3.bf16.msra.mxu1 %v1007_v24  ;;  %v965_v5 = vadd.f32 %v5034_v2, %v6904_v59  ;;  %v5677_v24 = vld [vmem:[%s6750_s8 + $0x74] ss:$8 sps:$4 sm:$0xff]  }
 0x291   : > { %v5035_v4 = vpop.f32.mrb[30].mxu0  ;;  %4574 = vmatprep.subr.bf16.mxu1 %v1016_v0  ;;  %v957_v8 = vadd.f32 %v6904_v59, %v956_v3 }
 0x292   : > { %v968_v6 = vadd.f32 %v5035_v4, %v6904_v59  ;;  %v959_v7 = vpop.f32.mrb[31].mxu0  ;;  %v979_v4 = vld [vmem:[#allocation2 + $0x40] sm:$0xff] }
 0x293   : > { %v960_v9 = vadd.f32 %v6904_v59, %v959_v7  ;;  %v5662_v59 = vld [vmem:[%s6750_s8 + $0x24] ss:$8 sps:$4 sm:$0xff]  }
 0x294   : > { %v1018_v10 = vpack.c.bf16 %v968_v6, %v965_v5  ;;  %4575 = vmatpush3.bf16.msra.mxu1 %v1008_v23  ;;  %v5676_v23 = vld [vmem:[%s6750_s8 + $0x60] ss:$8 sps:$4 sm:$0xff]  }
 0x295   : > { %v1017_v11 = vpack.c.bf16 %v960_v9, %v957_v8  ;;  %v980_v8 = vld [vmem:[#allocation2 + $0x48] sm:$0xff] }
 0x297   : > { %4576 = vmatprep.subr.bf16.mxu1 %v1017_v11 }
 0x298   : > { %4577 = vmatpush3.bf16.msra.mxu1 %v1009_v34 }
 0x299   : > { %4578 = vmatprep.subr.bf16.mxu1 %v1018_v10 }
 0x29c   : > { %4579 = vmatpush3.bf16.msra.mxu1 %v1010_v33 }
 0x29f   : > { %1132 = vmatmul.mubr.bf16.vlgmr.msra.gmra.mrb[0].mxu1 %v5656_v12 }
 0x2a0   : > { %1139 = vmatprep.mubr.bf16.mxu1 %v5659_v13 }
 0x2a7   : > { %1140 = vmatmul.mubr.bf16.gmra.mrb[4].mxu1 %v5661_v14  ;;  %v981_v14 = vld [vmem:[#allocation2 + $0x50] sm:$0xff] }
 0x2a8   : > { %1147 = vmatprep.mubr.bf16.mxu1 %v5662_v59 }
 0x2af   : > { %1148 = vmatmul.mubr.bf16.gmra.mrb[8].mxu1 %v5664_v15 }
 0x2b0   : > { %1155 = vmatprep.mubr.bf16.mxu1 %v5665_v16 }
 0x2b7   : > { %1156 = vmatmul.mubr.bf16.gmra.mrb[12].mxu1 %v5667_v17  ;;  %v982_v17 = vld [vmem:[#allocation2 + $0x58] sm:$0xff] }
 0x2b8   : > { %1163 = vmatprep.mubr.bf16.mxu1 %v5668_v18 }
 0x2bf   : > { %1164 = vmatmul.mubr.bf16.gmra.mrb[16].mxu1 %v5670_v19 }
 0x2c0   : > { %1171 = vmatprep.mubr.bf16.mxu1 %v5671_v20 }
 0x2c7   : > { %1172 = vmatmul.mubr.bf16.gmra.mrb[20].mxu1 %v5673_v21 }
 0x2c8   : > { %1179 = vmatprep.mubr.bf16.mxu1 %v5674_v22 }
 0x2cf   : > { %1180 = vmatmul.mubr.bf16.gmra.mrb[24].mxu1 %v5676_v23  ;;  %v983_v23 = vld [vmem:[#allocation2 + $0x60] sm:$0xff] }
 0x2d0   : > { %1187 = vmatprep.mubr.bf16.mxu1 %v5677_v24 }
 0x2d7   : > { %1188 = vmatmul.mubr.bf16.gmra.mrb[28].mxu1 %v5679_v25 }
 0x372   : > { %v4580_v26 = vpop.f32.mrb[0].mxu1 }
 0x373   : > { %v4581_v28 = vpop.f32.mrb[1].mxu1 }
 0x374   : > { %v4582_v29 = vadd.f32 %v4581_v28, %v4580_v26  ;;  %v4583_v30 = vpop.f32.mrb[2].mxu1 }
 0x375   : > { %v4584_v32 = vpop.f32.mrb[3].mxu1 }
 0x376   : > { %v1196_v33 = vadd.f32 %v4582_v29, %v971_v27  ;;  %v4585_v34 = vadd.f32 %v4584_v32, %v4583_v30  ;;  %v984_v27 = vld [vmem:[#allocation2 + $0x68] sm:$0xff] }
 0x378   : > { %1212 = vst [vmem:[#allocation2] sm:$0xff] %v1196_v33  ;;  %v1197_v35 = vadd.f32 %v4585_v34, %v972_v31  ;;  %v985_v33 = vld [vmem:[#allocation2 + $0x70] sm:$0xff] }
 0x37a   : > { %1213 = vst [vmem:[#allocation2 + $0x8] sm:$0xff] %v1197_v35  ;;  %v4586_v36 = vpop.f32.mrb[4].mxu1 }
 0x37b   : > { %v4587_v38 = vpop.f32.mrb[5].mxu1 }
 0x37c   : > { %v4588_v39 = vadd.f32 %v4587_v38, %v4586_v36  ;;  %v4589_v40 = vpop.f32.mrb[6].mxu1 }
 0x37d   : > { %v4590_v42 = vpop.f32.mrb[7].mxu1 }
 0x37e   : > { %v1198_v43 = vadd.f32 %v4588_v39, %v973_v37  ;;  %v4591_v44 = vadd.f32 %v4590_v42, %v4589_v40  ;;  %v986_v37 = vld [vmem:[#allocation2 + $0x78] sm:$0xff] }
 0x380   : > { %1214 = vst [vmem:[#allocation2 + $0x10] sm:$0xff] %v1198_v43  ;;  %v1199_v45 = vadd.f32 %v4591_v44, %v974_v41 }
 0x382   : > { %1215 = vst [vmem:[#allocation2 + $0x18] sm:$0xff] %v1199_v45  ;;  %v4592_v46 = vpop.f32.mrb[8].mxu1 }
 0x383   : > { %v4593_v48 = vpop.f32.mrb[9].mxu1 }
 0x384   : > { %v4594_v49 = vadd.f32 %v4593_v48, %v4592_v46  ;;  %v4595_v50 = vpop.f32.mrb[10].mxu1 }
 0x385   : > { %v4596_v52 = vpop.f32.mrb[11].mxu1 }
 0x386   : > { %v1200_v53 = vadd.f32 %v4594_v49, %v975_v47  ;;  %v4597_v54 = vadd.f32 %v4596_v52, %v4595_v50 }
 0x388   : > { %1216 = vst [vmem:[#allocation2 + $0x20] sm:$0xff] %v1200_v53  ;;  %v1201_v55 = vadd.f32 %v4597_v54, %v976_v51 }
 0x38a   : > { %1217 = vst [vmem:[#allocation2 + $0x28] sm:$0xff] %v1201_v55  ;;  %v4598_v56 = vpop.f32.mrb[12].mxu1 }
 0x38b   : > { %v4599_v58 = vpop.f32.mrb[13].mxu1 }
 0x38c   : > { %v4600_v60 = vadd.f32 %v4599_v58, %v4598_v56  ;;  %v4601_v61 = vpop.f32.mrb[14].mxu1 }
 0x38d   : > { %v4602_v63 = vpop.f32.mrb[15].mxu1 }
 0x38e   : > { %v1202_v0 = vadd.f32 %v4600_v60, %v977_v57  ;;  %v4603_v1 = vadd.f32 %v4602_v63, %v4601_v61 }
 0x390   : > { %1218 = vst [vmem:[#allocation2 + $0x30] sm:$0xff] %v1202_v0  ;;  %v1203_v2 = vadd.f32 %v4603_v1, %v978_v62 }
 0x392   : > { %1219 = vst [vmem:[#allocation2 + $0x38] sm:$0xff] %v1203_v2  ;;  %v4604_v3 = vpop.f32.mrb[16].mxu1 }
 0x393   : > { %v4605_v5 = vpop.f32.mrb[17].mxu1 }
 0x394   : > { %v4606_v6 = vadd.f32 %v4605_v5, %v4604_v3  ;;  %v4607_v7 = vpop.f32.mrb[18].mxu1 }
 0x395   : > { %v4608_v9 = vpop.f32.mrb[19].mxu1 }
 0x396   : > { %v1204_v10 = vadd.f32 %v4606_v6, %v979_v4  ;;  %v4609_v11 = vadd.f32 %v4608_v9, %v4607_v7 }
 0x398   : > { %1220 = vst [vmem:[#allocation2 + $0x40] sm:$0xff] %v1204_v10  ;;  %v1205_v12 = vadd.f32 %v4609_v11, %v980_v8 }
 0x39a   : > { %1221 = vst [vmem:[#allocation2 + $0x48] sm:$0xff] %v1205_v12  ;;  %v4610_v13 = vpop.f32.mrb[20].mxu1 }
 0x39b   : > { %v4611_v59 = vpop.f32.mrb[21].mxu1 }
 0x39c   : > { %v4612_v15 = vadd.f32 %v4611_v59, %v4610_v13  ;;  %v4613_v16 = vpop.f32.mrb[22].mxu1 }
 0x39d   : > { %v4614_v18 = vpop.f32.mrb[23].mxu1 }
 0x39e   : > { %v1206_v19 = vadd.f32 %v4612_v15, %v981_v14  ;;  %v4615_v20 = vadd.f32 %v4614_v18, %v4613_v16 }
 0x3a0   : > { %1222 = vst [vmem:[#allocation2 + $0x50] sm:$0xff] %v1206_v19  ;;  %v1207_v21 = vadd.f32 %v4615_v20, %v982_v17 }
 0x3a2   : > { %1223 = vst [vmem:[#allocation2 + $0x58] sm:$0xff] %v1207_v21  ;;  %v4616_v22 = vpop.f32.mrb[24].mxu1 }
 0x3a3   : > { %v4617_v24 = vpop.f32.mrb[25].mxu1 }
 0x3a4   : > { %v4618_v25 = vadd.f32 %v4617_v24, %v4616_v22  ;;  %v4619_v26 = vpop.f32.mrb[26].mxu1 }
 0x3a5   : > { %v4620_v28 = vpop.f32.mrb[27].mxu1 }
 0x3a6   : > { %v1208_v29 = vadd.f32 %v4618_v25, %v983_v23  ;;  %v4621_v30 = vadd.f32 %v4620_v28, %v4619_v26 }
 0x3a8   : > { %1224 = vst [vmem:[#allocation2 + $0x60] sm:$0xff] %v1208_v29  ;;  %v1209_v31 = vadd.f32 %v4621_v30, %v984_v27 }
 0x3aa   : > { %1225 = vst [vmem:[#allocation2 + $0x68] sm:$0xff] %v1209_v31  ;;  %v4622_v32 = vpop.f32.mrb[28].mxu1 }
 0x3ab   : > { %v4623_v34 = vpop.f32.mrb[29].mxu1 }
 0x3ac   : > { %v4624_v35 = vadd.f32 %v4623_v34, %v4622_v32  ;;  %v4625_v36 = vpop.f32.mrb[30].mxu1 }
 0x3ad   : > { %v4626_v38 = vpop.f32.mrb[31].mxu1 }
 0x3ae   : > { %v1210_v39 = vadd.f32 %v4624_v35, %v985_v33  ;;  %v4627_v40 = vadd.f32 %v4626_v38, %v4625_v36 }
 0x3b0   : > { %1226 = vst [vmem:[#allocation2 + $0x70] sm:$0xff] %v1210_v39  ;;  %v1211_v41 = vadd.f32 %v4627_v40, %v986_v37 }
 0x3b2   : > { %1227 = vst [vmem:[#allocation2 + $0x78] sm:$0xff] %v1211_v41 }
 0x3b3 PF: > { %s7748_s16 = sld [smem:[#allocation32_spill]] }
 0x3b9   : > { %p4385_p5 = scmp.ne.s32.totalorder %s7748_s16, 1 }
 0x3ba   : > { %v1264_v42 = vld [vmem:[#allocation2] sm:$0xff] (!%p4385_p5)  ;;  %v1265_v43 = vld [vmem:[#allocation2 + $0x8] sm:$0xff] (!%p4385_p5)  ;;  %v1266_v44 = vld [vmem:[#allocation2 + $0x10] sm:$0xff] (!%p4385_p5)  ;;  %s7749_s7 = sld [smem:[#allocation31_spill]] (!%p4385_p5) }
 0x3bb   : > { %1231 = sbr.rel (%p4385_p5) target bundleno = 1823 (0x71f), region = 104  ;;  %v1280_v45 = vpack.c.bf16 (!%p4385_p5), %v1265_v43, %v1264_v42  ;;  %v1267_v46 = vld [vmem:[#allocation2 + $0x18] sm:$0xff] (!%p4385_p5)  ;;  %v1268_v48 = vld [vmem:[#allocation2 + $0x20] sm:$0xff] (!%p4385_p5)  ;;  %v1269_v49 = vld [vmem:[#allocation2 + $0x28] sm:$0xff] (!%p4385_p5) }
 0x3bc   : > { %v1281_v47 = vpack.c.bf16 (!%p4385_p5), %v1267_v46, %v1266_v44  ;;  %v1270_v50 = vld [vmem:[#allocation2 + $0x30] sm:$0xff] (!%p4385_p5)  ;;  %v1282_v51 = vpack.c.bf16 (!%p4385_p5), %v1269_v49, %v1268_v48  ;;  %v1271_v52 = vld [vmem:[#allocation2 + $0x38] sm:$0xff] (!%p4385_p5)  ;;  %v5680_v53 = vld [vmem:[%s6757_s24] sm:$0xff] (!%p4385_p5)  }
 0x3bd   : > { %5036 = vmatprep.subr.bf16.mxu0 (!%p4385_p5), %v1280_v45  ;;  %5372 = vmatprep.subr.bf16.mxu1 (!%p4385_p5), %v1280_v45  ;;  %v5681_v54 = vld [vmem:[%s6757_s24 + $0x40] sm:$0xff] (!%p4385_p5)   ;;  %v1283_v55 = vpack.c.bf16 (!%p4385_p5), %v1271_v52, %v1270_v50  ;;  %v1273_v57 = vld [vmem:[#allocation2 + $0x48] sm:$0xff] (!%p4385_p5)  ;;  %v1274_v60 = vld [vmem:[#allocation2 + $0x50] sm:$0xff] (!%p4385_p5) }
 0x3be   : > { %5037 = vmatpush3.bf16.msra.mxu0 (!%p4385_p5), %v1280_v45  ;;  %5380 = vmatpush3.bf16.msra.mxu1 (!%p4385_p5), %v1280_v45  ;;  %v1272_v56 = vld [vmem:[#allocation2 + $0x40] sm:$0xff] (!%p4385_p5)  ;;  %v1275_v61 = vld [vmem:[#allocation2 + $0x58] sm:$0xff] (!%p4385_p5)  ;;  %v1277_v0 = vld [vmem:[#allocation2 + $0x68] sm:$0xff] (!%p4385_p5) }
 0x3bf   : > { %5038 = vmatprep.subr.bf16.mxu0 (!%p4385_p5), %v1281_v47  ;;  %5373 = vmatprep.subr.bf16.mxu1 (!%p4385_p5), %v1281_v47  ;;  %v1284_v58 = vpack.c.bf16 (!%p4385_p5), %v1273_v57, %v1272_v56  ;;  %v1285_v62 = vpack.c.bf16 (!%p4385_p5), %v1275_v61, %v1274_v60  ;;  %v1276_v63 = vld [vmem:[#allocation2 + $0x60] sm:$0xff] (!%p4385_p5)  ;;  %v1278_v2 = vld [vmem:[#allocation2 + $0x70] sm:$0xff] (!%p4385_p5)  ;;  %v1279_v3 = vld [vmem:[#allocation2 + $0x78] sm:$0xff] (!%p4385_p5) }
 0x3c0   : > { %5052 = vmatprep.mubr.bf16.mxu0 (!%p4385_p5), %v5680_v53  ;;  %5068 = vmatprep.mubr.bf16.mxu1 (!%p4385_p5), %v5681_v54  ;;  %v1286_v1 = vpack.c.bf16 (!%p4385_p5), %v1277_v0, %v1276_v63  ;;  %v1287_v4 = vpack.c.bf16 (!%p4385_p5), %v1279_v3, %v1278_v2  ;;  %v5682_v5 = vld [vmem:[%s6757_s24 + $0x8] sm:$0xff] (!%p4385_p5)   ;;  %v5684_v7 = vld [vmem:[%s6757_s24 + $0x10] sm:$0xff] (!%p4385_p5)   ;;  %v5686_v9 = vld [vmem:[%s6757_s24 + $0x18] sm:$0xff] (!%p4385_p5)   ;;  %p4402_p3 = scmp.ne.s32.totalorder (!%p4385_p5), %s7749_s7, 0 }
 0x3c1   : > { %v5683_v6 = vld [vmem:[%s6757_s24 + $0x48] sm:$0xff] (!%p4385_p5)   ;;  %v5685_v8 = vld [vmem:[%s6757_s24 + $0x50] sm:$0xff] (!%p4385_p5)   ;;  %v5687_v10 = vld [vmem:[%s6757_s24 + $0x58] sm:$0xff] (!%p4385_p5)  }
 0x3c2   : > { %5039 = vmatpush3.bf16.msra.mxu0 %v1281_v47  ;;  %5381 = vmatpush3.bf16.msra.mxu1 %v1281_v47  ;;  %v5688_v11 = vld [vmem:[%s6757_s24 + $0x20] sm:$0xff]   ;;  %v5690_v13 = vld [vmem:[%s6757_s24 + $0x28] sm:$0xff]   ;;  %v5692_v59 = vld [vmem:[%s6757_s24 + $0x30] sm:$0xff]  }
 0x3c3   : > { %5040 = vmatprep.subr.bf16.mxu0 %v1282_v51  ;;  %5374 = vmatprep.subr.bf16.mxu1 %v1282_v51  ;;  %v5689_v12 = vld [vmem:[%s6757_s24 + $0x60] sm:$0xff]   ;;  %v5691_v14 = vld [vmem:[%s6757_s24 + $0x68] sm:$0xff]   ;;  %v5693_v15 = vld [vmem:[%s6757_s24 + $0x70] sm:$0xff]  }
 0x3c4   : > { %v5694_v16 = vld [vmem:[%s6757_s24 + $0x38] sm:$0xff]  }
 0x3c5   : > { %v5695_v17 = vld [vmem:[%s6757_s24 + $0x78] sm:$0xff]  }
 0x3c6   : > { %5041 = vmatpush3.bf16.msra.mxu0 %v1282_v51  ;;  %5382 = vmatpush3.bf16.msra.mxu1 %v1282_v51 }
 0x3c7   : > { %5042 = vmatprep.subr.bf16.mxu0 %v1283_v55  ;;  %5375 = vmatprep.subr.bf16.mxu1 %v1283_v55 }
 0x3ca   : > { %5043 = vmatpush3.bf16.msra.mxu0 %v1283_v55  ;;  %5383 = vmatpush3.bf16.msra.mxu1 %v1283_v55 }
 0x3cb   : > { %5044 = vmatprep.subr.bf16.mxu0 %v1284_v58  ;;  %5376 = vmatprep.subr.bf16.mxu1 %v1284_v58 }
 0x3ce   : > { %5045 = vmatpush3.bf16.msra.mxu0 %v1284_v58  ;;  %5384 = vmatpush3.bf16.msra.mxu1 %v1284_v58 }
 0x3cf   : > { %5046 = vmatprep.subr.bf16.mxu0 %v1285_v62  ;;  %5377 = vmatprep.subr.bf16.mxu1 %v1285_v62 }
 0x3d2   : > { %5047 = vmatpush3.bf16.msra.mxu0 %v1285_v62  ;;  %5385 = vmatpush3.bf16.msra.mxu1 %v1285_v62 }
 0x3d3   : > { %5048 = vmatprep.subr.bf16.mxu0 %v1286_v1  ;;  %5378 = vmatprep.subr.bf16.mxu1 %v1286_v1 }
 0x3d6   : > { %5049 = vmatpush3.bf16.msra.mxu0 %v1286_v1  ;;  %5386 = vmatpush3.bf16.msra.mxu1 %v1286_v1 }
 0x3d7   : > { %5050 = vmatprep.subr.bf16.mxu0 %v1287_v4  ;;  %5379 = vmatprep.subr.bf16.mxu1 %v1287_v4 }
 0x3da   : > { %5051 = vmatpush3.bf16.msra.mxu0 %v1287_v4  ;;  %5387 = vmatpush3.bf16.msra.mxu1 %v1287_v4 }
 0x3dd   : > { %5053 = vmatmul.mubr.bf16.vlgmr.msra.gmra.mrb[0].mxu0 %v5682_v5  ;;  %5069 = vmatmul.mubr.bf16.vlgmr.msra.gmra.mrb[0].mxu1 %v5683_v6 }
 0x3de   : > { %5056 = vmatprep.mubr.bf16.mxu0 %v5684_v7  ;;  %5072 = vmatprep.mubr.bf16.mxu1 %v5685_v8 }
 0x3e5   : > { %5057 = vmatmul.mubr.bf16.gmra.mrb[4].mxu0 %v5686_v9  ;;  %5073 = vmatmul.mubr.bf16.gmra.mrb[4].mxu1 %v5687_v10 }
 0x3e6   : > { %5060 = vmatprep.mubr.bf16.mxu0 %v5688_v11  ;;  %5076 = vmatprep.mubr.bf16.mxu1 %v5689_v12 }
 0x3ed   : > { %5061 = vmatmul.mubr.bf16.gmra.mrb[8].mxu0 %v5690_v13  ;;  %5077 = vmatmul.mubr.bf16.gmra.mrb[8].mxu1 %v5691_v14 }
 0x3ee   : > { %5064 = vmatprep.mubr.bf16.mxu0 %v5692_v59  ;;  %5080 = vmatprep.mubr.bf16.mxu1 %v5693_v15 }
 0x3f5   : > { %5065 = vmatmul.mubr.bf16.gmra.mrb[12].mxu0 %v5694_v16  ;;  %5081 = vmatmul.mubr.bf16.gmra.mrb[12].mxu1 %v5695_v17 }
 0x4b0   : > { %v5054_v18 = vpop.f32.mrb[0].mxu0  ;;  %v5070_v19 = vpop.f32.mrb[0].mxu1 }
 0x4b1   : > { %v1418_v20 = vpop.f32.mrb[1].mxu0  ;;  %v1482_v21 = vpop.f32.mrb[1].mxu1  ;;  %v1547_v24 = vmax.f32 %v5054_v18, 0.0  ;;  %v1563_v25 = vmax.f32 %v5070_v19, 0.0 }
 0x4b2   : > { %v5055_v22 = vpop.f32.mrb[2].mxu0  ;;  %v5071_v23 = vpop.f32.mrb[2].mxu1  ;;  %v1545_v30 = vmax.f32 %v1418_v20, 0.0  ;;  %v1561_v31 = vmax.f32 %v1482_v21, 0.0 }
 0x4b3   : > { %v1548_v26 = vmax.f32 %v5055_v22, 0.0  ;;  %v1564_v27 = vmax.f32 %v5071_v23, 0.0  ;;  %v1421_v28 = vpop.f32.mrb[3].mxu0  ;;  %v1485_v29 = vpop.f32.mrb[3].mxu1 }
 0x4b4   : > { %v1546_v32 = vmax.f32 %v1421_v28, 0.0  ;;  %v1562_v33 = vmax.f32 %v1485_v29, 0.0 }
 0x4b5   : > { %v6982_v34 = vpack.c.bf16 %v1548_v26, %v1547_v24  ;;  %v6984_v35 = vpack.c.bf16 %v1564_v27, %v1563_v25 }
 0x4b6   : > { %v6986_v36 = vpack.c.bf16 %v1546_v32, %v1545_v30  ;;  %v6988_v37 = vpack.c.bf16 %v1562_v33, %v1561_v31 }
 0x4b8   : > { %v5058_v38 = vpop.f32.mrb[4].mxu0  ;;  %v5074_v39 = vpop.f32.mrb[4].mxu1 }
 0x4b9   : > { %v1434_v40 = vpop.f32.mrb[5].mxu0  ;;  %v1498_v41 = vpop.f32.mrb[5].mxu1  ;;  %v1551_v44 = vmax.f32 %v5058_v38, 0.0  ;;  %v1567_v45 = vmax.f32 %v5074_v39, 0.0  ;;  %v6243_v38 = vmov (!%p4402_p3), 0.0  }
 0x4ba   : > { %v5059_v42 = vpop.f32.mrb[6].mxu0  ;;  %v5075_v43 = vpop.f32.mrb[6].mxu1  ;;  %v1549_v50 = vmax.f32 %v1434_v40, 0.0  ;;  %v1565_v51 = vmax.f32 %v1498_v41, 0.0  ;;  %1597 = vst [vmem:[#allocation3] sm:$0xff] (!%p4402_p3), %v6243_v38  ;;  %1598 = vst [vmem:[#allocation3 + $0x8] sm:$0xff] (!%p4402_p3), %v6243_v38 }
 0x4bb   : > { %v1552_v46 = vmax.f32 %v5059_v42, 0.0  ;;  %v1568_v47 = vmax.f32 %v5075_v43, 0.0  ;;  %v1437_v48 = vpop.f32.mrb[7].mxu0  ;;  %v1501_v49 = vpop.f32.mrb[7].mxu1  ;;  %1599 = vst [vmem:[#allocation3 + $0x10] sm:$0xff] (!%p4402_p3), %v6243_v38  ;;  %1600 = vst [vmem:[#allocation3 + $0x18] sm:$0xff] (!%p4402_p3), %v6243_v38 }
 0x4bc   : > { %v1550_v52 = vmax.f32 %v1437_v48, 0.0  ;;  %v1566_v53 = vmax.f32 %v1501_v49, 0.0  ;;  %1601 = vst [vmem:[#allocation3 + $0x20] sm:$0xff] (!%p4402_p3), %v6243_v38  ;;  %1602 = vst [vmem:[#allocation3 + $0x28] sm:$0xff] (!%p4402_p3), %v6243_v38 }
 0x4bd   : > { %v6990_v54 = vpack.c.bf16 %v1552_v46, %v1551_v44  ;;  %v6992_v55 = vpack.c.bf16 %v1568_v47, %v1567_v45  ;;  %1603 = vst [vmem:[#allocation3 + $0x30] sm:$0xff] (!%p4402_p3), %v6243_v38  ;;  %1604 = vst [vmem:[#allocation3 + $0x38] sm:$0xff] (!%p4402_p3), %v6243_v38 }
 0x4be   : > { %v6994_v56 = vpack.c.bf16 %v1550_v52, %v1549_v50  ;;  %v6996_v57 = vpack.c.bf16 %v1566_v53, %v1565_v51  ;;  %1605 = vst [vmem:[#allocation3 + $0x40] sm:$0xff] (!%p4402_p3), %v6243_v38  ;;  %1606 = vst [vmem:[#allocation3 + $0x48] sm:$0xff] (!%p4402_p3), %v6243_v38 }
 0x4bf   : > { %1607 = vst [vmem:[#allocation3 + $0x50] sm:$0xff] (!%p4402_p3), %v6243_v38  ;;  %1608 = vst [vmem:[#allocation3 + $0x58] sm:$0xff] (!%p4402_p3), %v6243_v38 }
 0x4c0   : > { %v5062_v58 = vpop.f32.mrb[8].mxu0  ;;  %v5078_v60 = vpop.f32.mrb[8].mxu1  ;;  %1609 = vst [vmem:[#allocation3 + $0x60] sm:$0xff] (!%p4402_p3), %v6243_v38  ;;  %1610 = vst [vmem:[#allocation3 + $0x68] sm:$0xff] (!%p4402_p3), %v6243_v38 }
 0x4c1   : > { %v1450_v61 = vpop.f32.mrb[9].mxu0  ;;  %v1514_v62 = vpop.f32.mrb[9].mxu1  ;;  %v1555_v1 = vmax.f32 %v5062_v58, 0.0  ;;  %v1571_v2 = vmax.f32 %v5078_v60, 0.0  ;;  %1611 = vst [vmem:[#allocation3 + $0x70] sm:$0xff] (!%p4402_p3), %v6243_v38  ;;  %1612 = vst [vmem:[#allocation3 + $0x78] sm:$0xff] (!%p4402_p3), %v6243_v38 }
 0x4c2   : > { %v5063_v63 = vpop.f32.mrb[10].mxu0  ;;  %v5079_v0 = vpop.f32.mrb[10].mxu1  ;;  %v1553_v7 = vmax.f32 %v1450_v61, 0.0  ;;  %v1569_v8 = vmax.f32 %v1514_v62, 0.0 }
 0x4c3   : > { %v1556_v3 = vmax.f32 %v5063_v63, 0.0  ;;  %v1572_v4 = vmax.f32 %v5079_v0, 0.0  ;;  %v1453_v5 = vpop.f32.mrb[11].mxu0  ;;  %v1517_v6 = vpop.f32.mrb[11].mxu1 }
 0x4c4   : > { %v1554_v9 = vmax.f32 %v1453_v5, 0.0  ;;  %v1570_v10 = vmax.f32 %v1517_v6, 0.0 }
 0x4c5   : > { %v6998_v11 = vpack.c.bf16 %v1556_v3, %v1555_v1  ;;  %v7000_v12 = vpack.c.bf16 %v1572_v4, %v1571_v2 }
 0x4c6   : > { %v7002_v13 = vpack.c.bf16 %v1554_v9, %v1553_v7  ;;  %v7004_v14 = vpack.c.bf16 %v1570_v10, %v1569_v8 }
 0x4c8   : > { %v5066_v59 = vpop.f32.mrb[12].mxu0  ;;  %v5082_v15 = vpop.f32.mrb[12].mxu1  ;;  %1596 = sbr.rel (%p4402_p3) target bundleno = 1231 (0x4cf), region = 108 }
 0x4c9   : > { %v1466_v16 = vpop.f32.mrb[13].mxu0  ;;  %v1530_v17 = vpop.f32.mrb[13].mxu1  ;;  %v1559_v20 = vmax.f32 %v5066_v59, 0.0  ;;  %v1575_v21 = vmax.f32 %v5082_v15, 0.0 }
 0x4ca   : > { %v5067_v18 = vpop.f32.mrb[14].mxu0  ;;  %v5083_v19 = vpop.f32.mrb[14].mxu1  ;;  %v1557_v26 = vmax.f32 %v1466_v16, 0.0  ;;  %v1573_v27 = vmax.f32 %v1530_v17, 0.0 }
 0x4cb   : > { %v1560_v22 = vmax.f32 %v5067_v18, 0.0  ;;  %v1576_v23 = vmax.f32 %v5083_v19, 0.0  ;;  %v1469_v24 = vpop.f32.mrb[15].mxu0  ;;  %v1533_v25 = vpop.f32.mrb[15].mxu1 }
 0x4cc   : > { %v1558_v28 = vmax.f32 %v1469_v24, 0.0  ;;  %v1574_v29 = vmax.f32 %v1533_v25, 0.0 }
 0x4cd   : > { %v1584_v30 = vpack.c.bf16 %v1560_v22, %v1559_v20  ;;  %v1592_v31 = vpack.c.bf16 %v1576_v23, %v1575_v21 }
 0x4ce   : > { %v1583_v32 = vpack.c.bf16 %v1558_v28, %v1557_v26  ;;  %v1591_v33 = vpack.c.bf16 %v1574_v29, %v1573_v27 }
 0x4cf PF: > { %v5696_v39 = vld [vmem:[#allocation12] sm:$0xff]   ;;  %5100 = vmatprep.mubr.bf16.mxu1 %v6986_v36  ;;  %v5697_v40 = vld [vmem:[#allocation12 + $0x8] sm:$0xff]   ;;  %v5698_v41 = vld [vmem:[#allocation12 + $0x10] sm:$0xff]   ;;  %s7750_s29 = sld [smem:[#allocation45_spill]] }
 0x4d0   : > { %5084 = vmatprep.subr.bf16.mxu1 %v5696_v39  ;;  %v5699_v42 = vld [vmem:[#allocation12 + $0x18] sm:$0xff]   ;;  %v5700_v43 = vld [vmem:[#allocation12 + $0x20] sm:$0xff]   ;;  %v5701_v44 = vld [vmem:[#allocation12 + $0x28] sm:$0xff]  }
 0x4d1   : > { %5085 = vmatpush3.bf16.msra.mxu1 %v5696_v39  ;;  %v5702_v45 = vld [vmem:[#allocation12 + $0x30] sm:$0xff]   ;;  %v5703_v36 = vld [vmem:[#allocation12 + $0x38] sm:$0xff]  }
 0x4d2   : > { %5086 = vmatprep.subr.bf16.mxu1 %v5697_v40 }
 0x4d5   : > { %5087 = vmatpush3.bf16.msra.mxu1 %v5697_v40  ;;  %v7023_v47 = vld [vmem:[%s7750_s29] ss:$0 sm:$0xff] }
 0x4d6   : > { %5088 = vmatprep.subr.bf16.mxu1 %v5698_v41 }
 0x4d9   : > { %5089 = vmatpush3.bf16.msra.mxu1 %v5698_v41 }
 0x4da   : > { %5090 = vmatprep.subr.bf16.mxu1 %v5699_v42 }
 0x4dd   : > { %5091 = vmatpush3.bf16.msra.mxu1 %v5699_v42 }
 0x4de   : > { %5092 = vmatprep.subr.bf16.mxu1 %v5700_v43 }
 0x4e1   : > { %5093 = vmatpush3.bf16.msra.mxu1 %v5700_v43 }
 0x4e2   : > { %5094 = vmatprep.subr.bf16.mxu1 %v5701_v44 }
 0x4e5   : > { %5095 = vmatpush3.bf16.msra.mxu1 %v5701_v44 }
 0x4e6   : > { %5096 = vmatprep.subr.bf16.mxu1 %v5702_v45 }
 0x4e9   : > { %5097 = vmatpush3.bf16.msra.mxu1 %v5702_v45 }
 0x4ea   : > { %5098 = vmatprep.subr.bf16.mxu1 %v5703_v36 }
 0x4ed   : > { %5099 = vmatpush3.bf16.msra.mxu1 %v5703_v36 }
 0x4f0   : > { %5101 = vmatmul.mubr.bf16.vlgmr.msra.gmra.mrb[16].mxu1 %v6982_v34  ;;  %v5706_v34 = vld [vmem:[%s6750_s8 + $0x4] ss:$8 sps:$4 sm:$0xff]  }
 0x4f1   : > { %5104 = vmatprep.mubr.bf16.mxu1 %v6994_v56  ;;  %2005 = vmatprep.mubr.bf16.mxu0 %v5706_v34 }
 0x4f8   : > { %5105 = vmatmul.mubr.bf16.gmra.mrb[20].mxu1 %v6990_v54 }
 0x4f9   : > { %5108 = vmatprep.mubr.bf16.mxu1 %v7002_v13 }
 0x500   : > { %5109 = vmatmul.mubr.bf16.gmra.mrb[24].mxu1 %v6998_v11 }
 0x501   : > { %5112 = vmatprep.mubr.bf16.mxu1 %v1583_v32 }
 0x508   : > { %5113 = vmatmul.mubr.bf16.gmra.mrb[28].mxu1 %v1584_v30 }
 0x509   : > { %5116 = vmatprep.mubr.bf16.mxu1 %v6988_v37 }
 0x510   : > { %5117 = vmatmul.mubr.bf16.gmra.mrb[32].mxu1 %v6984_v35 }
 0x511   : > { %5120 = vmatprep.mubr.bf16.mxu1 %v6996_v57 }
 0x518   : > { %5121 = vmatmul.mubr.bf16.gmra.mrb[36].mxu1 %v6992_v55 }
 0x519   : > { %5124 = vmatprep.mubr.bf16.mxu1 %v7004_v14 }
 0x520   : > { %5125 = vmatmul.mubr.bf16.gmra.mrb[40].mxu1 %v7000_v12 }
 0x521   : > { %5128 = vmatprep.mubr.bf16.mxu1 %v1591_v33 }
 0x528   : > { %5129 = vmatmul.mubr.bf16.gmra.mrb[44].mxu1 %v1592_v31 }
 0x5c3   : > { %v5102_v46 = vpop.f32.mrb[16].mxu1 }
 0x5c4   : > { %v1718_v37 = vpop.f32.mrb[17].mxu1  ;;  %v1727_v48 = vadd.f32 %v5102_v46, %v7023_v47 }
 0x5c5   : > { %v5103_v35 = vpop.f32.mrb[18].mxu1  ;;  %v1719_v51 = vadd.f32 %v7023_v47, %v1718_v37 }
 0x5c6   : > { %v1730_v49 = vadd.f32 %v5103_v35, %v7023_v47  ;;  %v1721_v50 = vpop.f32.mrb[19].mxu1 }
 0x5c7   : > { %v1722_v52 = vadd.f32 %v7023_v47, %v1721_v50 }
 0x5c8   : > { %v1878_v53 = vpack.c.bf16 %v1730_v49, %v1727_v48 }
 0x5c9   : > { %v1877_v54 = vpack.c.bf16 %v1722_v52, %v1719_v51 }
 0x5cb   : > { %v5106_v55 = vpop.f32.mrb[20].mxu1 }
 0x5cc   : > { %v1734_v56 = vpop.f32.mrb[21].mxu1  ;;  %v7030_v58 = vadd.f32 %v5106_v55, %v7023_v47 }
 0x5cd   : > { %v5107_v57 = vpop.f32.mrb[22].mxu1  ;;  %v1735_v62 = vadd.f32 %v7023_v47, %v1734_v56 }
 0x5ce   : > { %v1746_v60 = vadd.f32 %v5107_v57, %v7023_v47  ;;  %v1737_v61 = vpop.f32.mrb[23].mxu1 }
 0x5cf   : > { %v1738_v63 = vadd.f32 %v7023_v47, %v1737_v61 }
 0x5d0   : > { %v1880_v0 = vpack.c.bf16 %v1746_v60, %v7030_v58 }
 0x5d1   : > { %v1879_v1 = vpack.c.bf16 %v1738_v63, %v1735_v62  ;;  %v5704_v63 = vld [vmem:[%s6750_s8] ss:$8 sps:$4 sm:$0xff]  }
 0x5d3   : > { %v5110_v2 = vpop.f32.mrb[24].mxu1 }
 0x5d4   : > { %v1750_v3 = vpop.f32.mrb[25].mxu1  ;;  %v7037_v5 = vadd.f32 %v5110_v2, %v7023_v47  ;;  %v5712_v2 = vld [vmem:[%s6750_s8 + $0x20] ss:$8 sps:$4 sm:$0xff]  }
 0x5d5   : > { %v5111_v4 = vpop.f32.mrb[26].mxu1  ;;  %v1751_v8 = vadd.f32 %v7023_v47, %v1750_v3  ;;  %v5713_v3 = vld [vmem:[%s6750_s8 + $0x34] ss:$8 sps:$4 sm:$0xff]  }
 0x5d6   : > { %v7040_v6 = vadd.f32 %v5111_v4, %v7023_v47  ;;  %v1753_v7 = vpop.f32.mrb[27].mxu1  ;;  %v5715_v4 = vld [vmem:[%s6750_s8 + $0x30] ss:$8 sps:$4 sm:$0xff]  }
 0x5d7   : > { %v1754_v9 = vadd.f32 %v7023_v47, %v1753_v7  ;;  %v5719_v7 = vld [vmem:[%s6750_s8 + $0x54] ss:$8 sps:$4 sm:$0xff]  }
 0x5d8   : > { %v1882_v10 = vpack.c.bf16 %v7040_v6, %v7037_v5  ;;  %v5716_v5 = vld [vmem:[%s6750_s8 + $0x44] ss:$8 sps:$4 sm:$0xff]   ;;  %v5718_v6 = vld [vmem:[%s6750_s8 + $0x40] ss:$8 sps:$4 sm:$0xff]  }
 0x5d9   : > { %v1881_v11 = vpack.c.bf16 %v1754_v9, %v1751_v8  ;;  %v5721_v8 = vld [vmem:[%s6750_s8 + $0x50] ss:$8 sps:$4 sm:$0xff]   ;;  %v5722_v9 = vld [vmem:[%s6750_s8 + $0x64] ss:$8 sps:$4 sm:$0xff]  }
 0x5db   : > { %v5114_v12 = vpop.f32.mrb[28].mxu1 }
 0x5dc   : > { %v1766_v13 = vpop.f32.mrb[29].mxu1  ;;  %v7047_v59 = vadd.f32 %v5114_v12, %v7023_v47  ;;  %v5727_v12 = vld [vmem:[%s6750_s8 + $0x70] ss:$8 sps:$4 sm:$0xff]  }
 0x5dd   : > { %v5115_v14 = vpop.f32.mrb[30].mxu1  ;;  %v1767_v17 = vadd.f32 %v7023_v47, %v1766_v13 }
 0x5de   : > { %v1778_v15 = vadd.f32 %v5115_v14, %v7023_v47  ;;  %v1769_v16 = vpop.f32.mrb[31].mxu1  ;;  %v1845_v14 = vld [vmem:[#allocation3] sm:$0xff] }
 0x5df   : > { %v1770_v18 = vadd.f32 %v7023_v47, %v1769_v16 }
 0x5e0   : > { %v1884_v19 = vpack.c.bf16 %v1778_v15, %v7047_v59 }
 0x5e1   : > { %v1883_v20 = vpack.c.bf16 %v1770_v18, %v1767_v17  ;;  %v1846_v17 = vld [vmem:[#allocation3 + $0x8] sm:$0xff] }
 0x5e3   : > { %v5118_v21 = vpop.f32.mrb[32].mxu1 }
 0x5e4   : > { %v1782_v22 = vpop.f32.mrb[33].mxu1  ;;  %v1791_v24 = vadd.f32 %v5118_v21, %v7023_v47 }
 0x5e5   : > { %v5119_v23 = vpop.f32.mrb[34].mxu1  ;;  %v1783_v27 = vadd.f32 %v7023_v47, %v1782_v22 }
 0x5e6   : > { %v1794_v25 = vadd.f32 %v5119_v23, %v7023_v47  ;;  %v1785_v26 = vpop.f32.mrb[35].mxu1  ;;  %v1847_v23 = vld [vmem:[#allocation3 + $0x10] sm:$0xff] }
 0x5e7   : > { %v1786_v28 = vadd.f32 %v7023_v47, %v1785_v26 }
 0x5e8   : > { %v1886_v29 = vpack.c.bf16 %v1794_v25, %v1791_v24 }
 0x5e9   : > { %v1885_v30 = vpack.c.bf16 %v1786_v28, %v1783_v27  ;;  %v1848_v27 = vld [vmem:[#allocation3 + $0x18] sm:$0xff] }
 0x5eb   : > { %v5122_v31 = vpop.f32.mrb[36].mxu1  ;;  %4676 = vmatprep.subr.bf16.mxu0 %v1885_v30 }
 0x5ec   : > { %v1798_v32 = vpop.f32.mrb[37].mxu1  ;;  %4677 = vmatpush3.bf16.msra.mxu0 %v1877_v54  ;;  %v1807_v38 = vadd.f32 %v5122_v31, %v7023_v47 }
 0x5ed   : > { %v5123_v33 = vpop.f32.mrb[38].mxu1  ;;  %4678 = vmatprep.subr.bf16.mxu0 %v1886_v29  ;;  %v1799_v41 = vadd.f32 %v7023_v47, %v1798_v32 }
 0x5ee   : > { %v1810_v39 = vadd.f32 %v5123_v33, %v7023_v47  ;;  %v1801_v40 = vpop.f32.mrb[39].mxu1  ;;  %v1849_v33 = vld [vmem:[#allocation3 + $0x20] sm:$0xff] }
 0x5ef   : > { %v1802_v42 = vadd.f32 %v7023_v47, %v1801_v40 }
 0x5f0   : > { %v1888_v43 = vpack.c.bf16 %v1810_v39, %v1807_v38  ;;  %4679 = vmatpush3.bf16.msra.mxu0 %v1878_v53 }
 0x5f1   : > { %v1887_v44 = vpack.c.bf16 %v1802_v42, %v1799_v41  ;;  %v1850_v41 = vld [vmem:[#allocation3 + $0x28] sm:$0xff] }
 0x5f3   : > { %v5126_v45 = vpop.f32.mrb[40].mxu1  ;;  %4680 = vmatprep.subr.bf16.mxu0 %v1887_v44 }
 0x5f4   : > { %v1814_v36 = vpop.f32.mrb[41].mxu1  ;;  %4681 = vmatpush3.bf16.msra.mxu0 %v1879_v1  ;;  %v1823_v46 = vadd.f32 %v5126_v45, %v7023_v47  ;;  %v5709_v1 = vld [vmem:[%s6750_s8 + $0x10] ss:$8 sps:$4 sm:$0xff]  }
 0x5f5   : > { %v5127_v34 = vpop.f32.mrb[42].mxu1  ;;  %4682 = vmatprep.subr.bf16.mxu0 %v1888_v43  ;;  %v1815_v48 = vadd.f32 %v7023_v47, %v1814_v36 }
 0x5f6   : > { %v1826_v37 = vadd.f32 %v5127_v34, %v7023_v47  ;;  %v1817_v35 = vpop.f32.mrb[43].mxu1  ;;  %v1851_v34 = vld [vmem:[#allocation3 + $0x30] sm:$0xff] }
 0x5f7   : > { %v1818_v49 = vadd.f32 %v7023_v47, %v1817_v35 }
 0x5f8   : > { %v1890_v50 = vpack.c.bf16 %v1826_v37, %v1823_v46  ;;  %4683 = vmatpush3.bf16.msra.mxu0 %v1880_v0  ;;  %v5707_v0 = vld [vmem:[%s6750_s8 + $0x14] ss:$8 sps:$4 sm:$0xff]  }
 0x5f9   : > { %v1889_v51 = vpack.c.bf16 %v1818_v49, %v1815_v48  ;;  %v1852_v48 = vld [vmem:[#allocation3 + $0x38] sm:$0xff] }
 0x5fb   : > { %v5130_v52 = vpop.f32.mrb[44].mxu1  ;;  %4684 = vmatprep.subr.bf16.mxu0 %v1889_v51 }
 0x5fc   : > { %v1830_v53 = vpop.f32.mrb[45].mxu1  ;;  %4685 = vmatpush3.bf16.msra.mxu0 %v1881_v11  ;;  %v1839_v55 = vadd.f32 %v5130_v52, %v7023_v47  ;;  %v5725_v11 = vld [vmem:[%s6750_s8 + $0x74] ss:$8 sps:$4 sm:$0xff]  }
 0x5fd   : > { %v5131_v54 = vpop.f32.mrb[46].mxu1  ;;  %4686 = vmatprep.subr.bf16.mxu0 %v1890_v50  ;;  %v1831_v58 = vadd.f32 %v7023_v47, %v1830_v53 }
 0x5fe   : > { %v1842_v56 = vadd.f32 %v5131_v54, %v7023_v47  ;;  %v1833_v57 = vpop.f32.mrb[47].mxu1  ;;  %v1853_v54 = vld [vmem:[#allocation3 + $0x40] sm:$0xff] }
 0x5ff   : > { %v1834_v60 = vadd.f32 %v7023_v47, %v1833_v57  ;;  %v5710_v47 = vld [vmem:[%s6750_s8 + $0x24] ss:$8 sps:$4 sm:$0xff]  }
 0x600   : > { %v1892_v61 = vpack.c.bf16 %v1842_v56, %v1839_v55  ;;  %4687 = vmatpush3.bf16.msra.mxu0 %v1882_v10  ;;  %v5724_v10 = vld [vmem:[%s6750_s8 + $0x60] ss:$8 sps:$4 sm:$0xff]  }
 0x601   : > { %v1891_v62 = vpack.c.bf16 %v1834_v60, %v1831_v58  ;;  %v1854_v58 = vld [vmem:[#allocation3 + $0x48] sm:$0xff] }
 0x603   : > { %4688 = vmatprep.subr.bf16.mxu0 %v1891_v62 }
 0x604   : > { %4689 = vmatpush3.bf16.msra.mxu0 %v1883_v20 }
 0x605   : > { %4690 = vmatprep.subr.bf16.mxu0 %v1892_v61 }
 0x608   : > { %4691 = vmatpush3.bf16.msra.mxu0 %v1884_v19 }
 0x60b   : > { %2006 = vmatmul.mubr.bf16.vlgmr.msra.gmra.mrb[16].mxu0 %v5704_v63 }
 0x60c   : > { %2013 = vmatprep.mubr.bf16.mxu0 %v5707_v0 }
 0x613   : > { %2014 = vmatmul.mubr.bf16.gmra.mrb[20].mxu0 %v5709_v1  ;;  %v1855_v1 = vld [vmem:[#allocation3 + $0x50] sm:$0xff] }
 0x614   : > { %2021 = vmatprep.mubr.bf16.mxu0 %v5710_v47 }
 0x61b   : > { %2022 = vmatmul.mubr.bf16.gmra.mrb[24].mxu0 %v5712_v2 }
 0x61c   : > { %2029 = vmatprep.mubr.bf16.mxu0 %v5713_v3 }
 0x623   : > { %2030 = vmatmul.mubr.bf16.gmra.mrb[28].mxu0 %v5715_v4  ;;  %v1856_v4 = vld [vmem:[#allocation3 + $0x58] sm:$0xff] }
 0x624   : > { %2037 = vmatprep.mubr.bf16.mxu0 %v5716_v5 }
 0x62b   : > { %2038 = vmatmul.mubr.bf16.gmra.mrb[32].mxu0 %v5718_v6 }
 0x62c   : > { %2045 = vmatprep.mubr.bf16.mxu0 %v5719_v7 }
 0x633   : > { %2046 = vmatmul.mubr.bf16.gmra.mrb[36].mxu0 %v5721_v8 }
 0x634   : > { %2053 = vmatprep.mubr.bf16.mxu0 %v5722_v9 }
 0x63b   : > { %2054 = vmatmul.mubr.bf16.gmra.mrb[40].mxu0 %v5724_v10  ;;  %v1857_v10 = vld [vmem:[#allocation3 + $0x60] sm:$0xff] }
 0x63c   : > { %2061 = vmatprep.mubr.bf16.mxu0 %v5725_v11 }
 0x643   : > { %2062 = vmatmul.mubr.bf16.gmra.mrb[44].mxu0 %v5727_v12 }
 0x6de   : > { %v4692_v13 = vpop.f32.mrb[16].mxu0 }
 0x6df   : > { %v4693_v59 = vpop.f32.mrb[17].mxu0 }
 0x6e0   : > { %v4694_v15 = vadd.f32 %v4693_v59, %v4692_v13  ;;  %v4695_v16 = vpop.f32.mrb[18].mxu0 }
 0x6e1   : > { %v4696_v18 = vpop.f32.mrb[19].mxu0 }
 0x6e2   : > { %v2070_v19 = vadd.f32 %v4694_v15, %v1845_v14  ;;  %v4697_v20 = vadd.f32 %v4696_v18, %v4695_v16  ;;  %v1858_v14 = vld [vmem:[#allocation3 + $0x68] sm:$0xff] }
 0x6e4   : > { %2086 = vst [vmem:[#allocation3] sm:$0xff] %v2070_v19  ;;  %v2071_v21 = vadd.f32 %v4697_v20, %v1846_v17  ;;  %v1859_v19 = vld [vmem:[#allocation3 + $0x70] sm:$0xff] }
 0x6e6   : > { %2087 = vst [vmem:[#allocation3 + $0x8] sm:$0xff] %v2071_v21  ;;  %v4698_v22 = vpop.f32.mrb[20].mxu0 }
 0x6e7   : > { %v4699_v24 = vpop.f32.mrb[21].mxu0 }
 0x6e8   : > { %v4700_v25 = vadd.f32 %v4699_v24, %v4698_v22  ;;  %v4701_v26 = vpop.f32.mrb[22].mxu0 }
 0x6e9   : > { %v4702_v28 = vpop.f32.mrb[23].mxu0 }
 0x6ea   : > { %v2072_v29 = vadd.f32 %v4700_v25, %v1847_v23  ;;  %v4703_v30 = vadd.f32 %v4702_v28, %v4701_v26  ;;  %v1860_v23 = vld [vmem:[#allocation3 + $0x78] sm:$0xff] }
 0x6ec   : > { %2088 = vst [vmem:[#allocation3 + $0x10] sm:$0xff] %v2072_v29  ;;  %v2073_v31 = vadd.f32 %v4703_v30, %v1848_v27 }
 0x6ee   : > { %2089 = vst [vmem:[#allocation3 + $0x18] sm:$0xff] %v2073_v31  ;;  %v4704_v32 = vpop.f32.mrb[24].mxu0 }
 0x6ef   : > { %v4705_v38 = vpop.f32.mrb[25].mxu0 }
 0x6f0   : > { %v4706_v39 = vadd.f32 %v4705_v38, %v4704_v32  ;;  %v4707_v40 = vpop.f32.mrb[26].mxu0 }
 0x6f1   : > { %v4708_v42 = vpop.f32.mrb[27].mxu0 }
 0x6f2   : > { %v2074_v43 = vadd.f32 %v4706_v39, %v1849_v33  ;;  %v4709_v44 = vadd.f32 %v4708_v42, %v4707_v40 }
 0x6f4   : > { %2090 = vst [vmem:[#allocation3 + $0x20] sm:$0xff] %v2074_v43  ;;  %v2075_v45 = vadd.f32 %v4709_v44, %v1850_v41 }
 0x6f6   : > { %2091 = vst [vmem:[#allocation3 + $0x28] sm:$0xff] %v2075_v45  ;;  %v4710_v36 = vpop.f32.mrb[28].mxu0 }
 0x6f7   : > { %v4711_v46 = vpop.f32.mrb[29].mxu0 }
 0x6f8   : > { %v4712_v37 = vadd.f32 %v4711_v46, %v4710_v36  ;;  %v4713_v35 = vpop.f32.mrb[30].mxu0 }
 0x6f9   : > { %v4714_v49 = vpop.f32.mrb[31].mxu0 }
 0x6fa   : > { %v2076_v50 = vadd.f32 %v4712_v37, %v1851_v34  ;;  %v4715_v51 = vadd.f32 %v4714_v49, %v4713_v35 }
 0x6fc   : > { %2092 = vst [vmem:[#allocation3 + $0x30] sm:$0xff] %v2076_v50  ;;  %v2077_v52 = vadd.f32 %v4715_v51, %v1852_v48 }
 0x6fe   : > { %2093 = vst [vmem:[#allocation3 + $0x38] sm:$0xff] %v2077_v52  ;;  %v4716_v53 = vpop.f32.mrb[32].mxu0 }
 0x6ff   : > { %v4717_v55 = vpop.f32.mrb[33].mxu0 }
 0x700   : > { %v4718_v56 = vadd.f32 %v4717_v55, %v4716_v53  ;;  %v4719_v57 = vpop.f32.mrb[34].mxu0 }
 0x701   : > { %v4720_v60 = vpop.f32.mrb[35].mxu0 }
 0x702   : > { %v2078_v61 = vadd.f32 %v4718_v56, %v1853_v54  ;;  %v4721_v62 = vadd.f32 %v4720_v60, %v4719_v57 }
 0x704   : > { %2094 = vst [vmem:[#allocation3 + $0x40] sm:$0xff] %v2078_v61  ;;  %v2079_v63 = vadd.f32 %v4721_v62, %v1854_v58 }
 0x706   : > { %2095 = vst [vmem:[#allocation3 + $0x48] sm:$0xff] %v2079_v63  ;;  %v4722_v0 = vpop.f32.mrb[36].mxu0 }
 0x707   : > { %v4723_v47 = vpop.f32.mrb[37].mxu0 }
 0x708   : > { %v4724_v2 = vadd.f32 %v4723_v47, %v4722_v0  ;;  %v4725_v3 = vpop.f32.mrb[38].mxu0 }
 0x709   : > { %v4726_v5 = vpop.f32.mrb[39].mxu0 }
 0x70a   : > { %v2080_v6 = vadd.f32 %v4724_v2, %v1855_v1  ;;  %v4727_v7 = vadd.f32 %v4726_v5, %v4725_v3 }
 0x70c   : > { %2096 = vst [vmem:[#allocation3 + $0x50] sm:$0xff] %v2080_v6  ;;  %v2081_v8 = vadd.f32 %v4727_v7, %v1856_v4 }
 0x70e   : > { %2097 = vst [vmem:[#allocation3 + $0x58] sm:$0xff] %v2081_v8  ;;  %v4728_v9 = vpop.f32.mrb[40].mxu0 }
 0x70f   : > { %v4729_v11 = vpop.f32.mrb[41].mxu0 }
 0x710   : > { %v4730_v12 = vadd.f32 %v4729_v11, %v4728_v9  ;;  %v4731_v13 = vpop.f32.mrb[42].mxu0 }
 0x711   : > { %v4732_v59 = vpop.f32.mrb[43].mxu0 }
 0x712   : > { %v2082_v15 = vadd.f32 %v4730_v12, %v1857_v10  ;;  %v4733_v16 = vadd.f32 %v4732_v59, %v4731_v13 }
 0x714   : > { %2098 = vst [vmem:[#allocation3 + $0x60] sm:$0xff] %v2082_v15  ;;  %v2083_v17 = vadd.f32 %v4733_v16, %v1858_v14 }
 0x716   : > { %2099 = vst [vmem:[#allocation3 + $0x68] sm:$0xff] %v2083_v17  ;;  %v4734_v18 = vpop.f32.mrb[44].mxu0 }
 0x717   : > { %v4735_v20 = vpop.f32.mrb[45].mxu0 }
 0x718   : > { %v4736_v21 = vadd.f32 %v4735_v20, %v4734_v18  ;;  %v4737_v22 = vpop.f32.mrb[46].mxu0 }
 0x719   : > { %v4738_v24 = vpop.f32.mrb[47].mxu0 }
 0x71a   : > { %v2084_v25 = vadd.f32 %v4736_v21, %v1859_v19  ;;  %v4739_v26 = vadd.f32 %v4738_v24, %v4737_v22 }
 0x71c   : > { %2100 = vst [vmem:[#allocation3 + $0x70] sm:$0xff] %v2084_v25  ;;  %v2085_v27 = vadd.f32 %v4739_v26, %v1860_v23 }
 0x71e   : > { %2101 = vst [vmem:[#allocation3 + $0x78] sm:$0xff] %v2085_v27 }
 0x71f PF: > { %s7751_s20 = sld [smem:[#allocation32_spill]] }
 0x725   : > { %p4428_p0 = scmp.ne.s32.totalorder %s7751_s20, 2 }
 0x726   : > { %v2138_v28 = vld [vmem:[#allocation3] sm:$0xff] (!%p4428_p0)  ;;  %v2139_v29 = vld [vmem:[#allocation3 + $0x8] sm:$0xff] (!%p4428_p0)  ;;  %v2140_v30 = vld [vmem:[#allocation3 + $0x10] sm:$0xff] (!%p4428_p0)  ;;  %s7752_s0 = sld [smem:[#allocation31_spill]] (!%p4428_p0) }
 0x727   : > { %2105 = sbr.rel (%p4428_p0) target bundleno = 2697 (0xa89), region = 112  ;;  %v2154_v31 = vpack.c.bf16 (!%p4428_p0), %v2139_v29, %v2138_v28  ;;  %v2141_v32 = vld [vmem:[#allocation3 + $0x18] sm:$0xff] (!%p4428_p0)  ;;  %v2142_v38 = vld [vmem:[#allocation3 + $0x20] sm:$0xff] (!%p4428_p0)  ;;  %v2143_v39 = vld [vmem:[#allocation3 + $0x28] sm:$0xff] (!%p4428_p0) }
 0x728   : > { %v2155_v33 = vpack.c.bf16 (!%p4428_p0), %v2141_v32, %v2140_v30  ;;  %v2144_v40 = vld [vmem:[#allocation3 + $0x30] sm:$0xff] (!%p4428_p0)  ;;  %v2156_v41 = vpack.c.bf16 (!%p4428_p0), %v2143_v39, %v2142_v38  ;;  %v2145_v42 = vld [vmem:[#allocation3 + $0x38] sm:$0xff] (!%p4428_p0)  ;;  %v5728_v43 = vld [vmem:[%s6757_s24] sm:$0xff] (!%p4428_p0)  }
 0x729   : > { %5132 = vmatprep.subr.bf16.mxu0 (!%p4428_p0), %v2154_v31  ;;  %5388 = vmatprep.subr.bf16.mxu1 (!%p4428_p0), %v2154_v31  ;;  %v5729_v44 = vld [vmem:[%s6757_s24 + $0x40] sm:$0xff] (!%p4428_p0)   ;;  %v2157_v45 = vpack.c.bf16 (!%p4428_p0), %v2145_v42, %v2144_v40  ;;  %v2147_v34 = vld [vmem:[#allocation3 + $0x48] sm:$0xff] (!%p4428_p0)  ;;  %v2148_v37 = vld [vmem:[#allocation3 + $0x50] sm:$0xff] (!%p4428_p0) }
 0x72a   : > { %5133 = vmatpush3.bf16.msra.mxu0 (!%p4428_p0), %v2154_v31  ;;  %5396 = vmatpush3.bf16.msra.mxu1 (!%p4428_p0), %v2154_v31  ;;  %v2146_v36 = vld [vmem:[#allocation3 + $0x40] sm:$0xff] (!%p4428_p0)  ;;  %v2149_v35 = vld [vmem:[#allocation3 + $0x58] sm:$0xff] (!%p4428_p0)  ;;  %v2151_v50 = vld [vmem:[#allocation3 + $0x68] sm:$0xff] (!%p4428_p0) }
 0x72b   : > { %5134 = vmatprep.subr.bf16.mxu0 (!%p4428_p0), %v2155_v33  ;;  %5389 = vmatprep.subr.bf16.mxu1 (!%p4428_p0), %v2155_v33  ;;  %v2158_v46 = vpack.c.bf16 (!%p4428_p0), %v2147_v34, %v2146_v36  ;;  %v2159_v48 = vpack.c.bf16 (!%p4428_p0), %v2149_v35, %v2148_v37  ;;  %v2150_v49 = vld [vmem:[#allocation3 + $0x60] sm:$0xff] (!%p4428_p0)  ;;  %v2152_v52 = vld [vmem:[#allocation3 + $0x70] sm:$0xff] (!%p4428_p0)  ;;  %v2153_v53 = vld [vmem:[#allocation3 + $0x78] sm:$0xff] (!%p4428_p0) }
 0x72c   : > { %5148 = vmatprep.mubr.bf16.mxu0 (!%p4428_p0), %v5728_v43  ;;  %5164 = vmatprep.mubr.bf16.mxu1 (!%p4428_p0), %v5729_v44  ;;  %v2160_v51 = vpack.c.bf16 (!%p4428_p0), %v2151_v50, %v2150_v49  ;;  %v2161_v54 = vpack.c.bf16 (!%p4428_p0), %v2153_v53, %v2152_v52  ;;  %v5730_v55 = vld [vmem:[%s6757_s24 + $0x8] sm:$0xff] (!%p4428_p0)   ;;  %v5732_v57 = vld [vmem:[%s6757_s24 + $0x10] sm:$0xff] (!%p4428_p0)   ;;  %v5734_v60 = vld [vmem:[%s6757_s24 + $0x18] sm:$0xff] (!%p4428_p0)   ;;  %p4445_p12 = scmp.ne.s32.totalorder (!%p4428_p0), %s7752_s0, 0 }
 0x72d   : > { %v5731_v56 = vld [vmem:[%s6757_s24 + $0x48] sm:$0xff] (!%p4428_p0)   ;;  %v5733_v58 = vld [vmem:[%s6757_s24 + $0x50] sm:$0xff] (!%p4428_p0)   ;;  %v5735_v61 = vld [vmem:[%s6757_s24 + $0x58] sm:$0xff] (!%p4428_p0)  }
 0x72e   : > { %5135 = vmatpush3.bf16.msra.mxu0 %v2155_v33  ;;  %5397 = vmatpush3.bf16.msra.mxu1 %v2155_v33  ;;  %v5736_v62 = vld [vmem:[%s6757_s24 + $0x20] sm:$0xff]   ;;  %v5738_v0 = vld [vmem:[%s6757_s24 + $0x28] sm:$0xff]   ;;  %v5740_v47 = vld [vmem:[%s6757_s24 + $0x30] sm:$0xff]   ;;  %v6244_v53 = vmov (!%p4445_p12), 0.0  }
 0x72f   : > { %5136 = vmatprep.subr.bf16.mxu0 %v2156_v41  ;;  %5390 = vmatprep.subr.bf16.mxu1 %v2156_v41  ;;  %v5737_v63 = vld [vmem:[%s6757_s24 + $0x60] sm:$0xff]   ;;  %v5739_v1 = vld [vmem:[%s6757_s24 + $0x68] sm:$0xff]   ;;  %v5741_v2 = vld [vmem:[%s6757_s24 + $0x70] sm:$0xff]   ;;  %2439 = vst [vmem:[#allocation2] sm:$0xff] (!%p4445_p12), %v6244_v53 }
 0x730   : > { %v5742_v3 = vld [vmem:[%s6757_s24 + $0x38] sm:$0xff]   ;;  %2440 = vst [vmem:[#allocation2 + $0x8] sm:$0xff] (!%p4445_p12), %v6244_v53  ;;  %2441 = vst [vmem:[#allocation2 + $0x10] sm:$0xff] (!%p4445_p12), %v6244_v53 }
 0x731   : > { %v5743_v4 = vld [vmem:[%s6757_s24 + $0x78] sm:$0xff]   ;;  %2442 = vst [vmem:[#allocation2 + $0x18] sm:$0xff] (!%p4445_p12), %v6244_v53  ;;  %2443 = vst [vmem:[#allocation2 + $0x20] sm:$0xff] (!%p4445_p12), %v6244_v53 }
 0x732   : > { %5137 = vmatpush3.bf16.msra.mxu0 %v2156_v41  ;;  %5398 = vmatpush3.bf16.msra.mxu1 %v2156_v41  ;;  %2444 = vst [vmem:[#allocation2 + $0x28] sm:$0xff] (!%p4445_p12), %v6244_v53  ;;  %2445 = vst [vmem:[#allocation2 + $0x30] sm:$0xff] (!%p4445_p12), %v6244_v53 }
 0x733   : > { %5138 = vmatprep.subr.bf16.mxu0 %v2157_v45  ;;  %5391 = vmatprep.subr.bf16.mxu1 %v2157_v45  ;;  %2446 = vst [vmem:[#allocation2 + $0x38] sm:$0xff] (!%p4445_p12), %v6244_v53  ;;  %2447 = vst [vmem:[#allocation2 + $0x40] sm:$0xff] (!%p4445_p12), %v6244_v53 }
 0x734   : > { %2448 = vst [vmem:[#allocation2 + $0x48] sm:$0xff] (!%p4445_p12), %v6244_v53  ;;  %2449 = vst [vmem:[#allocation2 + $0x50] sm:$0xff] (!%p4445_p12), %v6244_v53 }
 0x735   : > { %2450 = vst [vmem:[#allocation2 + $0x58] sm:$0xff] (!%p4445_p12), %v6244_v53  ;;  %2451 = vst [vmem:[#allocation2 + $0x60] sm:$0xff] (!%p4445_p12), %v6244_v53 }
 0x736   : > { %5139 = vmatpush3.bf16.msra.mxu0 %v2157_v45  ;;  %5399 = vmatpush3.bf16.msra.mxu1 %v2157_v45  ;;  %2452 = vst [vmem:[#allocation2 + $0x68] sm:$0xff] (!%p4445_p12), %v6244_v53  ;;  %2453 = vst [vmem:[#allocation2 + $0x70] sm:$0xff] (!%p4445_p12), %v6244_v53 }
 0x737   : > { %5140 = vmatprep.subr.bf16.mxu0 %v2158_v46  ;;  %5392 = vmatprep.subr.bf16.mxu1 %v2158_v46  ;;  %2454 = vst [vmem:[#allocation2 + $0x78] sm:$0xff] (!%p4445_p12), %v6244_v53 }
 0x73a   : > { %5141 = vmatpush3.bf16.msra.mxu0 %v2158_v46  ;;  %5400 = vmatpush3.bf16.msra.mxu1 %v2158_v46 }
 0x73b   : > { %5142 = vmatprep.subr.bf16.mxu0 %v2159_v48  ;;  %5393 = vmatprep.subr.bf16.mxu1 %v2159_v48 }
 0x73e   : > { %5143 = vmatpush3.bf16.msra.mxu0 %v2159_v48  ;;  %5401 = vmatpush3.bf16.msra.mxu1 %v2159_v48 }
 0x73f   : > { %5144 = vmatprep.subr.bf16.mxu0 %v2160_v51  ;;  %5394 = vmatprep.subr.bf16.mxu1 %v2160_v51 }
 0x742   : > { %5145 = vmatpush3.bf16.msra.mxu0 %v2160_v51  ;;  %5402 = vmatpush3.bf16.msra.mxu1 %v2160_v51 }
 0x743   : > { %5146 = vmatprep.subr.bf16.mxu0 %v2161_v54  ;;  %5395 = vmatprep.subr.bf16.mxu1 %v2161_v54 }
 0x746   : > { %5147 = vmatpush3.bf16.msra.mxu0 %v2161_v54  ;;  %5403 = vmatpush3.bf16.msra.mxu1 %v2161_v54 }
 0x749   : > { %5149 = vmatmul.mubr.bf16.vlgmr.msra.gmra.mrb[0].mxu0 %v5730_v55  ;;  %5165 = vmatmul.mubr.bf16.vlgmr.msra.gmra.mrb[0].mxu1 %v5731_v56 }
 0x74a   : > { %5152 = vmatprep.mubr.bf16.mxu0 %v5732_v57  ;;  %5168 = vmatprep.mubr.bf16.mxu1 %v5733_v58 }
 0x751   : > { %5153 = vmatmul.mubr.bf16.gmra.mrb[4].mxu0 %v5734_v60  ;;  %5169 = vmatmul.mubr.bf16.gmra.mrb[4].mxu1 %v5735_v61 }
 0x752   : > { %5156 = vmatprep.mubr.bf16.mxu0 %v5736_v62  ;;  %5172 = vmatprep.mubr.bf16.mxu1 %v5737_v63 }
 0x759   : > { %5157 = vmatmul.mubr.bf16.gmra.mrb[8].mxu0 %v5738_v0  ;;  %5173 = vmatmul.mubr.bf16.gmra.mrb[8].mxu1 %v5739_v1 }
 0x75a   : > { %5160 = vmatprep.mubr.bf16.mxu0 %v5740_v47  ;;  %5176 = vmatprep.mubr.bf16.mxu1 %v5741_v2 }
 0x761   : > { %5161 = vmatmul.mubr.bf16.gmra.mrb[12].mxu0 %v5742_v3  ;;  %5177 = vmatmul.mubr.bf16.gmra.mrb[12].mxu1 %v5743_v4 }
 0x81c   : > { %v7101_v5 = vpop.f32.mrb[0].mxu0  ;;  %v7103_v6 = vpop.f32.mrb[0].mxu1 }
 0x81d   : > { %v7105_v7 = vpop.f32.mrb[1].mxu0  ;;  %v7107_v8 = vpop.f32.mrb[1].mxu1 }
 0x81e   : > { %v7109_v9 = vpop.f32.mrb[2].mxu0  ;;  %v7111_v10 = vpop.f32.mrb[2].mxu1 }
 0x81f   : > { %v2420_v11 = vpack.c.bf16 %v7109_v9, %v7101_v5  ;;  %v2428_v12 = vpack.c.bf16 %v7111_v10, %v7103_v6  ;;  %v2295_v13 = vpop.f32.mrb[3].mxu0  ;;  %v7117_v14 = vpop.f32.mrb[3].mxu1 }
 0x820   : > { %v2419_v59 = vpack.c.bf16 %v2295_v13, %v7105_v7  ;;  %v2427_v15 = vpack.c.bf16 %v7117_v14, %v7107_v8 }
 0x824   : > { %v7122_v16 = vpop.f32.mrb[4].mxu0  ;;  %v7124_v17 = vpop.f32.mrb[4].mxu1 }
 0x825   : > { %v7126_v18 = vpop.f32.mrb[5].mxu0  ;;  %v7128_v19 = vpop.f32.mrb[5].mxu1 }
 0x826   : > { %v7130_v20 = vpop.f32.mrb[6].mxu0  ;;  %v7132_v21 = vpop.f32.mrb[6].mxu1 }
 0x827   : > { %v2422_v22 = vpack.c.bf16 %v7130_v20, %v7122_v16  ;;  %v2430_v23 = vpack.c.bf16 %v7132_v21, %v7124_v17  ;;  %v7138_v24 = vpop.f32.mrb[7].mxu0  ;;  %v7140_v25 = vpop.f32.mrb[7].mxu1 }
 0x828   : > { %v2421_v26 = vpack.c.bf16 %v7138_v24, %v7126_v18  ;;  %v2429_v27 = vpack.c.bf16 %v7140_v25, %v7128_v19 }
 0x82c   : > { %v7146_v28 = vpop.f32.mrb[8].mxu0  ;;  %v7148_v29 = vpop.f32.mrb[8].mxu1 }
 0x82d   : > { %v7150_v30 = vpop.f32.mrb[9].mxu0  ;;  %v7152_v31 = vpop.f32.mrb[9].mxu1 }
 0x82e   : > { %v7154_v32 = vpop.f32.mrb[10].mxu0  ;;  %v7156_v33 = vpop.f32.mrb[10].mxu1 }
 0x82f   : > { %v2424_v38 = vpack.c.bf16 %v7154_v32, %v7146_v28  ;;  %v2432_v39 = vpack.c.bf16 %v7156_v33, %v7148_v29  ;;  %v7162_v40 = vpop.f32.mrb[11].mxu0  ;;  %v7164_v41 = vpop.f32.mrb[11].mxu1 }
 0x830   : > { %v2423_v42 = vpack.c.bf16 %v7162_v40, %v7150_v30  ;;  %v2431_v43 = vpack.c.bf16 %v7164_v41, %v7152_v31 }
 0x832   : > { %2438 = sbr.rel (%p4445_p12) target bundleno = 2105 (0x839), region = 116 }
 0x834   : > { %v7170_v44 = vpop.f32.mrb[12].mxu0  ;;  %v7172_v45 = vpop.f32.mrb[12].mxu1 }
 0x835   : > { %v2340_v36 = vpop.f32.mrb[13].mxu0  ;;  %v7174_v34 = vpop.f32.mrb[13].mxu1 }
 0x836   : > { %v5163_v46 = vpop.f32.mrb[14].mxu0  ;;  %v7176_v37 = vpop.f32.mrb[14].mxu1 }
 0x837   : > { %v2426_v35 = vpack.c.bf16 %v5163_v46, %v7170_v44  ;;  %v2434_v48 = vpack.c.bf16 %v7176_v37, %v7172_v45  ;;  %v2343_v49 = vpop.f32.mrb[15].mxu0  ;;  %v2407_v50 = vpop.f32.mrb[15].mxu1 }
 0x838   : > { %v2425_v51 = vpack.c.bf16 %v2343_v49, %v2340_v36  ;;  %v2433_v52 = vpack.c.bf16 %v2407_v50, %v7174_v34 }
 0x839 PF: > { %v5744_v54 = vld [vmem:[#allocation13] sm:$0xff]   ;;  %5196 = vmatprep.mubr.bf16.mxu1 %v2419_v59  ;;  %v5745_v55 = vld [vmem:[#allocation13 + $0x8] sm:$0xff]   ;;  %v5746_v56 = vld [vmem:[#allocation13 + $0x10] sm:$0xff]   ;;  %s7753_s4 = sld [smem:[#allocation47_spill]] }
 0x83a   : > { %5180 = vmatprep.subr.bf16.mxu1 %v5744_v54  ;;  %v5747_v57 = vld [vmem:[#allocation13 + $0x18] sm:$0xff]   ;;  %v5748_v58 = vld [vmem:[#allocation13 + $0x20] sm:$0xff]   ;;  %v5749_v60 = vld [vmem:[#allocation13 + $0x28] sm:$0xff]  }
 0x83b   : > { %5181 = vmatpush3.bf16.msra.mxu1 %v5744_v54  ;;  %v5750_v61 = vld [vmem:[#allocation13 + $0x30] sm:$0xff]   ;;  %v5751_v62 = vld [vmem:[#allocation13 + $0x38] sm:$0xff]   ;;  %v5754_v63 = vld [vmem:[%s6750_s8 + $0x4] ss:$8 sps:$4 sm:$0xff]  }
 0x83c   : > { %5182 = vmatprep.subr.bf16.mxu1 %v5745_v55  ;;  %2847 = vmatprep.mubr.bf16.mxu0 %v5754_v63 }
 0x83f   : > { %5183 = vmatpush3.bf16.msra.mxu1 %v5745_v55  ;;  %v7220_v1 = vld [vmem:[%s7753_s4] ss:$0 sm:$0xff] }
 0x840   : > { %5184 = vmatprep.subr.bf16.mxu1 %v5746_v56 }
 0x843   : > { %5185 = vmatpush3.bf16.msra.mxu1 %v5746_v56 }
 0x844   : > { %5186 = vmatprep.subr.bf16.mxu1 %v5747_v57 }
 0x847   : > { %5187 = vmatpush3.bf16.msra.mxu1 %v5747_v57 }
 0x848   : > { %5188 = vmatprep.subr.bf16.mxu1 %v5748_v58 }
 0x84b   : > { %5189 = vmatpush3.bf16.msra.mxu1 %v5748_v58 }
 0x84c   : > { %5190 = vmatprep.subr.bf16.mxu1 %v5749_v60 }
 0x84f   : > { %5191 = vmatpush3.bf16.msra.mxu1 %v5749_v60 }
 0x850   : > { %5192 = vmatprep.subr.bf16.mxu1 %v5750_v61 }
 0x853   : > { %5193 = vmatpush3.bf16.msra.mxu1 %v5750_v61 }
 0x854   : > { %5194 = vmatprep.subr.bf16.mxu1 %v5751_v62 }
 0x857   : > { %5195 = vmatpush3.bf16.msra.mxu1 %v5751_v62 }
 0x85a   : > { %5197 = vmatmul.mubr.bf16.vlgmr.msra.gmra.mrb[16].mxu1 %v2420_v11 }
 0x85b   : > { %5200 = vmatprep.mubr.bf16.mxu1 %v2421_v26 }
 0x862   : > { %5201 = vmatmul.mubr.bf16.gmra.mrb[20].mxu1 %v2422_v22 }
 0x863   : > { %5204 = vmatprep.mubr.bf16.mxu1 %v2423_v42 }
 0x86a   : > { %5205 = vmatmul.mubr.bf16.gmra.mrb[24].mxu1 %v2424_v38 }
 0x86b   : > { %5208 = vmatprep.mubr.bf16.mxu1 %v2425_v51 }
 0x872   : > { %5209 = vmatmul.mubr.bf16.gmra.mrb[28].mxu1 %v2426_v35 }
 0x873   : > { %5212 = vmatprep.mubr.bf16.mxu1 %v2427_v15 }
 0x87a   : > { %5213 = vmatmul.mubr.bf16.gmra.mrb[32].mxu1 %v2428_v12 }
 0x87b   : > { %5216 = vmatprep.mubr.bf16.mxu1 %v2429_v27 }
 0x882   : > { %5217 = vmatmul.mubr.bf16.gmra.mrb[36].mxu1 %v2430_v23 }
 0x883   : > { %5220 = vmatprep.mubr.bf16.mxu1 %v2431_v43 }
 0x88a   : > { %5221 = vmatmul.mubr.bf16.gmra.mrb[40].mxu1 %v2432_v39 }
 0x88b   : > { %5224 = vmatprep.mubr.bf16.mxu1 %v2433_v52 }
 0x892   : > { %5225 = vmatmul.mubr.bf16.gmra.mrb[44].mxu1 %v2434_v48 }
 0x92d   : > { %v5198_v0 = vpop.f32.mrb[16].mxu1 }
 0x92e   : > { %v2560_v47 = vpop.f32.mrb[17].mxu1  ;;  %v2569_v3 = vadd.f32 %v5198_v0, %v7220_v1 }
 0x92f   : > { %v5199_v2 = vpop.f32.mrb[18].mxu1  ;;  %v2561_v6 = vadd.f32 %v7220_v1, %v2560_v47 }
 0x930   : > { %v2572_v4 = vadd.f32 %v5199_v2, %v7220_v1  ;;  %v2563_v5 = vpop.f32.mrb[19].mxu1 }
 0x931   : > { %v2564_v7 = vadd.f32 %v7220_v1, %v2563_v5 }
 0x932   : > { %v2720_v8 = vpack.c.bf16 %v2572_v4, %v2569_v3 }
 0x933   : > { %v2719_v9 = vpack.c.bf16 %v2564_v7, %v2561_v6 }
 0x935   : > { %v5202_v10 = vpop.f32.mrb[20].mxu1 }
 0x936   : > { %v2576_v11 = vpop.f32.mrb[21].mxu1  ;;  %v7227_v13 = vadd.f32 %v5202_v10, %v7220_v1 }
 0x937   : > { %v5203_v12 = vpop.f32.mrb[22].mxu1  ;;  %v2577_v15 = vadd.f32 %v7220_v1, %v2576_v11 }
 0x938   : > { %v2588_v14 = vadd.f32 %v5203_v12, %v7220_v1  ;;  %v2579_v59 = vpop.f32.mrb[23].mxu1 }
 0x939   : > { %v2580_v16 = vadd.f32 %v7220_v1, %v2579_v59 }
 0x93a   : > { %v2722_v17 = vpack.c.bf16 %v2588_v14, %v7227_v13 }
 0x93b   : > { %v2721_v18 = vpack.c.bf16 %v2580_v16, %v2577_v15  ;;  %v5752_v16 = vld [vmem:[%s6750_s8] ss:$8 sps:$4 sm:$0xff]  }
 0x93d   : > { %v5206_v19 = vpop.f32.mrb[24].mxu1 }
 0x93e   : > { %v2592_v20 = vpop.f32.mrb[25].mxu1  ;;  %v7234_v22 = vadd.f32 %v5206_v19, %v7220_v1  ;;  %v5760_v19 = vld [vmem:[%s6750_s8 + $0x20] ss:$8 sps:$4 sm:$0xff]  }
 0x93f   : > { %v5207_v21 = vpop.f32.mrb[26].mxu1  ;;  %v2593_v25 = vadd.f32 %v7220_v1, %v2592_v20  ;;  %v5761_v20 = vld [vmem:[%s6750_s8 + $0x34] ss:$8 sps:$4 sm:$0xff]  }
 0x940   : > { %v7237_v23 = vadd.f32 %v5207_v21, %v7220_v1  ;;  %v2595_v24 = vpop.f32.mrb[27].mxu1  ;;  %v5763_v21 = vld [vmem:[%s6750_s8 + $0x30] ss:$8 sps:$4 sm:$0xff]  }
 0x941   : > { %v2596_v26 = vadd.f32 %v7220_v1, %v2595_v24  ;;  %v5767_v24 = vld [vmem:[%s6750_s8 + $0x54] ss:$8 sps:$4 sm:$0xff]  }
 0x942   : > { %v2724_v27 = vpack.c.bf16 %v7237_v23, %v7234_v22  ;;  %v5764_v22 = vld [vmem:[%s6750_s8 + $0x44] ss:$8 sps:$4 sm:$0xff]   ;;  %v5766_v23 = vld [vmem:[%s6750_s8 + $0x40] ss:$8 sps:$4 sm:$0xff]  }
 0x943   : > { %v2723_v28 = vpack.c.bf16 %v2596_v26, %v2593_v25  ;;  %v5769_v25 = vld [vmem:[%s6750_s8 + $0x50] ss:$8 sps:$4 sm:$0xff]   ;;  %v5770_v26 = vld [vmem:[%s6750_s8 + $0x64] ss:$8 sps:$4 sm:$0xff]  }
 0x945   : > { %v5210_v29 = vpop.f32.mrb[28].mxu1 }
 0x946   : > { %v2608_v30 = vpop.f32.mrb[29].mxu1  ;;  %v7244_v32 = vadd.f32 %v5210_v29, %v7220_v1  ;;  %v5775_v29 = vld [vmem:[%s6750_s8 + $0x70] ss:$8 sps:$4 sm:$0xff]  }
 0x947   : > { %v5211_v31 = vpop.f32.mrb[30].mxu1  ;;  %v2609_v39 = vadd.f32 %v7220_v1, %v2608_v30 }
 0x948   : > { %v2620_v33 = vadd.f32 %v5211_v31, %v7220_v1  ;;  %v2611_v38 = vpop.f32.mrb[31].mxu1  ;;  %v2687_v31 = vld [vmem:[#allocation2] sm:$0xff] }
 0x949   : > { %v2612_v40 = vadd.f32 %v7220_v1, %v2611_v38 }
 0x94a   : > { %v2726_v41 = vpack.c.bf16 %v2620_v33, %v7244_v32 }
 0x94b   : > { %v2725_v42 = vpack.c.bf16 %v2612_v40, %v2609_v39  ;;  %v2688_v39 = vld [vmem:[#allocation2 + $0x8] sm:$0xff] }
 0x94d   : > { %v5214_v43 = vpop.f32.mrb[32].mxu1 }
 0x94e   : > { %v2624_v44 = vpop.f32.mrb[33].mxu1  ;;  %v2633_v36 = vadd.f32 %v5214_v43, %v7220_v1 }
 0x94f   : > { %v5215_v45 = vpop.f32.mrb[34].mxu1  ;;  %v2625_v37 = vadd.f32 %v7220_v1, %v2624_v44 }
 0x950   : > { %v2636_v34 = vadd.f32 %v5215_v45, %v7220_v1  ;;  %v2627_v46 = vpop.f32.mrb[35].mxu1  ;;  %v2689_v45 = vld [vmem:[#allocation2 + $0x10] sm:$0xff] }
 0x951   : > { %v2628_v35 = vadd.f32 %v7220_v1, %v2627_v46 }
 0x952   : > { %v2728_v48 = vpack.c.bf16 %v2636_v34, %v2633_v36 }
 0x953   : > { %v2727_v49 = vpack.c.bf16 %v2628_v35, %v2625_v37  ;;  %v2690_v37 = vld [vmem:[#allocation2 + $0x18] sm:$0xff] }
 0x955   : > { %v5218_v50 = vpop.f32.mrb[36].mxu1  ;;  %4788 = vmatprep.subr.bf16.mxu0 %v2727_v49 }
 0x956   : > { %v2640_v51 = vpop.f32.mrb[37].mxu1  ;;  %4789 = vmatpush3.bf16.msra.mxu0 %v2719_v9  ;;  %v2649_v53 = vadd.f32 %v5218_v50, %v7220_v1 }
 0x957   : > { %v5219_v52 = vpop.f32.mrb[38].mxu1  ;;  %4790 = vmatprep.subr.bf16.mxu0 %v2728_v48  ;;  %v2641_v56 = vadd.f32 %v7220_v1, %v2640_v51 }
 0x958   : > { %v2652_v54 = vadd.f32 %v5219_v52, %v7220_v1  ;;  %v2643_v55 = vpop.f32.mrb[39].mxu1  ;;  %v2691_v52 = vld [vmem:[#allocation2 + $0x20] sm:$0xff] }
 0x959   : > { %v2644_v57 = vadd.f32 %v7220_v1, %v2643_v55 }
 0x95a   : > { %v2730_v58 = vpack.c.bf16 %v2652_v54, %v2649_v53  ;;  %4791 = vmatpush3.bf16.msra.mxu0 %v2720_v8 }
 0x95b   : > { %v2729_v60 = vpack.c.bf16 %v2644_v57, %v2641_v56  ;;  %v2692_v56 = vld [vmem:[#allocation2 + $0x28] sm:$0xff] }
 0x95d   : > { %v5222_v61 = vpop.f32.mrb[40].mxu1  ;;  %4792 = vmatprep.subr.bf16.mxu0 %v2729_v60 }
 0x95e   : > { %v2656_v62 = vpop.f32.mrb[41].mxu1  ;;  %4793 = vmatpush3.bf16.msra.mxu0 %v2721_v18  ;;  %v2665_v0 = vadd.f32 %v5222_v61, %v7220_v1  ;;  %v5757_v18 = vld [vmem:[%s6750_s8 + $0x10] ss:$8 sps:$4 sm:$0xff]  }
 0x95f   : > { %v5223_v63 = vpop.f32.mrb[42].mxu1  ;;  %4794 = vmatprep.subr.bf16.mxu0 %v2730_v58  ;;  %v2657_v3 = vadd.f32 %v7220_v1, %v2656_v62 }
 0x960   : > { %v2668_v47 = vadd.f32 %v5223_v63, %v7220_v1  ;;  %v2659_v2 = vpop.f32.mrb[43].mxu1  ;;  %v2693_v63 = vld [vmem:[#allocation2 + $0x30] sm:$0xff] }
 0x961   : > { %v2660_v4 = vadd.f32 %v7220_v1, %v2659_v2 }
 0x962   : > { %v2732_v5 = vpack.c.bf16 %v2668_v47, %v2665_v0  ;;  %4795 = vmatpush3.bf16.msra.mxu0 %v2722_v17  ;;  %v5755_v17 = vld [vmem:[%s6750_s8 + $0x14] ss:$8 sps:$4 sm:$0xff]  }
 0x963   : > { %v2731_v6 = vpack.c.bf16 %v2660_v4, %v2657_v3  ;;  %v2694_v3 = vld [vmem:[#allocation2 + $0x38] sm:$0xff] }
 0x965   : > { %v5226_v7 = vpop.f32.mrb[44].mxu1  ;;  %4796 = vmatprep.subr.bf16.mxu0 %v2731_v6 }
 0x966   : > { %v2672_v8 = vpop.f32.mrb[45].mxu1  ;;  %4797 = vmatpush3.bf16.msra.mxu0 %v2723_v28  ;;  %v2681_v10 = vadd.f32 %v5226_v7, %v7220_v1  ;;  %v5773_v28 = vld [vmem:[%s6750_s8 + $0x74] ss:$8 sps:$4 sm:$0xff]  }
 0x967   : > { %v5227_v9 = vpop.f32.mrb[46].mxu1  ;;  %4798 = vmatprep.subr.bf16.mxu0 %v2732_v5  ;;  %v2673_v13 = vadd.f32 %v7220_v1, %v2672_v8 }
 0x968   : > { %v2684_v11 = vadd.f32 %v5227_v9, %v7220_v1  ;;  %v2675_v12 = vpop.f32.mrb[47].mxu1  ;;  %v2695_v9 = vld [vmem:[#allocation2 + $0x40] sm:$0xff] }
 0x969   : > { %v2676_v14 = vadd.f32 %v7220_v1, %v2675_v12  ;;  %v5758_v1 = vld [vmem:[%s6750_s8 + $0x24] ss:$8 sps:$4 sm:$0xff]  }
 0x96a   : > { %v2734_v59 = vpack.c.bf16 %v2684_v11, %v2681_v10  ;;  %4799 = vmatpush3.bf16.msra.mxu0 %v2724_v27  ;;  %v5772_v27 = vld [vmem:[%s6750_s8 + $0x60] ss:$8 sps:$4 sm:$0xff]  }
 0x96b   : > { %v2733_v15 = vpack.c.bf16 %v2676_v14, %v2673_v13  ;;  %v2696_v13 = vld [vmem:[#allocation2 + $0x48] sm:$0xff] }
 0x96d   : > { %4800 = vmatprep.subr.bf16.mxu0 %v2733_v15 }
 0x96e   : > { %4801 = vmatpush3.bf16.msra.mxu0 %v2725_v42 }
 0x96f   : > { %4802 = vmatprep.subr.bf16.mxu0 %v2734_v59 }
 0x972   : > { %4803 = vmatpush3.bf16.msra.mxu0 %v2726_v41 }
 0x975   : > { %2848 = vmatmul.mubr.bf16.vlgmr.msra.gmra.mrb[16].mxu0 %v5752_v16 }
 0x976   : > { %2855 = vmatprep.mubr.bf16.mxu0 %v5755_v17 }
 0x97d   : > { %2856 = vmatmul.mubr.bf16.gmra.mrb[20].mxu0 %v5757_v18  ;;  %v2697_v18 = vld [vmem:[#allocation2 + $0x50] sm:$0xff] }
 0x97e   : > { %2863 = vmatprep.mubr.bf16.mxu0 %v5758_v1 }
 0x985   : > { %2864 = vmatmul.mubr.bf16.gmra.mrb[24].mxu0 %v5760_v19 }
 0x986   : > { %2871 = vmatprep.mubr.bf16.mxu0 %v5761_v20 }
 0x98d   : > { %2872 = vmatmul.mubr.bf16.gmra.mrb[28].mxu0 %v5763_v21  ;;  %v2698_v21 = vld [vmem:[#allocation2 + $0x58] sm:$0xff] }
 0x98e   : > { %2879 = vmatprep.mubr.bf16.mxu0 %v5764_v22 }
 0x995   : > { %2880 = vmatmul.mubr.bf16.gmra.mrb[32].mxu0 %v5766_v23 }
 0x996   : > { %2887 = vmatprep.mubr.bf16.mxu0 %v5767_v24 }
 0x99d   : > { %2888 = vmatmul.mubr.bf16.gmra.mrb[36].mxu0 %v5769_v25 }
 0x99e   : > { %2895 = vmatprep.mubr.bf16.mxu0 %v5770_v26 }
 0x9a5   : > { %2896 = vmatmul.mubr.bf16.gmra.mrb[40].mxu0 %v5772_v27  ;;  %v2699_v27 = vld [vmem:[#allocation2 + $0x60] sm:$0xff] }
 0x9a6   : > { %2903 = vmatprep.mubr.bf16.mxu0 %v5773_v28 }
 0x9ad   : > { %2904 = vmatmul.mubr.bf16.gmra.mrb[44].mxu0 %v5775_v29 }
 0xa48   : > { %v4804_v30 = vpop.f32.mrb[16].mxu0 }
 0xa49   : > { %v4805_v32 = vpop.f32.mrb[17].mxu0 }
 0xa4a   : > { %v4806_v33 = vadd.f32 %v4805_v32, %v4804_v30  ;;  %v4807_v38 = vpop.f32.mrb[18].mxu0 }
 0xa4b   : > { %v4808_v40 = vpop.f32.mrb[19].mxu0 }
 0xa4c   : > { %v2912_v41 = vadd.f32 %v4806_v33, %v2687_v31  ;;  %v4809_v42 = vadd.f32 %v4808_v40, %v4807_v38  ;;  %v2700_v31 = vld [vmem:[#allocation2 + $0x68] sm:$0xff] }
 0xa4e   : > { %2928 = vst [vmem:[#allocation2] sm:$0xff] %v2912_v41  ;;  %v2913_v43 = vadd.f32 %v4809_v42, %v2688_v39  ;;  %v2701_v41 = vld [vmem:[#allocation2 + $0x70] sm:$0xff] }
 0xa50   : > { %2929 = vst [vmem:[#allocation2 + $0x8] sm:$0xff] %v2913_v43  ;;  %v4810_v44 = vpop.f32.mrb[20].mxu0 }
 0xa51   : > { %v4811_v36 = vpop.f32.mrb[21].mxu0 }
 0xa52   : > { %v4812_v34 = vadd.f32 %v4811_v36, %v4810_v44  ;;  %v4813_v46 = vpop.f32.mrb[22].mxu0 }
 0xa53   : > { %v4814_v35 = vpop.f32.mrb[23].mxu0 }
 0xa54   : > { %v2914_v48 = vadd.f32 %v4812_v34, %v2689_v45  ;;  %v4815_v49 = vadd.f32 %v4814_v35, %v4813_v46  ;;  %v2702_v45 = vld [vmem:[#allocation2 + $0x78] sm:$0xff] }
 0xa56   : > { %2930 = vst [vmem:[#allocation2 + $0x10] sm:$0xff] %v2914_v48  ;;  %v2915_v50 = vadd.f32 %v4815_v49, %v2690_v37 }
 0xa58   : > { %2931 = vst [vmem:[#allocation2 + $0x18] sm:$0xff] %v2915_v50  ;;  %v4816_v51 = vpop.f32.mrb[24].mxu0 }
 0xa59   : > { %v4817_v53 = vpop.f32.mrb[25].mxu0 }
 0xa5a   : > { %v4818_v54 = vadd.f32 %v4817_v53, %v4816_v51  ;;  %v4819_v55 = vpop.f32.mrb[26].mxu0 }
 0xa5b   : > { %v4820_v57 = vpop.f32.mrb[27].mxu0 }
 0xa5c   : > { %v2916_v58 = vadd.f32 %v4818_v54, %v2691_v52  ;;  %v4821_v60 = vadd.f32 %v4820_v57, %v4819_v55 }
 0xa5e   : > { %2932 = vst [vmem:[#allocation2 + $0x20] sm:$0xff] %v2916_v58  ;;  %v2917_v61 = vadd.f32 %v4821_v60, %v2692_v56 }
 0xa60   : > { %2933 = vst [vmem:[#allocation2 + $0x28] sm:$0xff] %v2917_v61  ;;  %v4822_v62 = vpop.f32.mrb[28].mxu0 }
 0xa61   : > { %v4823_v0 = vpop.f32.mrb[29].mxu0 }
 0xa62   : > { %v4824_v47 = vadd.f32 %v4823_v0, %v4822_v62  ;;  %v4825_v2 = vpop.f32.mrb[30].mxu0 }
 0xa63   : > { %v4826_v4 = vpop.f32.mrb[31].mxu0 }
 0xa64   : > { %v2918_v5 = vadd.f32 %v4824_v47, %v2693_v63  ;;  %v4827_v6 = vadd.f32 %v4826_v4, %v4825_v2 }
 0xa66   : > { %2934 = vst [vmem:[#allocation2 + $0x30] sm:$0xff] %v2918_v5  ;;  %v2919_v7 = vadd.f32 %v4827_v6, %v2694_v3 }
 0xa68   : > { %2935 = vst [vmem:[#allocation2 + $0x38] sm:$0xff] %v2919_v7  ;;  %v4828_v8 = vpop.f32.mrb[32].mxu0 }
 0xa69   : > { %v4829_v10 = vpop.f32.mrb[33].mxu0 }
 0xa6a   : > { %v4830_v11 = vadd.f32 %v4829_v10, %v4828_v8  ;;  %v4831_v12 = vpop.f32.mrb[34].mxu0 }
 0xa6b   : > { %v4832_v14 = vpop.f32.mrb[35].mxu0 }
 0xa6c   : > { %v2920_v59 = vadd.f32 %v4830_v11, %v2695_v9  ;;  %v4833_v15 = vadd.f32 %v4832_v14, %v4831_v12 }
 0xa6e   : > { %2936 = vst [vmem:[#allocation2 + $0x40] sm:$0xff] %v2920_v59  ;;  %v2921_v16 = vadd.f32 %v4833_v15, %v2696_v13 }
 0xa70   : > { %2937 = vst [vmem:[#allocation2 + $0x48] sm:$0xff] %v2921_v16  ;;  %v4834_v17 = vpop.f32.mrb[36].mxu0 }
 0xa71   : > { %v4835_v1 = vpop.f32.mrb[37].mxu0 }
 0xa72   : > { %v4836_v19 = vadd.f32 %v4835_v1, %v4834_v17  ;;  %v4837_v20 = vpop.f32.mrb[38].mxu0 }
 0xa73   : > { %v4838_v22 = vpop.f32.mrb[39].mxu0 }
 0xa74   : > { %v2922_v23 = vadd.f32 %v4836_v19, %v2697_v18  ;;  %v4839_v24 = vadd.f32 %v4838_v22, %v4837_v20 }
 0xa76   : > { %2938 = vst [vmem:[#allocation2 + $0x50] sm:$0xff] %v2922_v23  ;;  %v2923_v25 = vadd.f32 %v4839_v24, %v2698_v21 }
 0xa78   : > { %2939 = vst [vmem:[#allocation2 + $0x58] sm:$0xff] %v2923_v25  ;;  %v4840_v26 = vpop.f32.mrb[40].mxu0 }
 0xa79   : > { %v4841_v28 = vpop.f32.mrb[41].mxu0 }
 0xa7a   : > { %v4842_v29 = vadd.f32 %v4841_v28, %v4840_v26  ;;  %v4843_v30 = vpop.f32.mrb[42].mxu0 }
 0xa7b   : > { %v4844_v32 = vpop.f32.mrb[43].mxu0 }
 0xa7c   : > { %v2924_v33 = vadd.f32 %v4842_v29, %v2699_v27  ;;  %v4845_v38 = vadd.f32 %v4844_v32, %v4843_v30 }
 0xa7e   : > { %2940 = vst [vmem:[#allocation2 + $0x60] sm:$0xff] %v2924_v33  ;;  %v2925_v39 = vadd.f32 %v4845_v38, %v2700_v31 }
 0xa80   : > { %2941 = vst [vmem:[#allocation2 + $0x68] sm:$0xff] %v2925_v39  ;;  %v4846_v40 = vpop.f32.mrb[44].mxu0 }
 0xa81   : > { %v4847_v42 = vpop.f32.mrb[45].mxu0 }
 0xa82   : > { %v4848_v43 = vadd.f32 %v4847_v42, %v4846_v40  ;;  %v4849_v44 = vpop.f32.mrb[46].mxu0 }
 0xa83   : > { %v4850_v36 = vpop.f32.mrb[47].mxu0 }
 0xa84   : > { %v2926_v34 = vadd.f32 %v4848_v43, %v2701_v41  ;;  %v4851_v46 = vadd.f32 %v4850_v36, %v4849_v44 }
 0xa86   : > { %2942 = vst [vmem:[#allocation2 + $0x70] sm:$0xff] %v2926_v34  ;;  %v2927_v37 = vadd.f32 %v4851_v46, %v2702_v45 }
 0xa88   : > { %2943 = vst [vmem:[#allocation2 + $0x78] sm:$0xff] %v2927_v37 }
 0xa89 PF: > { %s7754_s27 = sld [smem:[#allocation32_spill]] }
 0xa8f   : > { %p4471_p2 = scmp.ne.s32.totalorder %s7754_s27, 3 }
 0xa90   : > { %v2980_v35 = vld [vmem:[#allocation2] sm:$0xff] (!%p4471_p2)  ;;  %v2981_v48 = vld [vmem:[#allocation2 + $0x8] sm:$0xff] (!%p4471_p2)  ;;  %v2982_v49 = vld [vmem:[#allocation2 + $0x10] sm:$0xff] (!%p4471_p2)  ;;  %s7755_s2 = sld [smem:[#allocation31_spill]] (!%p4471_p2) }
 0xa91   : > { %2947 = sbr.rel (%p4471_p2) target bundleno = 3571 (0xdf3), region = 120  ;;  %v2996_v50 = vpack.c.bf16 (!%p4471_p2), %v2981_v48, %v2980_v35  ;;  %v2983_v51 = vld [vmem:[#allocation2 + $0x18] sm:$0xff] (!%p4471_p2)  ;;  %v2984_v53 = vld [vmem:[#allocation2 + $0x20] sm:$0xff] (!%p4471_p2)  ;;  %v2985_v54 = vld [vmem:[#allocation2 + $0x28] sm:$0xff] (!%p4471_p2) }
 0xa92   : > { %v2997_v52 = vpack.c.bf16 (!%p4471_p2), %v2983_v51, %v2982_v49  ;;  %v2986_v55 = vld [vmem:[#allocation2 + $0x30] sm:$0xff] (!%p4471_p2)  ;;  %v2998_v56 = vpack.c.bf16 (!%p4471_p2), %v2985_v54, %v2984_v53  ;;  %v2987_v57 = vld [vmem:[#allocation2 + $0x38] sm:$0xff] (!%p4471_p2)  ;;  %v5776_v58 = vld [vmem:[%s6757_s24] sm:$0xff] (!%p4471_p2)  }
 0xa93   : > { %5228 = vmatprep.subr.bf16.mxu0 (!%p4471_p2), %v2996_v50  ;;  %5404 = vmatprep.subr.bf16.mxu1 (!%p4471_p2), %v2996_v50  ;;  %v5777_v60 = vld [vmem:[%s6757_s24 + $0x40] sm:$0xff] (!%p4471_p2)   ;;  %v2999_v61 = vpack.c.bf16 (!%p4471_p2), %v2987_v57, %v2986_v55  ;;  %v2989_v63 = vld [vmem:[#allocation2 + $0x48] sm:$0xff] (!%p4471_p2)  ;;  %v2990_v47 = vld [vmem:[#allocation2 + $0x50] sm:$0xff] (!%p4471_p2) }
 0xa94   : > { %5229 = vmatpush3.bf16.msra.mxu0 (!%p4471_p2), %v2996_v50  ;;  %5412 = vmatpush3.bf16.msra.mxu1 (!%p4471_p2), %v2996_v50  ;;  %v2988_v62 = vld [vmem:[#allocation2 + $0x40] sm:$0xff] (!%p4471_p2)  ;;  %v2991_v2 = vld [vmem:[#allocation2 + $0x58] sm:$0xff] (!%p4471_p2)  ;;  %v2993_v5 = vld [vmem:[#allocation2 + $0x68] sm:$0xff] (!%p4471_p2) }
 0xa95   : > { %5230 = vmatprep.subr.bf16.mxu0 (!%p4471_p2), %v2997_v52  ;;  %5405 = vmatprep.subr.bf16.mxu1 (!%p4471_p2), %v2997_v52  ;;  %v3000_v0 = vpack.c.bf16 (!%p4471_p2), %v2989_v63, %v2988_v62  ;;  %v3001_v3 = vpack.c.bf16 (!%p4471_p2), %v2991_v2, %v2990_v47  ;;  %v2992_v4 = vld [vmem:[#allocation2 + $0x60] sm:$0xff] (!%p4471_p2)  ;;  %v2994_v7 = vld [vmem:[#allocation2 + $0x70] sm:$0xff] (!%p4471_p2)  ;;  %v2995_v8 = vld [vmem:[#allocation2 + $0x78] sm:$0xff] (!%p4471_p2) }
 0xa96   : > { %5244 = vmatprep.mubr.bf16.mxu0 (!%p4471_p2), %v5776_v58  ;;  %5260 = vmatprep.mubr.bf16.mxu1 (!%p4471_p2), %v5777_v60  ;;  %v3002_v6 = vpack.c.bf16 (!%p4471_p2), %v2993_v5, %v2992_v4  ;;  %v3003_v9 = vpack.c.bf16 (!%p4471_p2), %v2995_v8, %v2994_v7  ;;  %v5778_v10 = vld [vmem:[%s6757_s24 + $0x8] sm:$0xff] (!%p4471_p2)   ;;  %v5780_v12 = vld [vmem:[%s6757_s24 + $0x10] sm:$0xff] (!%p4471_p2)   ;;  %v5782_v14 = vld [vmem:[%s6757_s24 + $0x18] sm:$0xff] (!%p4471_p2)   ;;  %p4488_p6 = scmp.ne.s32.totalorder (!%p4471_p2), %s7755_s2, 0 }
 0xa97   : > { %v5779_v11 = vld [vmem:[%s6757_s24 + $0x48] sm:$0xff] (!%p4471_p2)   ;;  %v5781_v13 = vld [vmem:[%s6757_s24 + $0x50] sm:$0xff] (!%p4471_p2)   ;;  %v5783_v59 = vld [vmem:[%s6757_s24 + $0x58] sm:$0xff] (!%p4471_p2)  }
 0xa98   : > { %5231 = vmatpush3.bf16.msra.mxu0 %v2997_v52  ;;  %5413 = vmatpush3.bf16.msra.mxu1 %v2997_v52  ;;  %v5784_v15 = vld [vmem:[%s6757_s24 + $0x20] sm:$0xff]   ;;  %v5786_v17 = vld [vmem:[%s6757_s24 + $0x28] sm:$0xff]   ;;  %v5788_v1 = vld [vmem:[%s6757_s24 + $0x30] sm:$0xff]   ;;  %v6245_v8 = vmov (!%p4488_p6), 0.0  }
 0xa99   : > { %5232 = vmatprep.subr.bf16.mxu0 %v2998_v56  ;;  %5406 = vmatprep.subr.bf16.mxu1 %v2998_v56  ;;  %v5785_v16 = vld [vmem:[%s6757_s24 + $0x60] sm:$0xff]   ;;  %v5787_v18 = vld [vmem:[%s6757_s24 + $0x68] sm:$0xff]   ;;  %v5789_v19 = vld [vmem:[%s6757_s24 + $0x70] sm:$0xff]   ;;  %3281 = vst [vmem:[#allocation3] sm:$0xff] (!%p4488_p6), %v6245_v8 }
 0xa9a   : > { %v5790_v20 = vld [vmem:[%s6757_s24 + $0x38] sm:$0xff]   ;;  %3282 = vst [vmem:[#allocation3 + $0x8] sm:$0xff] (!%p4488_p6), %v6245_v8  ;;  %3283 = vst [vmem:[#allocation3 + $0x10] sm:$0xff] (!%p4488_p6), %v6245_v8 }
 0xa9b   : > { %v5791_v21 = vld [vmem:[%s6757_s24 + $0x78] sm:$0xff]   ;;  %3284 = vst [vmem:[#allocation3 + $0x18] sm:$0xff] (!%p4488_p6), %v6245_v8  ;;  %3285 = vst [vmem:[#allocation3 + $0x20] sm:$0xff] (!%p4488_p6), %v6245_v8 }
 0xa9c   : > { %5233 = vmatpush3.bf16.msra.mxu0 %v2998_v56  ;;  %5414 = vmatpush3.bf16.msra.mxu1 %v2998_v56  ;;  %3286 = vst [vmem:[#allocation3 + $0x28] sm:$0xff] (!%p4488_p6), %v6245_v8  ;;  %3287 = vst [vmem:[#allocation3 + $0x30] sm:$0xff] (!%p4488_p6), %v6245_v8 }
 0xa9d   : > { %5234 = vmatprep.subr.bf16.mxu0 %v2999_v61  ;;  %5407 = vmatprep.subr.bf16.mxu1 %v2999_v61  ;;  %3288 = vst [vmem:[#allocation3 + $0x38] sm:$0xff] (!%p4488_p6), %v6245_v8  ;;  %3289 = vst [vmem:[#allocation3 + $0x40] sm:$0xff] (!%p4488_p6), %v6245_v8 }
 0xa9e   : > { %3290 = vst [vmem:[#allocation3 + $0x48] sm:$0xff] (!%p4488_p6), %v6245_v8  ;;  %3291 = vst [vmem:[#allocation3 + $0x50] sm:$0xff] (!%p4488_p6), %v6245_v8 }
 0xa9f   : > { %3292 = vst [vmem:[#allocation3 + $0x58] sm:$0xff] (!%p4488_p6), %v6245_v8  ;;  %3293 = vst [vmem:[#allocation3 + $0x60] sm:$0xff] (!%p4488_p6), %v6245_v8 }
 0xaa0   : > { %5235 = vmatpush3.bf16.msra.mxu0 %v2999_v61  ;;  %5415 = vmatpush3.bf16.msra.mxu1 %v2999_v61  ;;  %3294 = vst [vmem:[#allocation3 + $0x68] sm:$0xff] (!%p4488_p6), %v6245_v8  ;;  %3295 = vst [vmem:[#allocation3 + $0x70] sm:$0xff] (!%p4488_p6), %v6245_v8 }
 0xaa1   : > { %5236 = vmatprep.subr.bf16.mxu0 %v3000_v0  ;;  %5408 = vmatprep.subr.bf16.mxu1 %v3000_v0  ;;  %3296 = vst [vmem:[#allocation3 + $0x78] sm:$0xff] (!%p4488_p6), %v6245_v8 }
 0xaa4   : > { %5237 = vmatpush3.bf16.msra.mxu0 %v3000_v0  ;;  %5416 = vmatpush3.bf16.msra.mxu1 %v3000_v0 }
 0xaa5   : > { %5238 = vmatprep.subr.bf16.mxu0 %v3001_v3  ;;  %5409 = vmatprep.subr.bf16.mxu1 %v3001_v3 }
 0xaa8   : > { %5239 = vmatpush3.bf16.msra.mxu0 %v3001_v3  ;;  %5417 = vmatpush3.bf16.msra.mxu1 %v3001_v3 }
 0xaa9   : > { %5240 = vmatprep.subr.bf16.mxu0 %v3002_v6  ;;  %5410 = vmatprep.subr.bf16.mxu1 %v3002_v6 }
 0xaac   : > { %5241 = vmatpush3.bf16.msra.mxu0 %v3002_v6  ;;  %5418 = vmatpush3.bf16.msra.mxu1 %v3002_v6 }
 0xaad   : > { %5242 = vmatprep.subr.bf16.mxu0 %v3003_v9  ;;  %5411 = vmatprep.subr.bf16.mxu1 %v3003_v9 }
 0xab0   : > { %5243 = vmatpush3.bf16.msra.mxu0 %v3003_v9  ;;  %5419 = vmatpush3.bf16.msra.mxu1 %v3003_v9 }
 0xab3   : > { %5245 = vmatmul.mubr.bf16.vlgmr.msra.gmra.mrb[0].mxu0 %v5778_v10  ;;  %5261 = vmatmul.mubr.bf16.vlgmr.msra.gmra.mrb[0].mxu1 %v5779_v11 }
 0xab4   : > { %5248 = vmatprep.mubr.bf16.mxu0 %v5780_v12  ;;  %5264 = vmatprep.mubr.bf16.mxu1 %v5781_v13 }
 0xabb   : > { %5249 = vmatmul.mubr.bf16.gmra.mrb[4].mxu0 %v5782_v14  ;;  %5265 = vmatmul.mubr.bf16.gmra.mrb[4].mxu1 %v5783_v59 }
 0xabc   : > { %5252 = vmatprep.mubr.bf16.mxu0 %v5784_v15  ;;  %5268 = vmatprep.mubr.bf16.mxu1 %v5785_v16 }
 0xac3   : > { %5253 = vmatmul.mubr.bf16.gmra.mrb[8].mxu0 %v5786_v17  ;;  %5269 = vmatmul.mubr.bf16.gmra.mrb[8].mxu1 %v5787_v18 }
 0xac4   : > { %5256 = vmatprep.mubr.bf16.mxu0 %v5788_v1  ;;  %5272 = vmatprep.mubr.bf16.mxu1 %v5789_v19 }
 0xacb   : > { %5257 = vmatmul.mubr.bf16.gmra.mrb[12].mxu0 %v5790_v20  ;;  %5273 = vmatmul.mubr.bf16.gmra.mrb[12].mxu1 %v5791_v21 }
 0xb86   : > { %v7298_v22 = vpop.f32.mrb[0].mxu0  ;;  %v7300_v23 = vpop.f32.mrb[0].mxu1 }
 0xb87   : > { %v7302_v24 = vpop.f32.mrb[1].mxu0  ;;  %v7304_v25 = vpop.f32.mrb[1].mxu1 }
 0xb88   : > { %v7306_v26 = vpop.f32.mrb[2].mxu0  ;;  %v7308_v27 = vpop.f32.mrb[2].mxu1 }
 0xb89   : > { %v3262_v28 = vpack.c.bf16 %v7306_v26, %v7298_v22  ;;  %v3270_v29 = vpack.c.bf16 %v7308_v27, %v7300_v23  ;;  %v3137_v30 = vpop.f32.mrb[3].mxu0  ;;  %v7314_v31 = vpop.f32.mrb[3].mxu1 }
 0xb8a   : > { %v3261_v32 = vpack.c.bf16 %v3137_v30, %v7302_v24  ;;  %v3269_v33 = vpack.c.bf16 %v7314_v31, %v7304_v25 }
 0xb8e   : > { %v7319_v38 = vpop.f32.mrb[4].mxu0  ;;  %v7321_v39 = vpop.f32.mrb[4].mxu1 }
 0xb8f   : > { %v7323_v40 = vpop.f32.mrb[5].mxu0  ;;  %v7325_v41 = vpop.f32.mrb[5].mxu1 }
 0xb90   : > { %v7327_v42 = vpop.f32.mrb[6].mxu0  ;;  %v7329_v43 = vpop.f32.mrb[6].mxu1 }
 0xb91   : > { %v3264_v44 = vpack.c.bf16 %v7327_v42, %v7319_v38  ;;  %v3272_v45 = vpack.c.bf16 %v7329_v43, %v7321_v39  ;;  %v7335_v36 = vpop.f32.mrb[7].mxu0  ;;  %v7337_v34 = vpop.f32.mrb[7].mxu1 }
 0xb92   : > { %v3263_v46 = vpack.c.bf16 %v7335_v36, %v7323_v40  ;;  %v3271_v37 = vpack.c.bf16 %v7337_v34, %v7325_v41 }
 0xb96   : > { %v7343_v35 = vpop.f32.mrb[8].mxu0  ;;  %v7345_v48 = vpop.f32.mrb[8].mxu1 }
 0xb97   : > { %v7347_v49 = vpop.f32.mrb[9].mxu0  ;;  %v7349_v50 = vpop.f32.mrb[9].mxu1 }
 0xb98   : > { %v7351_v51 = vpop.f32.mrb[10].mxu0  ;;  %v7353_v52 = vpop.f32.mrb[10].mxu1 }
 0xb99   : > { %v3266_v53 = vpack.c.bf16 %v7351_v51, %v7343_v35  ;;  %v3274_v54 = vpack.c.bf16 %v7353_v52, %v7345_v48  ;;  %v7359_v55 = vpop.f32.mrb[11].mxu0  ;;  %v7361_v56 = vpop.f32.mrb[11].mxu1 }
 0xb9a   : > { %v3265_v57 = vpack.c.bf16 %v7359_v55, %v7347_v49  ;;  %v3273_v58 = vpack.c.bf16 %v7361_v56, %v7349_v50 }
 0xb9c   : > { %3280 = sbr.rel (%p4488_p6) target bundleno = 2979 (0xba3), region = 124 }
 0xb9e   : > { %v7367_v60 = vpop.f32.mrb[12].mxu0  ;;  %v7369_v61 = vpop.f32.mrb[12].mxu1 }
 0xb9f   : > { %v3182_v62 = vpop.f32.mrb[13].mxu0  ;;  %v7371_v63 = vpop.f32.mrb[13].mxu1 }
 0xba0   : > { %v5259_v0 = vpop.f32.mrb[14].mxu0  ;;  %v7373_v47 = vpop.f32.mrb[14].mxu1 }
 0xba1   : > { %v3268_v2 = vpack.c.bf16 %v5259_v0, %v7367_v60  ;;  %v3276_v3 = vpack.c.bf16 %v7373_v47, %v7369_v61  ;;  %v3185_v4 = vpop.f32.mrb[15].mxu0  ;;  %v3249_v5 = vpop.f32.mrb[15].mxu1 }
 0xba2   : > { %v3267_v6 = vpack.c.bf16 %v3185_v4, %v3182_v62  ;;  %v3275_v7 = vpack.c.bf16 %v3249_v5, %v7371_v63 }
 0xba3 PF: > { %v5792_v9 = vld [vmem:[#allocation15] sm:$0xff]   ;;  %5292 = vmatprep.mubr.bf16.mxu1 %v3261_v32  ;;  %v5793_v10 = vld [vmem:[#allocation15 + $0x8] sm:$0xff]   ;;  %v5794_v11 = vld [vmem:[#allocation15 + $0x10] sm:$0xff]   ;;  %s7756_s16 = sld [smem:[#allocation48_spill]] }
 0xba4   : > { %5276 = vmatprep.subr.bf16.mxu1 %v5792_v9  ;;  %v5795_v12 = vld [vmem:[#allocation15 + $0x18] sm:$0xff]   ;;  %v5796_v13 = vld [vmem:[#allocation15 + $0x20] sm:$0xff]   ;;  %v5797_v14 = vld [vmem:[#allocation15 + $0x28] sm:$0xff]  }
 0xba5   : > { %5277 = vmatpush3.bf16.msra.mxu1 %v5792_v9  ;;  %v5798_v59 = vld [vmem:[#allocation15 + $0x30] sm:$0xff]   ;;  %v5799_v15 = vld [vmem:[#allocation15 + $0x38] sm:$0xff]   ;;  %v5802_v16 = vld [vmem:[%s6750_s8 + $0x4] ss:$8 sps:$4 sm:$0xff]  }
 0xba6   : > { %5278 = vmatprep.subr.bf16.mxu1 %v5793_v10  ;;  %3689 = vmatprep.mubr.bf16.mxu0 %v5802_v16 }
 0xba9   : > { %5279 = vmatpush3.bf16.msra.mxu1 %v5793_v10  ;;  %v7417_v18 = vld [vmem:[%s7756_s16] ss:$0 sm:$0xff] }
 0xbaa   : > { %5280 = vmatprep.subr.bf16.mxu1 %v5794_v11 }
 0xbad   : > { %5281 = vmatpush3.bf16.msra.mxu1 %v5794_v11 }
 0xbae   : > { %5282 = vmatprep.subr.bf16.mxu1 %v5795_v12 }
 0xbb1   : > { %5283 = vmatpush3.bf16.msra.mxu1 %v5795_v12 }
 0xbb2   : > { %5284 = vmatprep.subr.bf16.mxu1 %v5796_v13 }
 0xbb5   : > { %5285 = vmatpush3.bf16.msra.mxu1 %v5796_v13 }
 0xbb6   : > { %5286 = vmatprep.subr.bf16.mxu1 %v5797_v14 }
 0xbb9   : > { %5287 = vmatpush3.bf16.msra.mxu1 %v5797_v14 }
 0xbba   : > { %5288 = vmatprep.subr.bf16.mxu1 %v5798_v59 }
 0xbbd   : > { %5289 = vmatpush3.bf16.msra.mxu1 %v5798_v59 }
 0xbbe   : > { %5290 = vmatprep.subr.bf16.mxu1 %v5799_v15 }
 0xbc1   : > { %5291 = vmatpush3.bf16.msra.mxu1 %v5799_v15 }
 0xbc4   : > { %5293 = vmatmul.mubr.bf16.vlgmr.msra.gmra.mrb[16].mxu1 %v3262_v28 }
 0xbc5   : > { %5296 = vmatprep.mubr.bf16.mxu1 %v3263_v46 }
 0xbcc   : > { %5297 = vmatmul.mubr.bf16.gmra.mrb[20].mxu1 %v3264_v44 }
 0xbcd   : > { %5300 = vmatprep.mubr.bf16.mxu1 %v3265_v57 }
 0xbd4   : > { %5301 = vmatmul.mubr.bf16.gmra.mrb[24].mxu1 %v3266_v53 }
 0xbd5   : > { %5304 = vmatprep.mubr.bf16.mxu1 %v3267_v6 }
 0xbdc   : > { %5305 = vmatmul.mubr.bf16.gmra.mrb[28].mxu1 %v3268_v2 }
 0xbdd   : > { %5308 = vmatprep.mubr.bf16.mxu1 %v3269_v33 }
 0xbe4   : > { %5309 = vmatmul.mubr.bf16.gmra.mrb[32].mxu1 %v3270_v29 }
 0xbe5   : > { %5312 = vmatprep.mubr.bf16.mxu1 %v3271_v37 }
 0xbec   : > { %5313 = vmatmul.mubr.bf16.gmra.mrb[36].mxu1 %v3272_v45 }
 0xbed   : > { %5316 = vmatprep.mubr.bf16.mxu1 %v3273_v58 }
 0xbf4   : > { %5317 = vmatmul.mubr.bf16.gmra.mrb[40].mxu1 %v3274_v54 }
 0xbf5   : > { %5320 = vmatprep.mubr.bf16.mxu1 %v3275_v7 }
 0xbfc   : > { %5321 = vmatmul.mubr.bf16.gmra.mrb[44].mxu1 %v3276_v3 }
 0xc97   : > { %v5294_v17 = vpop.f32.mrb[16].mxu1 }
 0xc98   : > { %v3402_v1 = vpop.f32.mrb[17].mxu1  ;;  %v3411_v20 = vadd.f32 %v5294_v17, %v7417_v18 }
 0xc99   : > { %v5295_v19 = vpop.f32.mrb[18].mxu1  ;;  %v3403_v23 = vadd.f32 %v7417_v18, %v3402_v1 }
 0xc9a   : > { %v3414_v21 = vadd.f32 %v5295_v19, %v7417_v18  ;;  %v3405_v22 = vpop.f32.mrb[19].mxu1 }
 0xc9b   : > { %v3406_v24 = vadd.f32 %v7417_v18, %v3405_v22 }
 0xc9c   : > { %v3562_v25 = vpack.c.bf16 %v3414_v21, %v3411_v20 }
 0xc9d   : > { %v3561_v26 = vpack.c.bf16 %v3406_v24, %v3403_v23 }
 0xc9f   : > { %v5298_v27 = vpop.f32.mrb[20].mxu1 }
 0xca0   : > { %v3418_v28 = vpop.f32.mrb[21].mxu1  ;;  %v7424_v30 = vadd.f32 %v5298_v27, %v7417_v18 }
 0xca1   : > { %v5299_v29 = vpop.f32.mrb[22].mxu1  ;;  %v3419_v33 = vadd.f32 %v7417_v18, %v3418_v28 }
 0xca2   : > { %v3430_v31 = vadd.f32 %v5299_v29, %v7417_v18  ;;  %v3421_v32 = vpop.f32.mrb[23].mxu1 }
 0xca3   : > { %v3422_v38 = vadd.f32 %v7417_v18, %v3421_v32 }
 0xca4   : > { %v3564_v39 = vpack.c.bf16 %v3430_v31, %v7424_v30 }
 0xca5   : > { %v3563_v40 = vpack.c.bf16 %v3422_v38, %v3419_v33  ;;  %v5800_v38 = vld [vmem:[%s6750_s8] ss:$8 sps:$4 sm:$0xff]  }
 0xca7   : > { %v5302_v41 = vpop.f32.mrb[24].mxu1 }
 0xca8   : > { %v3434_v42 = vpop.f32.mrb[25].mxu1  ;;  %v7431_v44 = vadd.f32 %v5302_v41, %v7417_v18  ;;  %v5808_v41 = vld [vmem:[%s6750_s8 + $0x20] ss:$8 sps:$4 sm:$0xff]  }
 0xca9   : > { %v5303_v43 = vpop.f32.mrb[26].mxu1  ;;  %v3435_v34 = vadd.f32 %v7417_v18, %v3434_v42  ;;  %v5809_v42 = vld [vmem:[%s6750_s8 + $0x34] ss:$8 sps:$4 sm:$0xff]  }
 0xcaa   : > { %v7434_v45 = vadd.f32 %v5303_v43, %v7417_v18  ;;  %v3437_v36 = vpop.f32.mrb[27].mxu1  ;;  %v5811_v43 = vld [vmem:[%s6750_s8 + $0x30] ss:$8 sps:$4 sm:$0xff]  }
 0xcab   : > { %v3438_v46 = vadd.f32 %v7417_v18, %v3437_v36  ;;  %v5815_v36 = vld [vmem:[%s6750_s8 + $0x54] ss:$8 sps:$4 sm:$0xff]  }
 0xcac   : > { %v3566_v37 = vpack.c.bf16 %v7434_v45, %v7431_v44  ;;  %v5812_v44 = vld [vmem:[%s6750_s8 + $0x44] ss:$8 sps:$4 sm:$0xff]   ;;  %v5814_v45 = vld [vmem:[%s6750_s8 + $0x40] ss:$8 sps:$4 sm:$0xff]  }
 0xcad   : > { %v3565_v35 = vpack.c.bf16 %v3438_v46, %v3435_v34  ;;  %v5817_v34 = vld [vmem:[%s6750_s8 + $0x50] ss:$8 sps:$4 sm:$0xff]   ;;  %v5818_v46 = vld [vmem:[%s6750_s8 + $0x64] ss:$8 sps:$4 sm:$0xff]  }
 0xcaf   : > { %v5306_v48 = vpop.f32.mrb[28].mxu1 }
 0xcb0   : > { %v3450_v49 = vpop.f32.mrb[29].mxu1  ;;  %v7441_v51 = vadd.f32 %v5306_v48, %v7417_v18  ;;  %v5823_v48 = vld [vmem:[%s6750_s8 + $0x70] ss:$8 sps:$4 sm:$0xff]  }
 0xcb1   : > { %v5307_v50 = vpop.f32.mrb[30].mxu1  ;;  %v3451_v54 = vadd.f32 %v7417_v18, %v3450_v49 }
 0xcb2   : > { %v3462_v52 = vadd.f32 %v5307_v50, %v7417_v18  ;;  %v3453_v53 = vpop.f32.mrb[31].mxu1  ;;  %v3529_v50 = vld [vmem:[#allocation3] sm:$0xff] }
 0xcb3   : > { %v3454_v55 = vadd.f32 %v7417_v18, %v3453_v53 }
 0xcb4   : > { %v3568_v56 = vpack.c.bf16 %v3462_v52, %v7441_v51 }
 0xcb5   : > { %v3567_v57 = vpack.c.bf16 %v3454_v55, %v3451_v54  ;;  %v3530_v54 = vld [vmem:[#allocation3 + $0x8] sm:$0xff] }
 0xcb7   : > { %v5310_v58 = vpop.f32.mrb[32].mxu1 }
 0xcb8   : > { %v3466_v60 = vpop.f32.mrb[33].mxu1  ;;  %v3475_v62 = vadd.f32 %v5310_v58, %v7417_v18 }
 0xcb9   : > { %v5311_v61 = vpop.f32.mrb[34].mxu1  ;;  %v3467_v47 = vadd.f32 %v7417_v18, %v3466_v60 }
 0xcba   : > { %v3478_v63 = vadd.f32 %v5311_v61, %v7417_v18  ;;  %v3469_v0 = vpop.f32.mrb[35].mxu1  ;;  %v3531_v61 = vld [vmem:[#allocation3 + $0x10] sm:$0xff] }
 0xcbb   : > { %v3470_v2 = vadd.f32 %v7417_v18, %v3469_v0 }
 0xcbc   : > { %v3570_v3 = vpack.c.bf16 %v3478_v63, %v3475_v62 }
 0xcbd   : > { %v3569_v4 = vpack.c.bf16 %v3470_v2, %v3467_v47  ;;  %v3532_v47 = vld [vmem:[#allocation3 + $0x18] sm:$0xff] }
 0xcbf   : > { %v5314_v5 = vpop.f32.mrb[36].mxu1  ;;  %4900 = vmatprep.subr.bf16.mxu0 %v3569_v4 }
 0xcc0   : > { %v3482_v6 = vpop.f32.mrb[37].mxu1  ;;  %4901 = vmatpush3.bf16.msra.mxu0 %v3561_v26  ;;  %v3491_v8 = vadd.f32 %v5314_v5, %v7417_v18 }
 0xcc1   : > { %v5315_v7 = vpop.f32.mrb[38].mxu1  ;;  %4902 = vmatprep.subr.bf16.mxu0 %v3570_v3  ;;  %v3483_v11 = vadd.f32 %v7417_v18, %v3482_v6 }
 0xcc2   : > { %v3494_v9 = vadd.f32 %v5315_v7, %v7417_v18  ;;  %v3485_v10 = vpop.f32.mrb[39].mxu1  ;;  %v3533_v7 = vld [vmem:[#allocation3 + $0x20] sm:$0xff] }
 0xcc3   : > { %v3486_v12 = vadd.f32 %v7417_v18, %v3485_v10 }
 0xcc4   : > { %v3572_v13 = vpack.c.bf16 %v3494_v9, %v3491_v8  ;;  %4903 = vmatpush3.bf16.msra.mxu0 %v3562_v25 }
 0xcc5   : > { %v3571_v14 = vpack.c.bf16 %v3486_v12, %v3483_v11  ;;  %v3534_v11 = vld [vmem:[#allocation3 + $0x28] sm:$0xff] }
 0xcc7   : > { %v5318_v59 = vpop.f32.mrb[40].mxu1  ;;  %4904 = vmatprep.subr.bf16.mxu0 %v3571_v14 }
 0xcc8   : > { %v3498_v15 = vpop.f32.mrb[41].mxu1  ;;  %4905 = vmatpush3.bf16.msra.mxu0 %v3563_v40  ;;  %v3507_v17 = vadd.f32 %v5318_v59, %v7417_v18  ;;  %v5805_v40 = vld [vmem:[%s6750_s8 + $0x10] ss:$8 sps:$4 sm:$0xff]  }
 0xcc9   : > { %v5319_v16 = vpop.f32.mrb[42].mxu1  ;;  %4906 = vmatprep.subr.bf16.mxu0 %v3572_v13  ;;  %v3499_v20 = vadd.f32 %v7417_v18, %v3498_v15 }
 0xcca   : > { %v3510_v1 = vadd.f32 %v5319_v16, %v7417_v18  ;;  %v3501_v19 = vpop.f32.mrb[43].mxu1  ;;  %v3535_v16 = vld [vmem:[#allocation3 + $0x30] sm:$0xff] }
 0xccb   : > { %v3502_v21 = vadd.f32 %v7417_v18, %v3501_v19 }
 0xccc   : > { %v3574_v22 = vpack.c.bf16 %v3510_v1, %v3507_v17  ;;  %4907 = vmatpush3.bf16.msra.mxu0 %v3564_v39  ;;  %v5803_v39 = vld [vmem:[%s6750_s8 + $0x14] ss:$8 sps:$4 sm:$0xff]  }
 0xccd   : > { %v3573_v23 = vpack.c.bf16 %v3502_v21, %v3499_v20  ;;  %v3536_v20 = vld [vmem:[#allocation3 + $0x38] sm:$0xff] }
 0xccf   : > { %v5322_v24 = vpop.f32.mrb[44].mxu1  ;;  %4908 = vmatprep.subr.bf16.mxu0 %v3573_v23 }
 0xcd0   : > { %v3514_v25 = vpop.f32.mrb[45].mxu1  ;;  %4909 = vmatpush3.bf16.msra.mxu0 %v3565_v35  ;;  %v3523_v27 = vadd.f32 %v5322_v24, %v7417_v18  ;;  %v5821_v35 = vld [vmem:[%s6750_s8 + $0x74] ss:$8 sps:$4 sm:$0xff]  }
 0xcd1   : > { %v5323_v26 = vpop.f32.mrb[46].mxu1  ;;  %4910 = vmatprep.subr.bf16.mxu0 %v3574_v22  ;;  %v3515_v30 = vadd.f32 %v7417_v18, %v3514_v25 }
 0xcd2   : > { %v3526_v28 = vadd.f32 %v5323_v26, %v7417_v18  ;;  %v3517_v29 = vpop.f32.mrb[47].mxu1  ;;  %v3537_v26 = vld [vmem:[#allocation3 + $0x40] sm:$0xff] }
 0xcd3   : > { %v3518_v31 = vadd.f32 %v7417_v18, %v3517_v29  ;;  %v5806_v18 = vld [vmem:[%s6750_s8 + $0x24] ss:$8 sps:$4 sm:$0xff]  }
 0xcd4   : > { %v3576_v32 = vpack.c.bf16 %v3526_v28, %v3523_v27  ;;  %4911 = vmatpush3.bf16.msra.mxu0 %v3566_v37  ;;  %v5820_v37 = vld [vmem:[%s6750_s8 + $0x60] ss:$8 sps:$4 sm:$0xff]  }
 0xcd5   : > { %v3575_v33 = vpack.c.bf16 %v3518_v31, %v3515_v30  ;;  %v3538_v30 = vld [vmem:[#allocation3 + $0x48] sm:$0xff] }
 0xcd7   : > { %4912 = vmatprep.subr.bf16.mxu0 %v3575_v33 }
 0xcd8   : > { %4913 = vmatpush3.bf16.msra.mxu0 %v3567_v57 }
 0xcd9   : > { %4914 = vmatprep.subr.bf16.mxu0 %v3576_v32 }
 0xcdc   : > { %4915 = vmatpush3.bf16.msra.mxu0 %v3568_v56 }
 0xcdf   : > { %3690 = vmatmul.mubr.bf16.vlgmr.msra.gmra.mrb[16].mxu0 %v5800_v38 }
 0xce0   : > { %3697 = vmatprep.mubr.bf16.mxu0 %v5803_v39 }
 0xce7   : > { %3698 = vmatmul.mubr.bf16.gmra.mrb[20].mxu0 %v5805_v40  ;;  %v3539_v40 = vld [vmem:[#allocation3 + $0x50] sm:$0xff] }
 0xce8   : > { %3705 = vmatprep.mubr.bf16.mxu0 %v5806_v18 }
 0xcef   : > { %3706 = vmatmul.mubr.bf16.gmra.mrb[24].mxu0 %v5808_v41 }
 0xcf0   : > { %3713 = vmatprep.mubr.bf16.mxu0 %v5809_v42 }
 0xcf7   : > { %3714 = vmatmul.mubr.bf16.gmra.mrb[28].mxu0 %v5811_v43  ;;  %v3540_v43 = vld [vmem:[#allocation3 + $0x58] sm:$0xff] }
 0xcf8   : > { %3721 = vmatprep.mubr.bf16.mxu0 %v5812_v44 }
 0xcff   : > { %3722 = vmatmul.mubr.bf16.gmra.mrb[32].mxu0 %v5814_v45 }
 0xd00   : > { %3729 = vmatprep.mubr.bf16.mxu0 %v5815_v36 }
 0xd07   : > { %3730 = vmatmul.mubr.bf16.gmra.mrb[36].mxu0 %v5817_v34 }
 0xd08   : > { %3737 = vmatprep.mubr.bf16.mxu0 %v5818_v46 }
 0xd0f   : > { %3738 = vmatmul.mubr.bf16.gmra.mrb[40].mxu0 %v5820_v37  ;;  %v3541_v37 = vld [vmem:[#allocation3 + $0x60] sm:$0xff] }
 0xd10   : > { %3745 = vmatprep.mubr.bf16.mxu0 %v5821_v35 }
 0xd17   : > { %3746 = vmatmul.mubr.bf16.gmra.mrb[44].mxu0 %v5823_v48 }
 0xdb2   : > { %v4916_v49 = vpop.f32.mrb[16].mxu0 }
 0xdb3   : > { %v4917_v51 = vpop.f32.mrb[17].mxu0 }
 0xdb4   : > { %v4918_v52 = vadd.f32 %v4917_v51, %v4916_v49  ;;  %v4919_v53 = vpop.f32.mrb[18].mxu0 }
 0xdb5   : > { %v4920_v55 = vpop.f32.mrb[19].mxu0 }
 0xdb6   : > { %v3754_v56 = vadd.f32 %v4918_v52, %v3529_v50  ;;  %v4921_v57 = vadd.f32 %v4920_v55, %v4919_v53  ;;  %v3542_v50 = vld [vmem:[#allocation3 + $0x68] sm:$0xff] }
 0xdb8   : > { %3770 = vst [vmem:[#allocation3] sm:$0xff] %v3754_v56  ;;  %v3755_v58 = vadd.f32 %v4921_v57, %v3530_v54  ;;  %v3543_v56 = vld [vmem:[#allocation3 + $0x70] sm:$0xff] }
 0xdba   : > { %3771 = vst [vmem:[#allocation3 + $0x8] sm:$0xff] %v3755_v58  ;;  %v4922_v60 = vpop.f32.mrb[20].mxu0 }
 0xdbb   : > { %v4923_v62 = vpop.f32.mrb[21].mxu0 }
 0xdbc   : > { %v4924_v63 = vadd.f32 %v4923_v62, %v4922_v60  ;;  %v4925_v0 = vpop.f32.mrb[22].mxu0 }
 0xdbd   : > { %v4926_v2 = vpop.f32.mrb[23].mxu0 }
 0xdbe   : > { %v3756_v3 = vadd.f32 %v4924_v63, %v3531_v61  ;;  %v4927_v4 = vadd.f32 %v4926_v2, %v4925_v0  ;;  %v3544_v61 = vld [vmem:[#allocation3 + $0x78] sm:$0xff] }
 0xdc0   : > { %3772 = vst [vmem:[#allocation3 + $0x10] sm:$0xff] %v3756_v3  ;;  %v3757_v5 = vadd.f32 %v4927_v4, %v3532_v47 }
 0xdc2   : > { %3773 = vst [vmem:[#allocation3 + $0x18] sm:$0xff] %v3757_v5  ;;  %v4928_v6 = vpop.f32.mrb[24].mxu0 }
 0xdc3   : > { %v4929_v8 = vpop.f32.mrb[25].mxu0 }
 0xdc4   : > { %v4930_v9 = vadd.f32 %v4929_v8, %v4928_v6  ;;  %v4931_v10 = vpop.f32.mrb[26].mxu0 }
 0xdc5   : > { %v4932_v12 = vpop.f32.mrb[27].mxu0 }
 0xdc6   : > { %v3758_v13 = vadd.f32 %v4930_v9, %v3533_v7  ;;  %v4933_v14 = vadd.f32 %v4932_v12, %v4931_v10 }
 0xdc8   : > { %3774 = vst [vmem:[#allocation3 + $0x20] sm:$0xff] %v3758_v13  ;;  %v3759_v59 = vadd.f32 %v4933_v14, %v3534_v11 }
 0xdca   : > { %3775 = vst [vmem:[#allocation3 + $0x28] sm:$0xff] %v3759_v59  ;;  %v4934_v15 = vpop.f32.mrb[28].mxu0 }
 0xdcb   : > { %v4935_v17 = vpop.f32.mrb[29].mxu0 }
 0xdcc   : > { %v4936_v1 = vadd.f32 %v4935_v17, %v4934_v15  ;;  %v4937_v19 = vpop.f32.mrb[30].mxu0 }
 0xdcd   : > { %v4938_v21 = vpop.f32.mrb[31].mxu0 }
 0xdce   : > { %v3760_v22 = vadd.f32 %v4936_v1, %v3535_v16  ;;  %v4939_v23 = vadd.f32 %v4938_v21, %v4937_v19 }
 0xdd0   : > { %3776 = vst [vmem:[#allocation3 + $0x30] sm:$0xff] %v3760_v22  ;;  %v3761_v24 = vadd.f32 %v4939_v23, %v3536_v20 }
 0xdd2   : > { %3777 = vst [vmem:[#allocation3 + $0x38] sm:$0xff] %v3761_v24  ;;  %v4940_v25 = vpop.f32.mrb[32].mxu0 }
 0xdd3   : > { %v4941_v27 = vpop.f32.mrb[33].mxu0 }
 0xdd4   : > { %v4942_v28 = vadd.f32 %v4941_v27, %v4940_v25  ;;  %v4943_v29 = vpop.f32.mrb[34].mxu0 }
 0xdd5   : > { %v4944_v31 = vpop.f32.mrb[35].mxu0 }
 0xdd6   : > { %v3762_v32 = vadd.f32 %v4942_v28, %v3537_v26  ;;  %v4945_v33 = vadd.f32 %v4944_v31, %v4943_v29 }
 0xdd8   : > { %3778 = vst [vmem:[#allocation3 + $0x40] sm:$0xff] %v3762_v32  ;;  %v3763_v38 = vadd.f32 %v4945_v33, %v3538_v30 }
 0xdda   : > { %3779 = vst [vmem:[#allocation3 + $0x48] sm:$0xff] %v3763_v38  ;;  %v4946_v39 = vpop.f32.mrb[36].mxu0 }
 0xddb   : > { %v4947_v18 = vpop.f32.mrb[37].mxu0 }
 0xddc   : > { %v4948_v41 = vadd.f32 %v4947_v18, %v4946_v39  ;;  %v4949_v42 = vpop.f32.mrb[38].mxu0 }
 0xddd   : > { %v4950_v44 = vpop.f32.mrb[39].mxu0 }
 0xdde   : > { %v3764_v45 = vadd.f32 %v4948_v41, %v3539_v40  ;;  %v4951_v36 = vadd.f32 %v4950_v44, %v4949_v42 }
 0xde0   : > { %3780 = vst [vmem:[#allocation3 + $0x50] sm:$0xff] %v3764_v45  ;;  %v3765_v34 = vadd.f32 %v4951_v36, %v3540_v43 }
 0xde2   : > { %3781 = vst [vmem:[#allocation3 + $0x58] sm:$0xff] %v3765_v34  ;;  %v4952_v46 = vpop.f32.mrb[40].mxu0 }
 0xde3   : > { %v4953_v35 = vpop.f32.mrb[41].mxu0 }
 0xde4   : > { %v4954_v48 = vadd.f32 %v4953_v35, %v4952_v46  ;;  %v4955_v49 = vpop.f32.mrb[42].mxu0 }
 0xde5   : > { %v4956_v51 = vpop.f32.mrb[43].mxu0 }
 0xde6   : > { %v3766_v52 = vadd.f32 %v4954_v48, %v3541_v37  ;;  %v4957_v53 = vadd.f32 %v4956_v51, %v4955_v49 }
 0xde8   : > { %3782 = vst [vmem:[#allocation3 + $0x60] sm:$0xff] %v3766_v52  ;;  %v3767_v54 = vadd.f32 %v4957_v53, %v3542_v50 }
 0xdea   : > { %3783 = vst [vmem:[#allocation3 + $0x68] sm:$0xff] %v3767_v54  ;;  %v4958_v55 = vpop.f32.mrb[44].mxu0 }
 0xdeb   : > { %v4959_v57 = vpop.f32.mrb[45].mxu0 }
 0xdec   : > { %v4960_v58 = vadd.f32 %v4959_v57, %v4958_v55  ;;  %v4961_v60 = vpop.f32.mrb[46].mxu0 }
 0xded   : > { %v4962_v62 = vpop.f32.mrb[47].mxu0 }
 0xdee   : > { %v3768_v63 = vadd.f32 %v4960_v58, %v3543_v56  ;;  %v4963_v0 = vadd.f32 %v4962_v62, %v4961_v60 }
 0xdf0   : > { %3784 = vst [vmem:[#allocation3 + $0x70] sm:$0xff] %v3768_v63  ;;  %v3769_v47 = vadd.f32 %v4963_v0, %v3544_v61 }
 0xdf2   : > { %3785 = vst [vmem:[#allocation3 + $0x78] sm:$0xff] %v3769_v47 }
 0xdf3 PF: > { %s7757_s8 = sld [smem:[#allocation32_spill]] }
 0xdf9   : > { %p4514_p10 = scmp.ne.s32.totalorder %s7757_s8, 4 }
 0xdfa   : > { %v3822_v2 = vld [vmem:[#allocation3] sm:$0xff] (!%p4514_p10)  ;;  %v3823_v3 = vld [vmem:[#allocation3 + $0x8] sm:$0xff] (!%p4514_p10)  ;;  %v3824_v4 = vld [vmem:[#allocation3 + $0x10] sm:$0xff] (!%p4514_p10) }
 0xdfb   : > { %3789 = sbr.rel (%p4514_p10) target bundleno = 3853 (0xf0d), region = 128  ;;  %v3838_v5 = vpack.c.bf16 (!%p4514_p10), %v3823_v3, %v3822_v2  ;;  %v3825_v6 = vld [vmem:[#allocation3 + $0x18] sm:$0xff] (!%p4514_p10)  ;;  %v3826_v8 = vld [vmem:[#allocation3 + $0x20] sm:$0xff] (!%p4514_p10)  ;;  %v3827_v9 = vld [vmem:[#allocation3 + $0x28] sm:$0xff] (!%p4514_p10) }
 0xdfc   : > { %v3839_v7 = vpack.c.bf16 (!%p4514_p10), %v3825_v6, %v3824_v4  ;;  %v3828_v10 = vld [vmem:[#allocation3 + $0x30] sm:$0xff] (!%p4514_p10)  ;;  %v3840_v11 = vpack.c.bf16 (!%p4514_p10), %v3827_v9, %v3826_v8  ;;  %v3829_v12 = vld [vmem:[#allocation3 + $0x38] sm:$0xff] (!%p4514_p10)  ;;  %v5824_v13 = vld [vmem:[%s6757_s24] sm:$0xff] (!%p4514_p10)  }
 0xdfd   : > { %5324 = vmatprep.subr.bf16.mxu0 (!%p4514_p10), %v3838_v5  ;;  %5420 = vmatprep.subr.bf16.mxu1 (!%p4514_p10), %v3838_v5  ;;  %v5825_v14 = vld [vmem:[%s6757_s24 + $0x40] sm:$0xff] (!%p4514_p10)   ;;  %v3841_v59 = vpack.c.bf16 (!%p4514_p10), %v3829_v12, %v3828_v10  ;;  %v3831_v16 = vld [vmem:[#allocation3 + $0x48] sm:$0xff] (!%p4514_p10)  ;;  %v3832_v1 = vld [vmem:[#allocation3 + $0x50] sm:$0xff] (!%p4514_p10) }
 0xdfe   : > { %5325 = vmatpush3.bf16.msra.mxu0 (!%p4514_p10), %v3838_v5  ;;  %5428 = vmatpush3.bf16.msra.mxu1 (!%p4514_p10), %v3838_v5  ;;  %v3830_v15 = vld [vmem:[#allocation3 + $0x40] sm:$0xff] (!%p4514_p10)  ;;  %v3833_v19 = vld [vmem:[#allocation3 + $0x58] sm:$0xff] (!%p4514_p10)  ;;  %v3835_v22 = vld [vmem:[#allocation3 + $0x68] sm:$0xff] (!%p4514_p10) }
 0xdff   : > { %5326 = vmatprep.subr.bf16.mxu0 (!%p4514_p10), %v3839_v7  ;;  %5421 = vmatprep.subr.bf16.mxu1 (!%p4514_p10), %v3839_v7  ;;  %v3842_v17 = vpack.c.bf16 (!%p4514_p10), %v3831_v16, %v3830_v15  ;;  %v3843_v20 = vpack.c.bf16 (!%p4514_p10), %v3833_v19, %v3832_v1  ;;  %v3834_v21 = vld [vmem:[#allocation3 + $0x60] sm:$0xff] (!%p4514_p10)  ;;  %v3836_v24 = vld [vmem:[#allocation3 + $0x70] sm:$0xff] (!%p4514_p10)  ;;  %v3837_v25 = vld [vmem:[#allocation3 + $0x78] sm:$0xff] (!%p4514_p10) }
 0xe00   : > { %5340 = vmatprep.mubr.bf16.mxu0 (!%p4514_p10), %v5824_v13  ;;  %5356 = vmatprep.mubr.bf16.mxu1 (!%p4514_p10), %v5825_v14  ;;  %v3844_v23 = vpack.c.bf16 (!%p4514_p10), %v3835_v22, %v3834_v21  ;;  %v3845_v26 = vpack.c.bf16 (!%p4514_p10), %v3837_v25, %v3836_v24  ;;  %v5826_v27 = vld [vmem:[%s6757_s24 + $0x8] sm:$0xff] (!%p4514_p10)   ;;  %v5828_v29 = vld [vmem:[%s6757_s24 + $0x10] sm:$0xff] (!%p4514_p10)   ;;  %v5830_v31 = vld [vmem:[%s6757_s24 + $0x18] sm:$0xff] (!%p4514_p10)  }
 0xe01   : > { %v5827_v28 = vld [vmem:[%s6757_s24 + $0x48] sm:$0xff] (!%p4514_p10)   ;;  %v5829_v30 = vld [vmem:[%s6757_s24 + $0x50] sm:$0xff] (!%p4514_p10)   ;;  %v5831_v32 = vld [vmem:[%s6757_s24 + $0x58] sm:$0xff] (!%p4514_p10)  }
 0xe02   : > { %5327 = vmatpush3.bf16.msra.mxu0 %v3839_v7  ;;  %5429 = vmatpush3.bf16.msra.mxu1 %v3839_v7  ;;  %v5832_v33 = vld [vmem:[%s6757_s24 + $0x20] sm:$0xff]   ;;  %v5834_v39 = vld [vmem:[%s6757_s24 + $0x28] sm:$0xff]   ;;  %v5836_v18 = vld [vmem:[%s6757_s24 + $0x30] sm:$0xff]  }
 0xe03   : > { %5328 = vmatprep.subr.bf16.mxu0 %v3840_v11  ;;  %5422 = vmatprep.subr.bf16.mxu1 %v3840_v11  ;;  %v5833_v38 = vld [vmem:[%s6757_s24 + $0x60] sm:$0xff]   ;;  %v5835_v40 = vld [vmem:[%s6757_s24 + $0x68] sm:$0xff]   ;;  %v5837_v41 = vld [vmem:[%s6757_s24 + $0x70] sm:$0xff]  }
 0xe04   : > { %v5838_v42 = vld [vmem:[%s6757_s24 + $0x38] sm:$0xff]  }
 0xe05   : > { %v5839_v43 = vld [vmem:[%s6757_s24 + $0x78] sm:$0xff]  }
 0xe06   : > { %5329 = vmatpush3.bf16.msra.mxu0 %v3840_v11  ;;  %5430 = vmatpush3.bf16.msra.mxu1 %v3840_v11 }
 0xe07   : > { %5330 = vmatprep.subr.bf16.mxu0 %v3841_v59  ;;  %5423 = vmatprep.subr.bf16.mxu1 %v3841_v59 }
 0xe0a   : > { %5331 = vmatpush3.bf16.msra.mxu0 %v3841_v59  ;;  %5431 = vmatpush3.bf16.msra.mxu1 %v3841_v59 }
 0xe0b   : > { %5332 = vmatprep.subr.bf16.mxu0 %v3842_v17  ;;  %5424 = vmatprep.subr.bf16.mxu1 %v3842_v17 }
 0xe0e   : > { %5333 = vmatpush3.bf16.msra.mxu0 %v3842_v17  ;;  %5432 = vmatpush3.bf16.msra.mxu1 %v3842_v17 }
 0xe0f   : > { %5334 = vmatprep.subr.bf16.mxu0 %v3843_v20  ;;  %5425 = vmatprep.subr.bf16.mxu1 %v3843_v20 }
 0xe12   : > { %5335 = vmatpush3.bf16.msra.mxu0 %v3843_v20  ;;  %5433 = vmatpush3.bf16.msra.mxu1 %v3843_v20 }
 0xe13   : > { %5336 = vmatprep.subr.bf16.mxu0 %v3844_v23  ;;  %5426 = vmatprep.subr.bf16.mxu1 %v3844_v23 }
 0xe16   : > { %5337 = vmatpush3.bf16.msra.mxu0 %v3844_v23  ;;  %5434 = vmatpush3.bf16.msra.mxu1 %v3844_v23 }
 0xe17   : > { %5338 = vmatprep.subr.bf16.mxu0 %v3845_v26  ;;  %5427 = vmatprep.subr.bf16.mxu1 %v3845_v26 }
 0xe1a   : > { %5339 = vmatpush3.bf16.msra.mxu0 %v3845_v26  ;;  %5435 = vmatpush3.bf16.msra.mxu1 %v3845_v26 }
 0xe1d   : > { %5341 = vmatmul.mubr.bf16.vlgmr.msra.gmra.mrb[0].mxu0 %v5826_v27  ;;  %5357 = vmatmul.mubr.bf16.vlgmr.msra.gmra.mrb[0].mxu1 %v5827_v28 }
 0xe1e   : > { %5344 = vmatprep.mubr.bf16.mxu0 %v5828_v29  ;;  %5360 = vmatprep.mubr.bf16.mxu1 %v5829_v30 }
 0xe25   : > { %5345 = vmatmul.mubr.bf16.gmra.mrb[4].mxu0 %v5830_v31  ;;  %5361 = vmatmul.mubr.bf16.gmra.mrb[4].mxu1 %v5831_v32 }
 0xe26   : > { %5348 = vmatprep.mubr.bf16.mxu0 %v5832_v33  ;;  %5364 = vmatprep.mubr.bf16.mxu1 %v5833_v38 }
 0xe2d   : > { %5349 = vmatmul.mubr.bf16.gmra.mrb[8].mxu0 %v5834_v39  ;;  %5365 = vmatmul.mubr.bf16.gmra.mrb[8].mxu1 %v5835_v40 }
 0xe2e   : > { %5352 = vmatprep.mubr.bf16.mxu0 %v5836_v18  ;;  %5368 = vmatprep.mubr.bf16.mxu1 %v5837_v41 }
 0xe35   : > { %5353 = vmatmul.mubr.bf16.gmra.mrb[12].mxu0 %v5838_v42  ;;  %5369 = vmatmul.mubr.bf16.gmra.mrb[12].mxu1 %v5839_v43 }
 0xef0   : > { %v5342_v44 = vpop.f32.mrb[0].mxu0  ;;  %v5358_v45 = vpop.f32.mrb[0].mxu1 }
 0xef1   : > { %4105 = vst [vmem:[%s6774_s30 + $0x10] sm:$0xff] %v5342_v44  ;;  %4121 = vst [vmem:[%s6774_s30 + $0x90] sm:$0xff] %v5358_v45  ;;  %v3976_v36 = vpop.f32.mrb[1].mxu0  ;;  %v4040_v34 = vpop.f32.mrb[1].mxu1 }
 0xef2   : > { %4103 = vst [vmem:[%s6774_s30] sm:$0xff] %v3976_v36  ;;  %4119 = vst [vmem:[%s6774_s30 + $0x80] sm:$0xff] %v4040_v34  ;;  %v5343_v46 = vpop.f32.mrb[2].mxu0  ;;  %v5359_v37 = vpop.f32.mrb[2].mxu1 }
 0xef3   : > { %4106 = vst [vmem:[%s6774_s30 + $0x18] sm:$0xff] %v5343_v46  ;;  %4122 = vst [vmem:[%s6774_s30 + $0x98] sm:$0xff] %v5359_v37  ;;  %v3979_v35 = vpop.f32.mrb[3].mxu0  ;;  %v4043_v48 = vpop.f32.mrb[3].mxu1 }
 0xef4   : > { %4104 = vst [vmem:[%s6774_s30 + $0x8] sm:$0xff] %v3979_v35  ;;  %4120 = vst [vmem:[%s6774_s30 + $0x88] sm:$0xff] %v4043_v48 }
 0xef8   : > { %v5346_v49 = vpop.f32.mrb[4].mxu0  ;;  %v5362_v50 = vpop.f32.mrb[4].mxu1 }
 0xef9   : > { %4109 = vst [vmem:[%s6774_s30 + $0x30] sm:$0xff] %v5346_v49  ;;  %4125 = vst [vmem:[%s6774_s30 + $0xb0] sm:$0xff] %v5362_v50  ;;  %v3992_v51 = vpop.f32.mrb[5].mxu0  ;;  %v4056_v52 = vpop.f32.mrb[5].mxu1 }
 0xefa   : > { %4107 = vst [vmem:[%s6774_s30 + $0x20] sm:$0xff] %v3992_v51  ;;  %4123 = vst [vmem:[%s6774_s30 + $0xa0] sm:$0xff] %v4056_v52  ;;  %v5347_v53 = vpop.f32.mrb[6].mxu0  ;;  %v5363_v54 = vpop.f32.mrb[6].mxu1 }
 0xefb   : > { %4110 = vst [vmem:[%s6774_s30 + $0x38] sm:$0xff] %v5347_v53  ;;  %4126 = vst [vmem:[%s6774_s30 + $0xb8] sm:$0xff] %v5363_v54  ;;  %v3995_v55 = vpop.f32.mrb[7].mxu0  ;;  %v4059_v56 = vpop.f32.mrb[7].mxu1 }
 0xefc   : > { %4108 = vst [vmem:[%s6774_s30 + $0x28] sm:$0xff] %v3995_v55  ;;  %4124 = vst [vmem:[%s6774_s30 + $0xa8] sm:$0xff] %v4059_v56 }
 0xf00   : > { %v5350_v57 = vpop.f32.mrb[8].mxu0  ;;  %v5366_v58 = vpop.f32.mrb[8].mxu1 }
 0xf01   : > { %4113 = vst [vmem:[%s6774_s30 + $0x50] sm:$0xff] %v5350_v57  ;;  %4129 = vst [vmem:[%s6774_s30 + $0xd0] sm:$0xff] %v5366_v58  ;;  %v4008_v60 = vpop.f32.mrb[9].mxu0  ;;  %v4072_v61 = vpop.f32.mrb[9].mxu1 }
 0xf02   : > { %4111 = vst [vmem:[%s6774_s30 + $0x40] sm:$0xff] %v4008_v60  ;;  %4127 = vst [vmem:[%s6774_s30 + $0xc0] sm:$0xff] %v4072_v61  ;;  %v5351_v62 = vpop.f32.mrb[10].mxu0  ;;  %v5367_v63 = vpop.f32.mrb[10].mxu1 }
 0xf03   : > { %4114 = vst [vmem:[%s6774_s30 + $0x58] sm:$0xff] %v5351_v62  ;;  %4130 = vst [vmem:[%s6774_s30 + $0xd8] sm:$0xff] %v5367_v63  ;;  %v4011_v0 = vpop.f32.mrb[11].mxu0  ;;  %v4075_v47 = vpop.f32.mrb[11].mxu1 }
 0xf04   : > { %4112 = vst [vmem:[%s6774_s30 + $0x48] sm:$0xff] %v4011_v0  ;;  %4128 = vst [vmem:[%s6774_s30 + $0xc8] sm:$0xff] %v4075_v47 }
 0xf08   : > { %v5354_v2 = vpop.f32.mrb[12].mxu0  ;;  %v5370_v3 = vpop.f32.mrb[12].mxu1 }
 0xf09   : > { %4117 = vst [vmem:[%s6774_s30 + $0x70] sm:$0xff] %v5354_v2  ;;  %4133 = vst [vmem:[%s6774_s30 + $0xf0] sm:$0xff] %v5370_v3  ;;  %v4024_v4 = vpop.f32.mrb[13].mxu0  ;;  %v4088_v5 = vpop.f32.mrb[13].mxu1 }
 0xf0a   : > { %4115 = vst [vmem:[%s6774_s30 + $0x60] sm:$0xff] %v4024_v4  ;;  %4131 = vst [vmem:[%s6774_s30 + $0xe0] sm:$0xff] %v4088_v5  ;;  %v5355_v6 = vpop.f32.mrb[14].mxu0  ;;  %v5371_v7 = vpop.f32.mrb[14].mxu1 }
 0xf0b   : > { %4118 = vst [vmem:[%s6774_s30 + $0x78] sm:$0xff] %v5355_v6  ;;  %4134 = vst [vmem:[%s6774_s30 + $0xf8] sm:$0xff] %v5371_v7  ;;  %v4027_v8 = vpop.f32.mrb[15].mxu0  ;;  %v4091_v9 = vpop.f32.mrb[15].mxu1 }
 0xf0c   : > { %4116 = vst [vmem:[%s6774_s30 + $0x68] sm:$0xff] %v4027_v8  ;;  %4132 = vst [vmem:[%s6774_s30 + $0xe8] sm:$0xff] %v4091_v9 }
 0xf0d PF: > { %s7758_s24 = sld [smem:[#allocation32_spill]]  ;;  %s7759_s7 = sld [smem:[#allocation31_spill]] }
 0xf0e   : > { %s7761_s6 = sld [smem:[#allocation34_spill]]  ;;  %s4151_s29 = sshll.u32 %s6774_s30, 4  ;;  %s7530_s29 = int_to_ptr.vmem [resolvable:$true] %s4151_s29 }
 0xf0f   : > { %s7762_s23 = sld [smem:[#allocation49_spill]]  ;;  %s7539_s2 = scalar_lea.sflag [#allocation6], %s571_s10 }
 0xf10   : > { %s6042_s15 = scalar_lea.vmem %s7530_s29, 4096  ;;  %s6246_s30 = smov [#allocation16]  }
 0xf11   : > { %p6043_p11 = scmp.ne.s32.totalorder %s7530_s29, %s6042_s15  ;;  %s6046_s11 = sshll.u32 %s6246_s30, 4  ;;  %s6047_s11 = int_to_ptr.vmem [resolvable:$false] %s6046_s11 }
 0xf12   : > { %s6048_s16 = scalar_lea.vmem %s6047_s11, 8192  ;;  %p6049_p4 = scmp.lt.s32.totalorder %s7530_s29, %s6047_s11 }
 0xf13   : > { %p4143_p9 = scmp.eq.s32.totalorder %s7758_s24, 4  ;;  %p6050_p1 = scmp.lt.s32.totalorder %s6048_s16, %s6042_s15 }
 0xf14   : > { %p7764_p13 = scmp.ne.s32.totalorder %s7761_s6, 0 }
 0xf15   : > { %s7800_s7 = smov (!%p4143_p9, %s7759_s7), 0  ;;  %s7763_s4 = smov %s7762_s23 }
 0xf16   : > { %s4539_s20 = sshll.u32 %s7800_s7, 12  ;;  %p6044_p8 = pnand %p6043_p11, %p7764_p13 }
 0xf17   : > { %s7535_s27 = scalar_lea.hbm %s7762_s23, %s4539_s20  ;;  %p6051_p5 = por %p6050_p1, %p6049_p4 }
 0xf18   : > { %p6045_p7 = pneg %p6044_p8 }
 0xf1a   : > { %p6052_p3 = pnand %p6051_p5, %p6045_p7 }
 0xf1c   : > { %6055 = shalt.err (!%p6052_p3)
}
 0xf1d   : > { %s6056_s10 = scalar_lea.hbm %s7535_s27, 4096  ;;  %s6060_s7 = scalar_lea.hbm %s7763_s4, 8192 }
 0xf1e   : > { %p6057_p0 = scmp.ne.s32.totalorder %s7535_s27, %s6056_s10  ;;  %p6061_p6 = scmp.lt.u32.totalorder %s7535_s27, %s7763_s4 }
 0xf1f   : > { %p6062_p10 = scmp.lt.u32.totalorder %s6060_s7, %s6056_s10  ;;  %p6064_p11 = scmp.lt.u32.totalorder %s6056_s10, %s7535_s27 }
 0xf20   : > { %p6058_p12 = pnand %p6057_p0, %p7764_p13 }
 0xf21   : > { %p6063_p9 = por %p6062_p10, %p6061_p6 }
 0xf22   : > { %p6059_p2 = pneg %p6058_p12 }
 0xf23   : > { %p6065_p8 = por %p6064_p11, %p6063_p9 }
 0xf25   : > { %p6066_p7 = pnand %p6065_p8, %p6059_p2 }
 0xf27   : > { %6069 = shalt.err (!%p6066_p7)
}
 0xf28   : > { %s6247_s0 = smov 128   ;;  %s6248_s18 = smov 8  }
 0xf29   : > { %5458 = dma.vmem_to_hbm [thread:$0]  (%p7764_p13), %s7530_s29, 4096, %s7535_s27, %s7539_s2, %s6247_s0, %s6247_s0, %s6248_s18  }
 0xf2a PF: > { %s7765_s23 = sld [smem:[#allocation23_spill]]  ;;  %s7766_s15 = sld [smem:[#allocation35_spill]] }
 0xf2b   : > { %p5496_p4 = scmp.ge.s32.totalorder %s6228_s14, 2 }
 0xf30   : > { %s4166_s30 = sand.u32 1, %s7765_s23   ;;  %p7767_p1 = scmp.ne.s32.totalorder %s7766_s15, 0 }
 0xf31   : > { %s4167_s11 = scalar_lea.sflag [#allocation6], %s4166_s30 }
 0xf32   : > { %p5484_p5 = pnand %p5496_p4, %p7767_p1 }
 0xf34   : > { %6159 = dma.done.wait (!%p5484_p5), %s4167_s11, 4096  }
 0xf35   : > { %6161 = vsyncadd (!%p5484_p5), %s4167_s11, 4294963200  ;;  %s32_s14 = sadd.s32 1, %s6228_s14   ;;  %s7769_s17 = sld [smem:[#allocation24_spill]] }
 0xf36   : > { %p7568_p3 = scmp.ge.s32.totalorder %s32_s14, 12   ;;  %s7770_s20 = sld [smem:[#allocation26_spill]] }
 0xf37   : > { %s7771_s6 = sld [smem:[#allocation27_spill]]  ;;  %s7772_s23 = sld [smem:[#allocation28_spill]] }
 0xf38   : > { %s7773_s29 = sld [smem:[#allocation38_spill]]  ;;  %s7774_s27 = sld [smem:[#allocation30_spill]] }
 0xf39   : > { %s7775_s2 = smov %s6630_s26  ;;  %s7776_s10 = smov %s7792_s21 }
 0xf3a   : > { %s7777_s8 = smov %s7796_s22  ;;  %s7778_s18 = smov %s6172_s19 }
 0xf3b   : > { %s7779_s19 = smov %s6523_s3  ;;  %s7781_s22 = smov %s7798_s1 }
 0xf3c   : > { %s7782_s24 = smov %s6196_s25  ;;  %s7788_s30 = smov %s6224_s13 }
 0xf3d   : > { %s7780_s21 = smov %s7771_s6  ;;  %s7790_s13 = smov %s7777_s8 }
 0xf3e   : > { %s7783_s25 = smov %s7773_s29  ;;  %s7784_s26 = smov %s7774_s27 }
 0xf3f   : > { %s7785_s27 = smov %s6208_s28  ;;  %s7786_s28 = smov %s7775_s2 }
 0xf40   : > { %s7787_s29 = smov %s6220_s12  ;;  %s7789_s12 = smov %s7776_s10 }
 0xf41   :  { %31 = sbr.rel (!%p7568_p3) target bundleno = 28 (0x1c), region = 185 }
 0xf48   :  { %4172 = vsyncpa [#allocation5], 1 }
 0xf49   :  { %4174 = vsyncpa [#allocation5 + $0x1], 1 }
 0xf4a   :  { %4175 = vsyncpa [#allocation8], 1 }
 0xf4b   :  { %4177 = vsyncpa [#allocation8 + $0x1], 1 }
 0xf4c   :  { %4178 = vsyncpa [#allocation11], 1 }
 0xf4d   :  { %4179 = vsyncpa [#allocation14], 1 }
 0xf4e   :  { %4180 = vsyncpa [#allocation6], 1 }
 0xf4f   :  { %4182 = vsyncpa [#allocation6 + $0x1], 1 }

</bundles_post_ra>
